<compile_context>
chip_gen: v7x
topology: tpu7x:2x2x1
jax: 0.10.0
libtpu: 0.0.40
codegen_flags: <defaults>
</compile_context>

<pallas_src>
import math

import jax
import jax.numpy as jnp
from jax.experimental import pallas as pl
from jax.experimental.pallas import tpu as pltpu

NUM_NODES = 12  # FlowSpeed(12): len2 (the attended sequence dim) must be 12


def _init_flow_speed_params(key, num_nodes):
    """Deterministic xavier_normal_ init for the (num_nodes, 1) FlowSpeed params."""
    k1, k2 = jax.random.split(key)
    fan_in, fan_out = 1, num_nodes   # PyTorch: fan_in = size(1), fan_out = size(0)
    std = math.sqrt(2.0 / (fan_in + fan_out))
    kj = std * jax.random.normal(k1, (num_nodes, 1), dtype=jnp.float32)
    vf = std * jax.random.normal(k2, (num_nodes, 1), dtype=jnp.float32)
    return kj, vf


def _cross_attn_kernel(kj_ref, vfp_ref, bias_ref,
                       qf_ref, kf_ref, vf_ref, qs_ref, ks_ref, vs_ref,
                       out_ref):
    """All four cross-attention branches as one batched attention.

    Tensor blocks : (G, L2, Dk) float32, G = B * n_heads * len1
    Param blocks  : (L2, 1)  float32 (FlowSpeed Kj / Vf)
    Bias block    : (L2, L2) float32 additive mask bias (0 = keep, -1e9 = masked)
    Output block  : (4*G, L2, Dk), branch-major order [ff | fs | sf | ss]
    """
    qf = qf_ref[...]
    kf = kf_ref[...]
    vf = vf_ref[...]
    qs = qs_ref[...]
    ks = ks_ref[...]
    vs = vs_ref[...]

    dk = qf.shape[-1]
    scale = 1.0 / math.sqrt(dk)

    # FlowSpeed: Kj * (speed - speed^2 / (Vf + 1e-5)).  One exact reciprocal over
    # the 12-element parameter replaces a per-element divide over (G, L2, Dk).
    kj = kj_ref[...]                                 # (L2, 1)
    inv_vf = 1.0 / (vfp_ref[...] + 1e-5)             # (L2, 1), exact
    qf_from_speed = kj * (qs - qs * qs * inv_vf)

    # Fuse the four branches along the group axis (leading-axis concat only):
    #   branch 0: softmax(Qf Kf^T) Vf              (context_flow_flow)
    #   branch 1: softmax(Kf Qf_from_speed^T) Vf   (context_flow_speed)
    #   branch 2: softmax(Ks Qf^T) Vs              (context_speed_flow)
    #   branch 3: softmax(Qs Ks^T) Vs              (context_speed_speed)
    q_all = jnp.concatenate([qf, kf, ks, qs], axis=0)             # (4G, L2, Dk)
    k_all = jnp.concatenate([kf, qf_from_speed, qf, ks], axis=0)  # (4G, L2, Dk)
    v_all = jnp.concatenate([vf, vf, vs, vs], axis=0)             # (4G, L2, Dk)

    bias = bias_ref[...][None, :, :]                               # (1, L2, L2)

    # Exactly two dot_generals + one softmax for all four branches.
    s = jnp.einsum('gqd,gkd->gqk', q_all, k_all,
                   preferred_element_type=jnp.float32) * scale + bias
    m = jnp.max(s, axis=-1, keepdims=True)
    e = jnp.exp(s - m)
    p = e / jnp.sum(e, axis=-1, keepdims=True)        # exact divide (accuracy)
    ctx = jnp.einsum('gqk,gkd->gqd', p.astype(v_all.dtype), v_all,
                     preferred_element_type=jnp.float32)          # (4G, L2, Dk)

    # One stacked, relayout-free store.
    # TODO(synk): a lane-dense (4, G, L2*Dk) output (last dim >= 128) would avoid
    # masked partial stores, but needs an in-kernel minor-dim merge reshape whose
    # Mosaic lowering is not guaranteed for (12, 16) tiles; kept the safe layout.
    out_ref[...] = ctx


def temporal_cross_attention(Qf, Kf, Vf, Qs, Ks, Vs, kj, vf_param, mask=None):
    """TemporalScaledDotProductforCrossAttention forward as one Pallas call."""
    B, H, L1, L2, Dk = Qf.shape
    assert L2 == NUM_NODES, "FlowSpeed(12) requires len2 == 12"
    G = B * H * L1

    def flat(x):
        return x.reshape(G, L2, Dk).astype(jnp.float32)

    # Additive mask bias, hoisted out of the kernel: 0 = keep, -1e9 = masked.
    # (Equivalent to masked_fill(mask == 0, -1e9) after softmax: exp underflows
    # to exactly 0 either way.)
    if mask is None:
        bias = jnp.zeros((L2, L2), dtype=jnp.float32)
    else:
        mask_arr = jnp.asarray(mask).reshape(L2, L2)
        bias = jnp.where(mask_arr == 0, jnp.float32(-1e9), jnp.float32(0.0))

    param_spec = pl.BlockSpec((L2, 1), lambda g: (0, 0))
    bias_spec = pl.BlockSpec((L2, L2), lambda g: (0, 0))
    tens_spec = pl.BlockSpec((G, L2, Dk), lambda g: (0, 0, 0))
    out_spec = pl.BlockSpec((4 * G, L2, Dk), lambda g: (0, 0, 0))

    # Whole problem (~120 KiB) fits comfortably in VMEM on every generation ->
    # single grid step (no per-step overhead on single-TC v5e/v6e).
    # TODO(synk): on v7x a 2-way CORE_PARALLEL split could use both TensorCores,
    # but per-core launch overhead likely eats the 2x at this problem size.
    out = pl.pallas_call(
        _cross_attn_kernel,
        out_shape=jax.ShapeDtypeStruct((4 * G, L2, Dk), jnp.float32),
        grid_spec=pltpu.PrefetchScalarGridSpec(
            num_scalar_prefetch=0,
            grid=(1,),
            in_specs=[param_spec, param_spec, bias_spec,
                      tens_spec, tens_spec, tens_spec,
                      tens_spec, tens_spec, tens_spec],
            out_specs=out_spec,
        ),
        compiler_params=pltpu.CompilerParams(
            dimension_semantics=("arbitrary",)),
    )(kj, vf_param, bias,
      flat(Qf), flat(Kf), flat(Vf), flat(Qs), flat(Ks), flat(Vs))

    out = out.reshape(4, B, H, L1, L2, Dk)
    return out[0], out[1], out[2], out[3]


# TODO(synk): the surrounding STTransformerBlock_decoder ops (Q/K/V and fc_out
# linear projections, the nn.Linear(2,1) branch mixer, LayerNorms, feed-forward,
# GCN, sinusoid position tables, dropout and the gated fusion) are left to XLA
# outside this kernel; only the FlowSpeed cross-attention core is fused.


def _reference(Qf, Kf, Vf, Qs, Ks, Vs, kj, vf_param, mask=None):
    """Pure-JAX replica of the PyTorch TemporalScaledDotProductforCrossAttention."""
    d_k = Qf.shape[-1]
    scale = 1.0 / math.sqrt(d_k)
    hi = jax.lax.Precision.HIGHEST
    qf_from_speed = kj * (Qs - Qs ** 2 / (vf_param + 1e-5))

    def scores(a, b):
        s = jnp.matmul(a, jnp.swapaxes(b, -1, -2), precision=hi) * scale
        if mask is not None:
            s = jnp.where(mask == 0, -1e9, s)
        return s

    def ctx(s, v):
        return jnp.matmul(jax.nn.softmax(s, axis=-1), v, precision=hi)

    return (ctx(scores(Qf, Kf), Vf),
            ctx(scores(Kf, qf_from_speed), Vf),
            ctx(scores(Ks, Qf), Vs),
            ctx(scores(Qs, Ks), Vs))


if __name__ == "__main__":
    key = jax.random.PRNGKey(0)
    kp, *keys = jax.random.split(key, 7)

    # Shapes implied by the decoder: embed_size=32, heads=2 -> head_dim=16,
    # batch=2, N(vertices)=4, T=12 (FlowSpeed(12) fixes the temporal length).
    B, H, L1, L2, Dk = 2, 2, 4, NUM_NODES, 16
    shape = (B, H, L1, L2, Dk)
    Qf = jax.random.normal(keys[0], shape, dtype=jnp.float32)
    Kf = jax.random.normal(keys[1], shape, dtype=jnp.float32)
    Vf = jax.random.normal(keys[2], shape, dtype=jnp.float32)
    Qs = jax.random.normal(keys[3], shape, dtype=jnp.float32)
    Ks = jax.random.normal(keys[4], shape, dtype=jnp.float32)
    Vs = jax.random.normal(keys[5], shape, dtype=jnp.float32)

    kj, vf_param = _init_flow_speed_params(kp, NUM_NODES)

    # Causal (subsequent) mask, as used by the decoder's first TTransformer call:
    # key position j allowed iff j <= query position i.
    tgt_mask = (jnp.triu(jnp.ones((L2, L2), dtype=jnp.float32), k=1) == 0
                ).astype(jnp.float32)

    # Softmax division is exact now (no approximate reciprocal); the tolerance
    # covers f32 accumulation-order differences and the sensitivity of the
    # saturated flow_speed branch (qf_from_speed can be O(100) when Vf+1e-5 is
    # small), not any approximation inside the kernel.
    tol = dict(atol=1e-3, rtol=1e-3)

    for m in (tgt_mask, None):
        outs = temporal_cross_attention(Qf, Kf, Vf, Qs, Ks, Vs, kj, vf_param,
                                        mask=m)
        outs = jax.block_until_ready(outs)
        refs = _reference(Qf, Kf, Vf, Qs, Ks, Vs, kj, vf_param, mask=m)
        for o, r in zip(outs, refs):
            assert o.shape == shape
            err = float(jnp.max(jnp.abs(o - r)))
            assert jnp.allclose(o, r, **tol), err

    print("KERNEL_OK")
</pallas_src>

<mosaic_0001>
module attributes {stable_mosaic.version = 11 : i64} {
  func.func @_cross_attn_kernel(%arg0: i32, %arg1: memref<12x1xf32, #tpu.memory_space<vmem>>, %arg2: memref<12x1xf32, #tpu.memory_space<vmem>>, %arg3: memref<12x12xf32, #tpu.memory_space<vmem>>, %arg4: memref<16x12x16xf32, #tpu.memory_space<vmem>>, %arg5: memref<16x12x16xf32, #tpu.memory_space<vmem>>, %arg6: memref<16x12x16xf32, #tpu.memory_space<vmem>>, %arg7: memref<16x12x16xf32, #tpu.memory_space<vmem>>, %arg8: memref<16x12x16xf32, #tpu.memory_space<vmem>>, %arg9: memref<16x12x16xf32, #tpu.memory_space<vmem>>, %arg10: memref<64x12x16xf32, #tpu.memory_space<vmem>>) attributes {dimension_semantics = [#tpu.dimension_semantics<arbitrary>], iteration_bounds = array<i64: 1>, scalar_prefetch = 0 : i64, scratch_operands = 0 : i64, tpu.core_type = #tpu.core_type<tc>, window_params = [{pipeline_mode = #tpu.pipeline_mode<synchronous>, transform_indices = @transform_0, window_bounds = array<i64: 12, 1>}, {pipeline_mode = #tpu.pipeline_mode<synchronous>, transform_indices = @transform_1, window_bounds = array<i64: 12, 1>}, {pipeline_mode = #tpu.pipeline_mode<synchronous>, transform_indices = @transform_2, window_bounds = array<i64: 12, 12>}, {pipeline_mode = #tpu.pipeline_mode<synchronous>, transform_indices = @transform_3, window_bounds = array<i64: 16, 12, 16>}, {pipeline_mode = #tpu.pipeline_mode<synchronous>, transform_indices = @transform_4, window_bounds = array<i64: 16, 12, 16>}, {pipeline_mode = #tpu.pipeline_mode<synchronous>, transform_indices = @transform_5, window_bounds = array<i64: 16, 12, 16>}, {pipeline_mode = #tpu.pipeline_mode<synchronous>, transform_indices = @transform_6, window_bounds = array<i64: 16, 12, 16>}, {pipeline_mode = #tpu.pipeline_mode<synchronous>, transform_indices = @transform_7, window_bounds = array<i64: 16, 12, 16>}, {pipeline_mode = #tpu.pipeline_mode<synchronous>, transform_indices = @transform_8, window_bounds = array<i64: 16, 12, 16>}, {pipeline_mode = #tpu.pipeline_mode<synchronous>, transform_indices = @transform_9, window_bounds = array<i64: 64, 12, 16>}]} {
    %c0 = arith.constant 0 : index
    %c0_0 = arith.constant 0 : index
    %c0_1 = arith.constant 0 : index
    %0 = vector.load %arg4[%c0, %c0_0, %c0_1] : memref<16x12x16xf32, #tpu.memory_space<vmem>>, vector<16x12x16xf32>
    %c0_2 = arith.constant 0 : index
    %c0_3 = arith.constant 0 : index
    %c0_4 = arith.constant 0 : index
    %1 = vector.load %arg5[%c0_2, %c0_3, %c0_4] : memref<16x12x16xf32, #tpu.memory_space<vmem>>, vector<16x12x16xf32>
    %c0_5 = arith.constant 0 : index
    %c0_6 = arith.constant 0 : index
    %c0_7 = arith.constant 0 : index
    %2 = vector.load %arg6[%c0_5, %c0_6, %c0_7] : memref<16x12x16xf32, #tpu.memory_space<vmem>>, vector<16x12x16xf32>
    %c0_8 = arith.constant 0 : index
    %c0_9 = arith.constant 0 : index
    %c0_10 = arith.constant 0 : index
    %3 = vector.load %arg7[%c0_8, %c0_9, %c0_10] : memref<16x12x16xf32, #tpu.memory_space<vmem>>, vector<16x12x16xf32>
    %c0_11 = arith.constant 0 : index
    %c0_12 = arith.constant 0 : index
    %c0_13 = arith.constant 0 : index
    %4 = vector.load %arg8[%c0_11, %c0_12, %c0_13] : memref<16x12x16xf32, #tpu.memory_space<vmem>>, vector<16x12x16xf32>
    %c0_14 = arith.constant 0 : index
    %c0_15 = arith.constant 0 : index
    %c0_16 = arith.constant 0 : index
    %5 = vector.load %arg9[%c0_14, %c0_15, %c0_16] : memref<16x12x16xf32, #tpu.memory_space<vmem>>, vector<16x12x16xf32>
    %c0_17 = arith.constant 0 : index
    %c0_18 = arith.constant 0 : index
    %6 = vector.load %arg1[%c0_17, %c0_18] : memref<12x1xf32, #tpu.memory_space<vmem>>, vector<12x1xf32>
    %c0_19 = arith.constant 0 : index
    %c0_20 = arith.constant 0 : index
    %7 = vector.load %arg2[%c0_19, %c0_20] : memref<12x1xf32, #tpu.memory_space<vmem>>, vector<12x1xf32>
    %cst = arith.constant 9.99999974E-6 : f32
    %8 = vector.broadcast %cst : f32 to vector<12x1xf32>
    %9 = arith.addf %7, %8 : vector<12x1xf32>
    %cst_21 = arith.constant 1.000000e+00 : f32
    %10 = vector.broadcast %cst_21 : f32 to vector<12x1xf32>
    %11 = arith.divf %10, %9 : vector<12x1xf32>
    %12 = arith.mulf %3, %3 : vector<16x12x16xf32>
    %13 = vector.shape_cast %11 : vector<12x1xf32> to vector<1x12x1xf32>
    %14 = vector.broadcast %13 : vector<1x12x1xf32> to vector<16x12x16xf32>
    %15 = arith.mulf %12, %14 : vector<16x12x16xf32>
    %16 = arith.subf %3, %15 : vector<16x12x16xf32>
    %17 = vector.shape_cast %6 : vector<12x1xf32> to vector<1x12x1xf32>
    %18 = vector.broadcast %17 : vector<1x12x1xf32> to vector<16x12x16xf32>
    %19 = arith.mulf %18, %16 : vector<16x12x16xf32>
    %20 = tpu.concatenate %0, %1, %4, %3 in 0 : vector<16x12x16xf32>, vector<16x12x16xf32>, vector<16x12x16xf32>, vector<16x12x16xf32> -> vector<64x12x16xf32>
    %21 = tpu.concatenate %1, %19, %0, %4 in 0 : vector<16x12x16xf32>, vector<16x12x16xf32>, vector<16x12x16xf32>, vector<16x12x16xf32> -> vector<64x12x16xf32>
    %22 = tpu.concatenate %2, %2, %5, %5 in 0 : vector<16x12x16xf32>, vector<16x12x16xf32>, vector<16x12x16xf32>, vector<16x12x16xf32> -> vector<64x12x16xf32>
    %c0_22 = arith.constant 0 : index
    %c0_23 = arith.constant 0 : index
    %23 = vector.load %arg3[%c0_22, %c0_23] : memref<12x12xf32, #tpu.memory_space<vmem>>, vector<12x12xf32>
    %24 = vector.shape_cast %23 : vector<12x12xf32> to vector<1x12x12xf32>
    "tpu.trace_start"() <{level = 10 : i32, message = "gqd,gkd->gqk"}> : () -> ()
    %cst_24 = arith.constant dense<0.000000e+00> : vector<64x12x12xf32>
    %25 = tpu.matmul %20, %21, %cst_24 {dimension_numbers = #tpu.dot_dimension_numbers<[2], [2], [1], [1], [0, 0, 0, 1, 1, 1], [0], [0]>} : vector<64x12x16xf32>, vector<64x12x16xf32>, vector<64x12x12xf32> -> vector<64x12x12xf32>
    "tpu.trace_stop"() : () -> ()
    %cst_25 = arith.constant 2.500000e-01 : f32
    %26 = vector.broadcast %cst_25 : f32 to vector<64x12x12xf32>
    %27 = arith.mulf %25, %26 : vector<64x12x12xf32>
    %28 = vector.broadcast %24 : vector<1x12x12xf32> to vector<64x12x12xf32>
    %29 = arith.addf %27, %28 : vector<64x12x12xf32>
    %cst_26 = arith.constant dense<0xFF800000> : vector<64x12xf32>
    %30 = vector.multi_reduction <maximumf>, %29, %cst_26 [2] : vector<64x12x12xf32> to vector<64x12xf32>
    %31 = vector.shape_cast %30 : vector<64x12xf32> to vector<64x12x1xf32>
    %32 = vector.broadcast %31 : vector<64x12x1xf32> to vector<64x12x12xf32>
    %33 = arith.subf %29, %32 : vector<64x12x12xf32>
    %34 = math.exp %33 : vector<64x12x12xf32>
    %cst_27 = arith.constant dense<0.000000e+00> : vector<64x12xf32>
    %35 = vector.multi_reduction <add>, %34, %cst_27 [2] : vector<64x12x12xf32> to vector<64x12xf32>
    %36 = vector.shape_cast %35 : vector<64x12xf32> to vector<64x12x1xf32>
    %37 = vector.broadcast %36 : vector<64x12x1xf32> to vector<64x12x12xf32>
    %38 = arith.divf %34, %37 : vector<64x12x12xf32>
    "tpu.trace_start"() <{level = 10 : i32, message = "gqk,gkd->gqd"}> : () -> ()
    %cst_28 = arith.constant dense<0.000000e+00> : vector<64x12x16xf32>
    %39 = tpu.matmul %38, %22, %cst_28 {dimension_numbers = #tpu.dot_dimension_numbers<[2], [1], [1], [2], [0, 0, 0, 1, 1, 2], [0], [0]>} : vector<64x12x12xf32>, vector<64x12x16xf32>, vector<64x12x16xf32> -> vector<64x12x16xf32>
    "tpu.trace_stop"() : () -> ()
    %c0_29 = arith.constant 0 : index
    %c0_30 = arith.constant 0 : index
    %c0_31 = arith.constant 0 : index
    %40 = vector.load %arg10[%c0_29, %c0_30, %c0_31] : memref<64x12x16xf32, #tpu.memory_space<vmem>>, vector<64x12x16xf32>
    tpu.vector_store %arg10[%c0_29, %c0_30, %c0_31], %39 {strides = array<i32>} : memref<64x12x16xf32, #tpu.memory_space<vmem>>, vector<64x12x16xf32>,
    return
  }
  func.func @transform_0(%arg0: i32) -> (i32, i32) {
    %c0_i32 = arith.constant 0 : i32
    %c0_i32_0 = arith.constant 0 : i32
    %c0_i32_1 = arith.constant 0 : i32
    return %c0_i32, %c0_i32_0 : i32, i32
  }
  func.func @transform_1(%arg0: i32) -> (i32, i32) {
    %c0_i32 = arith.constant 0 : i32
    %c0_i32_0 = arith.constant 0 : i32
    %c0_i32_1 = arith.constant 0 : i32
    return %c0_i32, %c0_i32_0 : i32, i32
  }
  func.func @transform_2(%arg0: i32) -> (i32, i32) {
    %c0_i32 = arith.constant 0 : i32
    %c0_i32_0 = arith.constant 0 : i32
    %c0_i32_1 = arith.constant 0 : i32
    return %c0_i32, %c0_i32_0 : i32, i32
  }
  func.func @transform_3(%arg0: i32) -> (i32, i32, i32) {
    %c0_i32 = arith.constant 0 : i32
    %c0_i32_0 = arith.constant 0 : i32
    %c0_i32_1 = arith.constant 0 : i32
    %c0_i32_2 = arith.constant 0 : i32
    return %c0_i32, %c0_i32_0, %c0_i32_1 : i32, i32, i32
  }
  func.func @transform_4(%arg0: i32) -> (i32, i32, i32) {
    %c0_i32 = arith.constant 0 : i32
    %c0_i32_0 = arith.constant 0 : i32
    %c0_i32_1 = arith.constant 0 : i32
    %c0_i32_2 = arith.constant 0 : i32
    return %c0_i32, %c0_i32_0, %c0_i32_1 : i32, i32, i32
  }
  func.func @transform_5(%arg0: i32) -> (i32, i32, i32) {
    %c0_i32 = arith.constant 0 : i32
    %c0_i32_0 = arith.constant 0 : i32
    %c0_i32_1 = arith.constant 0 : i32
    %c0_i32_2 = arith.constant 0 : i32
    return %c0_i32, %c0_i32_0, %c0_i32_1 : i32, i32, i32
  }
  func.func @transform_6(%arg0: i32) -> (i32, i32, i32) {
    %c0_i32 = arith.constant 0 : i32
    %c0_i32_0 = arith.constant 0 : i32
    %c0_i32_1 = arith.constant 0 : i32
    %c0_i32_2 = arith.constant 0 : i32
    return %c0_i32, %c0_i32_0, %c0_i32_1 : i32, i32, i32
  }
  func.func @transform_7(%arg0: i32) -> (i32, i32, i32) {
    %c0_i32 = arith.constant 0 : i32
    %c0_i32_0 = arith.constant 0 : i32
    %c0_i32_1 = arith.constant 0 : i32
    %c0_i32_2 = arith.constant 0 : i32
    return %c0_i32, %c0_i32_0, %c0_i32_1 : i32, i32, i32
  }
  func.func @transform_8(%arg0: i32) -> (i32, i32, i32) {
    %c0_i32 = arith.constant 0 : i32
    %c0_i32_0 = arith.constant 0 : i32
    %c0_i32_1 = arith.constant 0 : i32
    %c0_i32_2 = arith.constant 0 : i32
    return %c0_i32, %c0_i32_0, %c0_i32_1 : i32, i32, i32
  }
  func.func @transform_9(%arg0: i32) -> (i32, i32, i32) {
    %c0_i32 = arith.constant 0 : i32
    %c0_i32_0 = arith.constant 0 : i32
    %c0_i32_1 = arith.constant 0 : i32
    %c0_i32_2 = arith.constant 0 : i32
    return %c0_i32, %c0_i32_0, %c0_i32_1 : i32, i32, i32
  }
}

</mosaic_0001>

<bundles_post_ra>
// kernel: tpu_custom_call.1
= control target key start
LH: loop header
LB: loop body
LE: loop exit
PB: predicated region body
PF: predicated region fallthrough
CT: control target
= control target key end

     0   :  { %vm384_vm0 = vcmask 130048   ;;  %v15901_v3 = vmov 0   ;;  %vm5925_vm2 = vcmask 93184   ;;  %vm5921_vm3 = vcmask 97280   ;;  %s20607_s4 = inlined_call_operand.vmem [shape: f32[16,12,16], index: 4, kind: input, shape index: {}]   ;;  %s20608_s3 = inlined_call_operand.vmem [shape: f32[16,12,16], index: 3, kind: input, shape index: {}]   ;;  %s20609_s1 = inlined_call_operand.vmem [shape: f32[12,1], index: 1, kind: input, shape index: {}]   ;;  %s20610_s0 = inlined_call_operand.vmem [shape: f32[12,1], index: 0, kind: input, shape index: {}]   ;;  %s20611_s6 = inlined_call_operand.vmem [shape: f32[16,12,16], index: 6, kind: input, shape index: {}]   ;;  %s20612_s7 = inlined_call_operand.vmem [shape: f32[16,12,16], index: 7, kind: input, shape index: {}]   ;;  %s20613_s2 = inlined_call_operand.vmem [shape: f32[12,12], index: 2, kind: input, shape index: {}]   ;;  %s20614_s5 = inlined_call_operand.vmem [shape: f32[16,12,16], index: 5, kind: input, shape index: {}]   ;;  %s20615_s9 = inlined_call_operand.vmem [shape: f32[64,12,16], index: 9, kind: output, shape index: {}]   ;;  %s20616_s8 = inlined_call_operand.vmem [shape: f32[16,12,16], index: 8, kind: input, shape index: {}]  }
   0x1   :  { %v15956_v0 = vld [vmem:[%s20607_s4] sm:$0xff]  ;;  %v15961_v1 = vld [vmem:[%s20607_s4 + $0x8] sm:$0xf]  ;;  %vm15965_vm1 = vmpackc.low %vm384_vm0, %vm384_vm0  ;;  %15372 = vset.pattern.permute.xlu1 %v15901_v3  ;;  %15371 = vset.pattern.permute.xlu0 %v15901_v3  ;;  %vm7337_vm4 = vcmask 1043456   ;;  %vm15902_vm5 = vmmov 1   ;;  %vm12613_vm7 = vcmask 125952  }
   0x2   :  { %v14601_v4 = vpack.c.bf16 %v15961_v1, %v15956_v0  ;;  %v15974_v5 = vld [vmem:[%s20607_s4 + $0x10] sm:$0xff]  ;;  %v15979_v6 = vld [vmem:[%s20607_s4 + $0x18] sm:$0xf]  ;;  %v32_v7 = vld [vmem:[%s20608_s3] sm:$0xff] }
   0x3   :  { %v14607_v8 = vpack.c.bf16 %v15979_v6, %v15974_v5  ;;  %v33_v9 = vld [vmem:[%s20608_s3 + $0x8] sm:$0xf]  ;;  %13709 = vmatprep.mubr.msk.f32.mxu0 %vm384_vm0, %v32_v7  ;;  %v34_v10 = vld [vmem:[%s20608_s3 + $0x10] sm:$0xff]  ;;  %v35_v11 = vld [vmem:[%s20608_s3 + $0x18] sm:$0xf] }
   0x4   :  { %14603 = vmatprep.subr.msk.bf16.mxu0 %vm15965_vm1, %v14601_v4  ;;  %v15998_v12 = vpack.c.bf16 %v33_v9, %v32_v7  ;;  %13716 = vmatprep.mubr.msk.f32.mxu1 %vm384_vm0, %v34_v10  ;;  %v16001_v13 = vpack.c.bf16 %v35_v11, %v34_v10  ;;  %v16006_v14 = vld [vmem:[%s20607_s4 + $0x20] sm:$0xff]  ;;  %v16011_v15 = vld [vmem:[%s20607_s4 + $0x28] sm:$0xf]  ;;  %v16031_v21 = vld [vmem:[%s20607_s4 + $0x30] sm:$0xff] }
   0x5   :  { %v226_v16 = vld [vmem:[%s20609_s1] sm:$0xff]  ;;  %14609 = vmatprep.subr.msk.bf16.mxu1 %vm15965_vm1, %v14607_v8  ;;  %14606 = vmatpush3.bf16.xpose.msk.msra.mxu0 %vm15965_vm1, %v14601_v4  ;;  %v14613_v17 = vpack.c.bf16 %v16011_v15, %v16006_v14  ;;  %v227_v18 = vld [vmem:[%s20609_s1 + $0x8] sm:$0xf]  ;;  %v16038_v23 = vld [vmem:[%s20607_s4 + $0x38] sm:$0xf] }
   0x6   :  { %20849 = vst [vmem:[#allocation2_spill] sm:$0xff] %v15998_v12  ;;  %20850 = vst [vmem:[#allocation3_spill] sm:$0xff] %v16001_v13  ;;  %v228_v19 = vadd.f32 1e-05, %v226_v16  ;;  %v224_v20 = vld [vmem:[%s20610_s0] sm:$0xff]  ;;  %14612 = vmatpush3.bf16.xpose.msk.msra.mxu1 %vm15965_vm1, %v14607_v8  ;;  %v14619_v26 = vpack.c.bf16 %v16038_v23, %v16031_v21  ;;  %v38_v31 = vld [vmem:[%s20608_s3 + $0x30] sm:$0xff] }
   0x7   :  { %v229_v22 = vadd.f32 1e-05, %v227_v18  ;;  %342 = vperm.xlu1 %15372, %v224_v20   ;;  %v36_v24 = vld [vmem:[%s20608_s3 + $0x20] sm:$0xff]  ;;  %14615 = vmatprep.subr.msk.bf16.mxu0 %vm15965_vm1, %v14613_v17  ;;  %v37_v27 = vld [vmem:[%s20608_s3 + $0x28] sm:$0xf]  ;;  %v16074_v33 = vld [vmem:[%s20607_s4 + $0x50] sm:$0xff] }
   0x8   :  { %v16046_v25 = vld [vmem:[%s20607_s4 + $0x40] sm:$0xff]  ;;  %15373 = vrcp.f32 %v228_v19  ;;  %v225_v28 = vld [vmem:[%s20610_s0 + $0x8] sm:$0xf]  ;;  %v16063_v30 = vpack.c.bf16 %v37_v27, %v36_v24  ;;  %v39_v32 = vld [vmem:[%s20608_s3 + $0x38] sm:$0xf]  ;;  %14621 = vmatprep.subr.msk.bf16.mxu1 %vm15965_vm1, %v14619_v26 }
   0x9   :  { %v16061_v29 = vld [vmem:[%s20607_s4 + $0x48] sm:$0xf]  ;;  %15375 = vrcp.f32 %v229_v22  ;;  %v16078_v34 = vpack.c.bf16 %v39_v32, %v38_v31  ;;  %v16083_v35 = vld [vmem:[%s20607_s4 + $0x58] sm:$0xf]  ;;  %v40_v36 = vld [vmem:[%s20608_s3 + $0x40] sm:$0xff] }
   0xa   :  { %20851 = vst [vmem:[#allocation4_spill] sm:$0xff] %v16063_v30  ;;  %v16091_v37 = vld [vmem:[%s20608_s3 + $0x48] sm:$0xf]  ;;  %v14625_v39 = vpack.c.bf16 %v16061_v29, %v16046_v25  ;;  %v42_v40 = vld [vmem:[%s20608_s3 + $0x50] sm:$0xff]  ;;  %v16104_v41 = vld [vmem:[%s20608_s3 + $0x58] sm:$0xf]  ;;  %v14631_v42 = vpack.c.bf16 %v16083_v35, %v16074_v33 }
   0xb   :  { %20852 = vst [vmem:[#allocation5_spill] sm:$0xff] %v16078_v34  ;;  %347 = vperm.xlu1 %15372, %v225_v28   ;;  %v16094_v38 = vpack.c.bf16 %v16091_v37, %v40_v36  ;;  %v16110_v43 = vpack.c.bf16 %v16104_v41, %v42_v40  ;;  %v16115_v44 = vld [vmem:[%s20608_s3 + $0x60] sm:$0xff]  ;;  %v16120_v45 = vld [vmem:[%s20608_s3 + $0x68] sm:$0xf]  ;;  %v46_v47 = vld [vmem:[%s20608_s3 + $0x70] sm:$0xff] }
   0xc   :  { %13710 = vmatmul.mubr.msk.f32.vlgmr.msra.gmra.mrb[0].mxu0 %vm384_vm0, %v33_v9  ;;  %v16127_v46 = vpack.c.bf16 %v16120_v45, %v16115_v44  ;;  %v16135_v48 = vld [vmem:[%s20608_s3 + $0x78] sm:$0xf]  ;;  %v16143_v49 = vld [vmem:[%s20607_s4 + $0x60] sm:$0xff]  ;;  %v16154_v51 = vld [vmem:[%s20607_s4 + $0x68] sm:$0xf] }
   0xd   :  { %20853 = vst [vmem:[#allocation6_spill] sm:$0xff] %v16094_v38  ;;  %20854 = vst [vmem:[#allocation7_spill] sm:$0xff] %v16110_v43  ;;  %13717 = vmatmul.mubr.msk.f32.vlgmr.msra.gmra.mrb[0].mxu1 %vm384_vm0, %v35_v11  ;;  %14618 = vmatpush3.bf16.xpose.msk.msra.mxu0 %vm15965_vm1, %v14613_v17  ;;  %v16146_v50 = vpack.c.bf16 %v16135_v48, %v46_v47  ;;  %v16159_v52 = vld [vmem:[%s20608_s3 + $0x80] sm:$0xff]  ;;  %v16164_v53 = vld [vmem:[%s20608_s3 + $0x88] sm:$0xf]  ;;  %v14637_v4 = vpack.c.bf16 %v16154_v51, %v16143_v49 }
   0xe   :  { %20855 = vst [vmem:[#allocation8_spill] sm:$0xff] %v16127_v46  ;;  %14624 = vmatpush3.bf16.xpose.msk.msra.mxu1 %vm15965_vm1, %v14619_v26  ;;  %13723 = vmatprep.mubr.msk.f32.mxu0 %vm384_vm0, %v36_v24  ;;  %v16171_v54 = vld [vmem:[%s20607_s4 + $0x70] sm:$0xff]  ;;  %v16175_v55 = vpack.c.bf16 %v16164_v53, %v16159_v52  ;;  %v16183_v57 = vld [vmem:[%s20608_s3 + $0x98] sm:$0xf]  ;;  %v16196_v61 = vld [vmem:[%s20608_s3 + $0xa0] sm:$0xff] }
   0xf   :  { %20856 = vst [vmem:[#allocation9_spill] sm:$0xff] %v16146_v50  ;;  %14627 = vmatprep.subr.msk.bf16.mxu0 %vm15965_vm1, %v14625_v39  ;;  %13730 = vmatprep.mubr.msk.f32.mxu1 %vm384_vm0, %v38_v31  ;;  %v50_v56 = vld [vmem:[%s20608_s3 + $0x90] sm:$0xff]  ;;  %v16188_v59 = vld [vmem:[%s20607_s4 + $0x78] sm:$0xf]  ;;  %v16201_v62 = vld [vmem:[%s20608_s3 + $0xa8] sm:$0xf] }
  0x10   :  { %14633 = vmatprep.subr.msk.bf16.mxu1 %vm15965_vm1, %v14631_v42  ;;  %20857 = vst [vmem:[#allocation10_spill] sm:$0xff] %v16175_v55  ;;  %v16191_v60 = vpack.c.bf16 %v16183_v57, %v50_v56  ;;  %v16205_v63 = vpack.c.bf16 %v16201_v62, %v16196_v61  ;;  %v16212_v7 = vld [vmem:[%s20608_s3 + $0xb0] sm:$0xff]  ;;  %v16217_v8 = vld [vmem:[%s20608_s3 + $0xb8] sm:$0xf]  ;;  %v14643_v9 = vpack.c.bf16 %v16188_v59, %v16171_v54  ;;  %v16229_v11 = vld [vmem:[%s20608_s3 + $0xc0] sm:$0xff] }
  0x11   :  { %v16224_v10 = vpack.c.bf16 %v16217_v8, %v16212_v7  ;;  %v16234_v16 = vld [vmem:[%s20608_s3 + $0xc8] sm:$0xf]  ;;  %v16246_v18 = vld [vmem:[%s20608_s3 + $0xd0] sm:$0xff]  ;;  %v16251_v19 = vld [vmem:[%s20608_s3 + $0xd8] sm:$0xf] }
  0x12   :  { %v15374_v58 = vpop.eup %15373  ;;  %20858 = vst [vmem:[#allocation11_spill] sm:$0xff] %v16191_v60  ;;  %20859 = vst [vmem:[#allocation12_spill] sm:$0xff] %v16205_v63  ;;  %v16241_v17 = vpack.c.bf16 %v16234_v16, %v16229_v11  ;;  %v16257_v20 = vpack.c.bf16 %v16251_v19, %v16246_v18  ;;  %v16262_v22 = vld [vmem:[%s20608_s3 + $0xe0] sm:$0xff]  ;;  %v16270_v24 = vld [vmem:[%s20608_s3 + $0xe8] sm:$0xf] }
  0x13   :  { %268 = vperm.xlu0 %15371, %v15374_v58   ;;  %v15376_v3 = vpop.eup %15375  ;;  %20860 = vst [vmem:[#allocation13_spill] sm:$0xff] %v16224_v10  ;;  %v16275_v26 = vld [vmem:[%s20608_s3 + $0xf0] sm:$0xff]  ;;  %v16288_v28 = vld [vmem:[%s20607_s4 + $0x80] sm:$0xff]  ;;  %v16293_v31 = vld [vmem:[%s20607_s4 + $0x88] sm:$0xf] }
  0x14   :  { %13724 = vmatmul.mubr.msk.f32.vlgmr.msra.gmra.mrb[2].mxu0 %vm384_vm0, %v37_v27  ;;  %20861 = vst [vmem:[#allocation14_spill] sm:$0xff] %v16241_v17  ;;  %20862 = vst [vmem:[#allocation15_spill] sm:$0xff] %v16257_v20  ;;  %v16280_v27 = vld [vmem:[%s20608_s3 + $0xf8] sm:$0xf]  ;;  %v16527_v60 = vld [vmem:[%s20611_s6 + $0x50] sm:$0xff] }
  0x15   :  { %14630 = vmatpush3.bf16.xpose.msk.msra.mxu0 %vm15965_vm1, %v14625_v39  ;;  %13731 = vmatmul.mubr.msk.f32.vlgmr.msra.gmra.mrb[2].mxu1 %vm384_vm0, %v39_v32  ;;  %v16297_v32 = vpack.c.bf16 %v16270_v24, %v16262_v22  ;;  %v16306_v39 = vld [vmem:[%s20607_s4 + $0x90] sm:$0xff]  ;;  %v139_v10 = vld [vmem:[%s20611_s6 + $0x58] sm:$0xf]  ;;  %vm17760_vm6 = vmpackc.low %vm7337_vm4, %vm15902_vm5 }
  0x16   :  { %14636 = vmatpush3.bf16.xpose.msk.msra.mxu1 %vm15965_vm1, %v14631_v42  ;;  %13737 = vmatprep.mubr.msk.f32.mxu0 %vm384_vm0, %v40_v36  ;;  %v16301_v36 = vpack.c.bf16 %v16280_v27, %v16275_v26  ;;  %v14649_v42 = vpack.c.bf16 %v16293_v31, %v16288_v28  ;;  %v245_v38 = vmul.f32 %v139_v10, %v139_v10 }
  0x17   :  { %273 = vperm.xlu0 %15371, %v15376_v3   ;;  %14639 = vmatprep.subr.msk.bf16.mxu0 %vm15965_vm1, %v14637_v4  ;;  %20863 = vst [vmem:[#allocation16_spill] sm:$0xff] %v16297_v32 }
  0x18   :  { %13744 = vmatprep.mubr.msk.f32.mxu1 %vm384_vm0, %v42_v40  ;;  %14645 = vmatprep.subr.msk.bf16.mxu1 %vm15965_vm1, %v14643_v9  ;;  %20864 = vst [vmem:[#allocation17_spill] sm:$0xff] %v16301_v36  ;;  %v16311_v40 = vld [vmem:[%s20607_s4 + $0x98] sm:$0xf]  ;;  %v16510_v36 = vld [vmem:[%s20611_s6 + $0x48] sm:$0xf] }
  0x19   :  { %v14655_v58 = vpack.c.bf16 %v16311_v40, %v16306_v39  ;;  %v243_v46 = vmul.f32 %v16510_v36, %v16510_v36 }
  0x1c   :  { %13738 = vmatmul.mubr.msk.f32.vlgmr.msra.gmra.mrb[4].mxu0 %vm384_vm0, %v16091_v37  ;;  %v16335_v37 = vld [vmem:[%s20607_s4 + $0xa0] sm:$0xff] }
  0x1d   :  { %14642 = vmatpush3.bf16.xpose.msk.msra.mxu0 %vm15965_vm1, %v14637_v4  ;;  %13745 = vmatmul.mubr.msk.f32.vlgmr.msra.gmra.mrb[4].mxu1 %vm384_vm0, %v16104_v41  ;;  %v16340_v41 = vld [vmem:[%s20607_s4 + $0xa8] sm:$0xf] }
  0x1e   :  { %14648 = vmatpush3.bf16.xpose.msk.msra.mxu1 %vm15965_vm1, %v14643_v9  ;;  %13751 = vmatprep.mubr.msk.f32.mxu0 %vm384_vm0, %v16115_v44  ;;  %v16345_v44 = vld [vmem:[%s20607_s4 + $0xb0] sm:$0xff]  ;;  %v14661_v3 = vpack.c.bf16 %v16340_v41, %v16335_v37 }
  0x1f   :  { %14651 = vmatprep.subr.msk.bf16.mxu0 %vm15965_vm1, %v14649_v42  ;;  %13758 = vmatprep.mubr.msk.f32.mxu1 %vm384_vm0, %v46_v47  ;;  %v16350_v47 = vld [vmem:[%s20607_s4 + $0xb8] sm:$0xf] }
  0x20   :  { %14657 = vmatprep.subr.msk.bf16.mxu1 %vm15965_vm1, %v14655_v58  ;;  %v14667_v4 = vpack.c.bf16 %v16350_v47, %v16345_v44 }
  0x24   :  { %13752 = vmatmul.mubr.msk.f32.vlgmr.msra.gmra.mrb[6].mxu0 %vm384_vm0, %v16120_v45  ;;  %v16374_v45 = vld [vmem:[%s20607_s4 + $0xc0] sm:$0xff] }
  0x25   :  { %14654 = vmatpush3.bf16.xpose.msk.msra.mxu0 %vm15965_vm1, %v14649_v42  ;;  %13759 = vmatmul.mubr.msk.f32.vlgmr.msra.gmra.mrb[6].mxu1 %vm384_vm0, %v16135_v48  ;;  %v16379_v48 = vld [vmem:[%s20607_s4 + $0xc8] sm:$0xf] }
  0x26   :  { %14660 = vmatpush3.bf16.xpose.msk.msra.mxu1 %vm15965_vm1, %v14655_v58  ;;  %13765 = vmatprep.mubr.msk.f32.mxu0 %vm384_vm0, %v16159_v52  ;;  %v16384_v52 = vld [vmem:[%s20607_s4 + $0xd0] sm:$0xff]  ;;  %v14673_v9 = vpack.c.bf16 %v16379_v48, %v16374_v45 }
  0x27   :  { %14663 = vmatprep.subr.msk.bf16.mxu0 %vm15965_vm1, %v14661_v3  ;;  %13772 = vmatprep.mubr.msk.f32.mxu1 %vm384_vm0, %v50_v56  ;;  %v16389_v56 = vld [vmem:[%s20607_s4 + $0xd8] sm:$0xf] }
  0x28   :  { %14669 = vmatprep.subr.msk.bf16.mxu1 %vm15965_vm1, %v14667_v4  ;;  %20865 = vst [vmem:[#allocation18_spill] sm:$0xff] %v16389_v56  ;;  %v14679_v42 = vpack.c.bf16 %v16389_v56, %v16384_v52 }
  0x2c   :  { %13766 = vmatmul.mubr.msk.f32.vlgmr.msra.gmra.mrb[8].mxu0 %vm384_vm0, %v16164_v53  ;;  %v16414_v53 = vld [vmem:[%s20607_s4 + $0xe0] sm:$0xff] }
  0x2d   :  { %14666 = vmatpush3.bf16.xpose.msk.msra.mxu0 %vm15965_vm1, %v14661_v3  ;;  %13773 = vmatmul.mubr.msk.f32.vlgmr.msra.gmra.mrb[8].mxu1 %vm384_vm0, %v16183_v57  ;;  %20866 = vst [vmem:[#allocation19_spill] sm:$0xff] %v16414_v53  ;;  %v16419_v57 = vld [vmem:[%s20607_s4 + $0xe8] sm:$0xf] }
  0x2e   :  { %14672 = vmatpush3.bf16.xpose.msk.msra.mxu1 %vm15965_vm1, %v14667_v4  ;;  %13779 = vmatprep.mubr.msk.f32.mxu0 %vm384_vm0, %v16196_v61  ;;  %20867 = vst [vmem:[#allocation20_spill] sm:$0xff] %v16419_v57  ;;  %v16424_v61 = vld [vmem:[%s20607_s4 + $0xf0] sm:$0xff]  ;;  %v14685_v58 = vpack.c.bf16 %v16419_v57, %v16414_v53 }
  0x2f   :  { %14675 = vmatprep.subr.msk.bf16.mxu0 %vm15965_vm1, %v14673_v9  ;;  %13786 = vmatprep.mubr.msk.f32.mxu1 %vm384_vm0, %v16212_v7  ;;  %20868 = vst [vmem:[#allocation21_spill] sm:$0xff] %v16424_v61  ;;  %v16429_v7 = vld [vmem:[%s20607_s4 + $0xf8] sm:$0xf] }
  0x30   :  { %14681 = vmatprep.subr.msk.bf16.mxu1 %vm15965_vm1, %v14679_v42  ;;  %20869 = vst [vmem:[#allocation22_spill] sm:$0xff] %v16429_v7  ;;  %v14691_v3 = vpack.c.bf16 %v16429_v7, %v16424_v61 }
  0x34   :  { %13780 = vmatmul.mubr.msk.f32.vlgmr.msra.gmra.mrb[10].mxu0 %vm384_vm0, %v16201_v62  ;;  %v16474_v62 = vld [vmem:[%s20611_s6] sm:$0xff] }
  0x35   :  { %14678 = vmatpush3.bf16.xpose.msk.msra.mxu0 %vm15965_vm1, %v14673_v9  ;;  %13787 = vmatmul.mubr.msk.f32.vlgmr.msra.gmra.mrb[10].mxu1 %vm384_vm0, %v16217_v8  ;;  %20870 = vst [vmem:[#allocation23_spill] sm:$0xff] %v16474_v62  ;;  %v16479_v8 = vld [vmem:[%s20611_s6 + $0x10] sm:$0xff] }
  0x36   :  { %14684 = vmatpush3.bf16.xpose.msk.msra.mxu1 %vm15965_vm1, %v14679_v42  ;;  %13793 = vmatprep.mubr.msk.f32.mxu0 %vm384_vm0, %v16229_v11  ;;  %20871 = vst [vmem:[#allocation24_spill] sm:$0xff] %v16479_v8  ;;  %v132_v11 = vld [vmem:[%s20611_s6 + $0x20] sm:$0xff] }
  0x37   :  { %14687 = vmatprep.subr.msk.bf16.mxu0 %vm15965_vm1, %v14685_v58  ;;  %13800 = vmatprep.mubr.msk.f32.mxu1 %vm384_vm0, %v16246_v18  ;;  %v129_v18 = vld [vmem:[%s20611_s6 + $0x8] sm:$0xf] }
  0x38   :  { %14693 = vmatprep.subr.msk.bf16.mxu1 %vm15965_vm1, %v14691_v3  ;;  %v235_v9 = vmul.f32 %v129_v18, %v129_v18 }
  0x3c   :  { %13794 = vmatmul.mubr.msk.f32.vlgmr.msra.gmra.mrb[12].mxu0 %vm384_vm0, %v16234_v16  ;;  %v236_v16 = vmul.f32 %v16479_v8, %v16479_v8 }
  0x3d   :  { %14690 = vmatpush3.bf16.xpose.msk.msra.mxu0 %vm15965_vm1, %v14685_v58  ;;  %13801 = vmatmul.mubr.msk.f32.vlgmr.msra.gmra.mrb[12].mxu1 %vm384_vm0, %v16251_v19  ;;  %v131_v19 = vld [vmem:[%s20611_s6 + $0x18] sm:$0xf] }
  0x3e   :  { %14696 = vmatpush3.bf16.xpose.msk.msra.mxu1 %vm15965_vm1, %v14691_v3  ;;  %13807 = vmatprep.mubr.msk.f32.mxu0 %vm384_vm0, %v16262_v22  ;;  %v133_v22 = vld [vmem:[%s20611_s6 + $0x28] sm:$0xf]  ;;  %v237_v58 = vmul.f32 %v131_v19, %v131_v19 }
  0x3f   :  { %13814 = vmatprep.mubr.msk.f32.mxu1 %vm384_vm0, %v16275_v26  ;;  %v135_v26 = vld [vmem:[%s20611_s6 + $0x38] sm:$0xf]  ;;  %v239_v20 = vmul.f32 %v133_v22, %v133_v22 }
  0x40   :  { %v241_v17 = vmul.f32 %v135_v26, %v135_v26 }
  0x44   :  { %13808 = vmatmul.mubr.msk.f32.vlgmr.msra.gmra.mrb[14].mxu0 %vm384_vm0, %v16270_v24  ;;  %v238_v24 = vmul.f32 %v132_v11, %v132_v11 }
  0x45   :  { %13815 = vmatmul.mubr.msk.f32.vlgmr.msra.gmra.mrb[14].mxu1 %vm384_vm0, %v16280_v27  ;;  %13821 = vmatprep.mubr.msk.f32.mxu0 %vm384_vm0, %v15956_v0  ;;  %v134_v0 = vld [vmem:[%s20611_s6 + $0x30] sm:$0xff] }
  0x46   :  { %13828 = vmatprep.mubr.msk.f32.mxu1 %vm384_vm0, %v15974_v5  ;;  %v234_v5 = vmul.f32 %v16474_v62, %v16474_v62  ;;  %v240_v27 = vmul.f32 %v134_v0, %v134_v0 }
  0x86   :  { %v16512_v32 = vpop.permute.xlu1 %342 }
  0x92   :  { %v16503_v4 = vpop.permute.xlu0 %268 }
  0x93   :  { %v276_v42 = vmul.f32 %v16503_v4, %v234_v5  ;;  %v278_v3 = vmul.f32 %v16503_v4, %v236_v16  ;;  %v280_v63 = vmul.f32 %v16503_v4, %v238_v24  ;;  %v282_v5 = vmul.f32 %v16503_v4, %v240_v27  ;;  %v16522_v16 = vld [vmem:[%s20611_s6 + $0x40] sm:$0xff] }
  0x94   :  { %v242_v7 = vmul.f32 %v16522_v16, %v16522_v16 }
  0x95   :  { %v308_v50 = vsub.f32 %v16474_v62, %v276_v42  ;;  %v310_v43 = vsub.f32 %v16479_v8, %v278_v3  ;;  %v244_v42 = vmul.f32 %v16527_v60, %v16527_v60  ;;  %v312_v13 = vsub.f32 %v132_v11, %v280_v63  ;;  %v16554_v63 = vld [vmem:[%s20611_s6 + $0x68] sm:$0xf] }
  0x96   :  { %v16529_v55 = vpop.permute.xlu0 %273  ;;  %v314_v12 = vsub.f32 %v134_v0, %v282_v5  ;;  %v16570_v0 = vld [vmem:[%s20611_s6 + $0x60] sm:$0xff] }
  0x97   :  { %v277_v24 = vmul.f32 %v16529_v55, %v235_v9  ;;  %v279_v27 = vmul.f32 %v16529_v55, %v237_v58  ;;  %v281_v34 = vmul.f32 %v16529_v55, %v239_v20  ;;  %v283_v30 = vmul.f32 %v16529_v55, %v241_v17  ;;  %v16543_v9 = vpop.permute.xlu1 %347 }
  0x98   :  { %v350_v58 = vmul.f32 %v16512_v32, %v308_v50  ;;  %v285_v20 = vmul.f32 %v16529_v55, %v243_v46  ;;  %v352_v61 = vmul.f32 %v16512_v32, %v310_v43  ;;  %v287_v56 = vmul.f32 %v16529_v55, %v245_v38 }
  0x99   :  { %v309_v62 = vsub.f32 %v129_v18, %v277_v24  ;;  %v311_v57 = vsub.f32 %v131_v19, %v279_v27  ;;  %v313_v3 = vsub.f32 %v133_v22, %v281_v34  ;;  %v315_v8 = vsub.f32 %v135_v26, %v283_v30  ;;  %v16559_v34 = vld [vmem:[%s20611_s6 + $0x78] sm:$0xf]  ;;  %v16607_v27 = vld [vmem:[%s20611_s6 + $0x88] sm:$0xf] }
  0x9a   :  { %v284_v43 = vmul.f32 %v16503_v4, %v242_v7  ;;  %v286_v50 = vmul.f32 %v16503_v4, %v244_v42  ;;  %v356_v11 = vmul.f32 %v16512_v32, %v314_v12  ;;  %v317_v18 = vsub.f32 %v16510_v36, %v285_v20  ;;  %v16578_v7 = vld [vmem:[%s20611_s6 + $0x70] sm:$0xff]  ;;  %v16612_v42 = vld [vmem:[%s20611_s6 + $0x98] sm:$0xf] }
  0x9b   :  { %v351_v17 = vmul.f32 %v16543_v9, %v309_v62  ;;  %v353_v53 = vmul.f32 %v16543_v9, %v311_v57  ;;  %v355_v30 = vmul.f32 %v16543_v9, %v313_v3  ;;  %v357_v46 = vmul.f32 %v16543_v9, %v315_v8 }
  0x9c   :  { %v354_v62 = vmul.f32 %v16512_v32, %v312_v13  ;;  %v247_v8 = vmul.f32 %v16554_v63, %v16554_v63  ;;  %v249_v13 = vmul.f32 %v16559_v34, %v16559_v34  ;;  %v319_v36 = vsub.f32 %v139_v10, %v287_v56 }
  0x9d   :  { %v14697_v57 = vpack.c.bf16 %v351_v17, %v350_v58  ;;  %v14703_v38 = vpack.c.bf16 %v353_v53, %v352_v61  ;;  %v14715_v53 = vpack.c.bf16 %v357_v46, %v356_v11  ;;  %v246_v61 = vmul.f32 %v16570_v0, %v16570_v0  ;;  %v16622_v46 = vld [vmem:[%s20611_s6 + $0x80] sm:$0xff] }
  0x9e   :  { %v14709_v12 = vpack.c.bf16 %v355_v30, %v354_v62  ;;  %v316_v19 = vsub.f32 %v16522_v16, %v284_v43  ;;  %v318_v22 = vsub.f32 %v16527_v60, %v286_v50  ;;  %v248_v10 = vmul.f32 %v16578_v7, %v16578_v7  ;;  %v16629_v50 = vld [vmem:[%s20611_s6 + $0x90] sm:$0xff] }
  0x9f   :  { %14699 = vmatprep.subr.msk.bf16.mxu0 %vm15965_vm1, %v14697_v57  ;;  %14705 = vmatprep.subr.msk.bf16.mxu1 %vm15965_vm1, %v14703_v38  ;;  %v289_v56 = vmul.f32 %v16529_v55, %v247_v8  ;;  %v359_v26 = vmul.f32 %v16543_v9, %v317_v18  ;;  %v361_v5 = vmul.f32 %v16543_v9, %v319_v36 }
  0xa0   :  { %14702 = vmatpush3.bf16.xpose.msk.msra.mxu0 %vm15965_vm1, %v14697_v57  ;;  %14708 = vmatpush3.bf16.xpose.msk.msra.mxu1 %vm15965_vm1, %v14703_v38  ;;  %v291_v24 = vmul.f32 %v16529_v55, %v249_v13  ;;  %v288_v58 = vmul.f32 %v16503_v4, %v246_v61  ;;  %v358_v3 = vmul.f32 %v16512_v32, %v316_v19  ;;  %v16663_v61 = vld [vmem:[%s20611_s6 + $0xa8] sm:$0xf] }
  0xa1   :  { %14711 = vmatprep.subr.msk.bf16.mxu0 %vm15965_vm1, %v14709_v12  ;;  %14717 = vmatprep.subr.msk.bf16.mxu1 %vm15965_vm1, %v14715_v53  ;;  %v360_v20 = vmul.f32 %v16512_v32, %v318_v22  ;;  %v290_v17 = vmul.f32 %v16503_v4, %v248_v10  ;;  %v321_v30 = vsub.f32 %v16554_v63, %v289_v56  ;;  %v16677_v56 = vld [vmem:[%s20611_s6 + $0xa0] sm:$0xff] }
  0xa2   :  { %v251_v43 = vmul.f32 %v16607_v27, %v16607_v27  ;;  %v253_v57 = vmul.f32 %v16612_v42, %v16612_v42  ;;  %v14721_v38 = vpack.c.bf16 %v359_v26, %v358_v3  ;;  %v323_v11 = vsub.f32 %v16559_v34, %v291_v24  ;;  %v16684_v24 = vld [vmem:[%s20611_s6 + $0xb0] sm:$0xff] }
  0xa3   :  { %v14727_v62 = vpack.c.bf16 %v361_v5, %v360_v20  ;;  %v320_v18 = vsub.f32 %v16570_v0, %v288_v58  ;;  %v252_v8 = vmul.f32 %v16629_v50, %v16629_v50  ;;  %v363_v13 = vmul.f32 %v16543_v9, %v321_v30 }
  0xa4   :  { %v295_v36 = vmul.f32 %v16529_v55, %v253_v57  ;;  %v255_v5 = vmul.f32 %v16663_v61, %v16663_v61  ;;  %v254_v30 = vmul.f32 %v16677_v56, %v16677_v56 }
  0xa5   :  { %v294_v10 = vmul.f32 %v16503_v4, %v252_v8 }
  0xa6   :  { %v297_v57 = vmul.f32 %v16529_v55, %v255_v5 }
  0xa7   :  { %13822 = vmatmul.mubr.msk.f32.vlgmr.msra.gmra.mrb[16].mxu0 %vm384_vm0, %v15961_v1  ;;  %13829 = vmatmul.mubr.msk.f32.vlgmr.msra.gmra.mrb[16].mxu1 %vm384_vm0, %v15979_v6  ;;  %v322_v1 = vsub.f32 %v16578_v7, %v290_v17  ;;  %v250_v6 = vmul.f32 %v16622_v46, %v16622_v46  ;;  %v327_v17 = vsub.f32 %v16612_v42, %v295_v36  ;;  %v16741_v36 = vld [vmem:[%s20611_s6 + $0xd0] sm:$0xff] }
  0xa8   :  { %14714 = vmatpush3.bf16.xpose.msk.msra.mxu0 %vm15965_vm1, %v14709_v12  ;;  %14720 = vmatpush3.bf16.xpose.msk.msra.mxu1 %vm15965_vm1, %v14715_v53  ;;  %v365_v12 = vmul.f32 %v16543_v9, %v323_v11  ;;  %v293_v53 = vmul.f32 %v16529_v55, %v251_v43  ;;  %v256_v43 = vmul.f32 %v16684_v24, %v16684_v24 }
  0xa9   :  { %14723 = vmatprep.subr.msk.bf16.mxu0 %vm15965_vm1, %v14721_v38  ;;  %14729 = vmatprep.subr.msk.bf16.mxu1 %vm15965_vm1, %v14727_v62  ;;  %v364_v19 = vmul.f32 %v16512_v32, %v322_v1  ;;  %v292_v22 = vmul.f32 %v16503_v4, %v250_v6 }
  0xaa   :  { %13835 = vmatprep.mubr.msk.f32.mxu0 %vm384_vm0, %v16006_v14  ;;  %13842 = vmatprep.mubr.msk.f32.mxu1 %vm384_vm0, %v16031_v21  ;;  %v16668_v14 = vld [vmem:[%s20611_s6 + $0xb8] sm:$0xf]  ;;  %v362_v21 = vmul.f32 %v16512_v32, %v320_v18  ;;  %v325_v20 = vsub.f32 %v16607_v27, %v293_v53  ;;  %v16719_v18 = vld [vmem:[%s20611_s6 + $0xc8] sm:$0xf]  ;;  %v298_v8 = vmul.f32 %v16503_v4, %v256_v43 }
  0xab   :  { %v257_v58 = vmul.f32 %v16668_v14, %v16668_v14  ;;  %v14739_v3 = vpack.c.bf16 %v365_v12, %v364_v19  ;;  %v16734_v12 = vld [vmem:[%s20611_s6 + $0xc0] sm:$0xff]  ;;  %v259_v53 = vmul.f32 %v16719_v18, %v16719_v18 }
  0xac   :  { %v14733_v26 = vpack.c.bf16 %v363_v13, %v362_v21  ;;  %v329_v13 = vsub.f32 %v16663_v61, %v297_v57  ;;  %v16789_v57 = vld [vmem:[%s20611_s6 + $0xe0] sm:$0xff] }
  0xad   :  { %v299_v11 = vmul.f32 %v16529_v55, %v257_v58  ;;  %v260_v58 = vmul.f32 %v16741_v36, %v16741_v36 }
  0xaf   :  { %13836 = vmatmul.mubr.msk.f32.vlgmr.msra.gmra.mrb[18].mxu0 %vm384_vm0, %v16011_v15  ;;  %13843 = vmatmul.mubr.msk.f32.vlgmr.msra.gmra.mrb[18].mxu1 %vm384_vm0, %v16038_v23  ;;  %v324_v15 = vsub.f32 %v16622_v46, %v292_v22  ;;  %v326_v23 = vsub.f32 %v16629_v50, %v294_v10  ;;  %v331_v10 = vsub.f32 %v16668_v14, %v299_v11  ;;  %v16796_v11 = vld [vmem:[%s20611_s6 + $0xf0] sm:$0xff] }
  0xb0   :  { %14726 = vmatpush3.bf16.xpose.msk.msra.mxu0 %vm15965_vm1, %v14721_v38  ;;  %14732 = vmatpush3.bf16.xpose.msk.msra.mxu1 %vm15965_vm1, %v14727_v62  ;;  %v367_v38 = vmul.f32 %v16543_v9, %v325_v20  ;;  %v369_v62 = vmul.f32 %v16543_v9, %v327_v17  ;;  %v301_v20 = vmul.f32 %v16529_v55, %v259_v53 }
  0xb1   :  { %14735 = vmatprep.subr.msk.bf16.mxu0 %vm15965_vm1, %v14733_v26  ;;  %14741 = vmatprep.subr.msk.bf16.mxu1 %vm15965_vm1, %v14739_v3  ;;  %v366_v1 = vmul.f32 %v16512_v32, %v324_v15  ;;  %v368_v6 = vmul.f32 %v16512_v32, %v326_v23  ;;  %v302_v43 = vmul.f32 %v16503_v4, %v260_v58 }
  0xb2   :  { %13849 = vmatprep.mubr.msk.f32.mxu0 %vm384_vm0, %v16046_v25  ;;  %13856 = vmatprep.mubr.msk.f32.mxu1 %vm384_vm0, %v16074_v33  ;;  %v16724_v25 = vld [vmem:[%s20611_s6 + $0xd8] sm:$0xf]  ;;  %v296_v33 = vmul.f32 %v16503_v4, %v254_v30  ;;  %v16775_v30 = vld [vmem:[%s20611_s6 + $0xe8] sm:$0xf]  ;;  %v264_v53 = vmul.f32 %v16796_v11, %v16796_v11 }
  0xb3   :  { %v261_v21 = vmul.f32 %v16724_v25, %v16724_v25  ;;  %v14745_v19 = vpack.c.bf16 %v367_v38, %v366_v1  ;;  %v14751_v22 = vpack.c.bf16 %v369_v62, %v368_v6  ;;  %20872 = vst [vmem:[#allocation25_spill] sm:$0xff] %v16775_v30  ;;  %v263_v62 = vmul.f32 %v16775_v30, %v16775_v30 }
  0xb4   :  { %v328_v5 = vsub.f32 %v16677_v56, %v296_v33  ;;  %v333_v6 = vsub.f32 %v16719_v18, %v301_v20  ;;  %v306_v58 = vmul.f32 %v16503_v4, %v264_v53 }
  0xb5   :  { %v303_v17 = vmul.f32 %v16529_v55, %v261_v21  ;;  %v305_v21 = vmul.f32 %v16529_v55, %v263_v62 }
  0xb7   :  { %13850 = vmatmul.mubr.msk.f32.vlgmr.msra.gmra.mrb[20].mxu0 %vm384_vm0, %v16061_v29  ;;  %13857 = vmatmul.mubr.msk.f32.vlgmr.msra.gmra.mrb[20].mxu1 %vm384_vm0, %v16083_v35  ;;  %v330_v29 = vsub.f32 %v16684_v24, %v298_v8  ;;  %v258_v35 = vmul.f32 %v16734_v12, %v16734_v12  ;;  %v335_v8 = vsub.f32 %v16724_v25, %v303_v17 }
  0xb8   :  { %14738 = vmatpush3.bf16.xpose.msk.msra.mxu0 %vm15965_vm1, %v14733_v26  ;;  %14744 = vmatpush3.bf16.xpose.msk.msra.mxu1 %vm15965_vm1, %v14739_v3  ;;  %v371_v26 = vmul.f32 %v16543_v9, %v329_v13  ;;  %v373_v3 = vmul.f32 %v16543_v9, %v331_v10  ;;  %v262_v13 = vmul.f32 %v16789_v57, %v16789_v57 }
  0xb9   :  { %14747 = vmatprep.subr.msk.bf16.mxu0 %vm15965_vm1, %v14745_v19  ;;  %14753 = vmatprep.subr.msk.bf16.mxu1 %vm15965_vm1, %v14751_v22  ;;  %v372_v15 = vmul.f32 %v16512_v32, %v330_v29  ;;  %v300_v23 = vmul.f32 %v16503_v4, %v258_v35 }
  0xba   :  { %13863 = vmatprep.mubr.msk.f32.mxu0 %vm384_vm0, %v16143_v49  ;;  %13870 = vmatprep.mubr.msk.f32.mxu1 %vm384_vm0, %v16171_v54  ;;  %v16780_v49 = vld [vmem:[%s20611_s6 + $0xf8] sm:$0xf]  ;;  %v370_v54 = vmul.f32 %v16512_v32, %v328_v5  ;;  %v304_v35 = vmul.f32 %v16503_v4, %v262_v13  ;;  %v20881_v13 = vld [vmem:[#allocation4_spill] sm:$0xff] }
  0xbb   :  { %20873 = vst [vmem:[#allocation26_spill] sm:$0xff] %v16780_v49  ;;  %v265_v33 = vmul.f32 %v16780_v49, %v16780_v49  ;;  %v14763_v1 = vpack.c.bf16 %v373_v3, %v372_v15 }
  0xbc   :  { %v14757_v38 = vpack.c.bf16 %v371_v26, %v370_v54 }
  0xbd   :  { %v307_v10 = vmul.f32 %v16529_v55, %v265_v33 }
  0xbf   :  { %13864 = vmatmul.mubr.msk.f32.vlgmr.msra.gmra.mrb[22].mxu0 %vm384_vm0, %v16154_v51  ;;  %13871 = vmatmul.mubr.msk.f32.vlgmr.msra.gmra.mrb[22].mxu1 %vm384_vm0, %v16188_v59  ;;  %v332_v51 = vsub.f32 %v16734_v12, %v300_v23  ;;  %v334_v59 = vsub.f32 %v16741_v36, %v302_v43  ;;  %v339_v55 = vsub.f32 %v16780_v49, %v307_v10  ;;  %v16907_v43 = vld [vmem:[%s20613_s2 + $0x8] sm:$0xf]  ;;  %v20918_v49 = vld [vmem:[#allocation16_spill] sm:$0xff] }
  0xc0   :  { %14750 = vmatpush3.bf16.xpose.msk.msra.mxu0 %vm15965_vm1, %v14745_v19  ;;  %14756 = vmatpush3.bf16.xpose.msk.msra.mxu1 %vm15965_vm1, %v14751_v22  ;;  %v375_v19 = vmul.f32 %v16543_v9, %v333_v6  ;;  %v377_v22 = vmul.f32 %v16543_v9, %v335_v8  ;;  %v16922_v8 = vld [vmem:[%s20613_s2] sm:$0xff] }
  0xc1   :  { %14759 = vmatprep.subr.msk.bf16.mxu0 %vm15965_vm1, %v14757_v38  ;;  %14765 = vmatprep.subr.msk.bf16.mxu1 %vm15965_vm1, %v14763_v1  ;;  %v374_v5 = vmul.f32 %v16512_v32, %v332_v51  ;;  %v376_v29 = vmul.f32 %v16512_v32, %v334_v59  ;;  %v381_v3 = vmul.f32 %v16543_v9, %v339_v55  ;;  %v20882_v51 = vld [vmem:[#allocation5_spill] sm:$0xff] }
  0xc2   :  { %13877 = vmatprep.mubr.msk.f32.mxu0 %vm384_vm0, %v16288_v28  ;;  %13884 = vmatprep.mubr.msk.f32.mxu1 %vm384_vm0, %v16306_v39  ;;  %v337_v28 = vsub.f32 %v16775_v30, %v305_v21 }
  0xc3   :  { %v14769_v39 = vpack.c.bf16 %v375_v19, %v374_v5  ;;  %v14775_v26 = vpack.c.bf16 %v377_v22, %v376_v29  ;;  %v16939_v19 = vld [vmem:[%s20612_s7 + $0x8] sm:$0xf]  ;;  %v16944_v22 = vld [vmem:[%s20612_s7 + $0x18] sm:$0xf] }
  0xc4   :  { %v379_v4 = vmul.f32 %v16543_v9, %v337_v28  ;;  %v20880_v9 = vld [vmem:[#allocation22_spill] sm:$0xff] }
  0xc7   :  { %13878 = vmatmul.mubr.msk.f32.vlgmr.msra.gmra.mrb[24].mxu0 %vm384_vm0, %v16293_v31  ;;  %13885 = vmatmul.mubr.msk.f32.vlgmr.msra.gmra.mrb[24].mxu1 %vm384_vm0, %v16311_v40  ;;  %v336_v31 = vsub.f32 %v16789_v57, %v304_v35  ;;  %v338_v40 = vsub.f32 %v16796_v11, %v306_v58  ;;  %v16954_v35 = vld [vmem:[%s20612_s7 + $0x20] sm:$0xff] }
  0xc8   :  { %14762 = vmatpush3.bf16.xpose.msk.msra.mxu0 %vm15965_vm1, %v14757_v38  ;;  %14768 = vmatpush3.bf16.xpose.msk.msra.mxu1 %vm15965_vm1, %v14763_v1 }
  0xc9   :  { %14771 = vmatprep.subr.msk.bf16.mxu0 %vm15965_vm1, %v14769_v39  ;;  %14777 = vmatprep.subr.msk.bf16.mxu1 %vm15965_vm1, %v14775_v26  ;;  %v378_v20 = vmul.f32 %v16512_v32, %v336_v31  ;;  %v380_v17 = vmul.f32 %v16512_v32, %v338_v40  ;;  %v20874_v32 = vld [vmem:[#allocation18_spill] sm:$0xff] }
  0xca   :  { %13891 = vmatprep.mubr.msk.f32.mxu0 %vm384_vm0, %v16335_v37  ;;  %13898 = vmatprep.mubr.msk.f32.mxu1 %vm384_vm0, %v16345_v44  ;;  %v20875_v37 = vld [vmem:[#allocation19_spill] sm:$0xff]  ;;  %v20877_v44 = vld [vmem:[#allocation2_spill] sm:$0xff] }
  0xcb   :  { %v14781_v54 = vpack.c.bf16 %v379_v4, %v378_v20  ;;  %v14787_v15 = vpack.c.bf16 %v381_v3, %v380_v17 }
  0xcf   :  { %13892 = vmatmul.mubr.msk.f32.vlgmr.msra.gmra.mrb[26].mxu0 %vm384_vm0, %v16340_v41  ;;  %13899 = vmatmul.mubr.msk.f32.vlgmr.msra.gmra.mrb[26].mxu1 %vm384_vm0, %v16350_v47  ;;  %v20876_v41 = vld [vmem:[#allocation21_spill] sm:$0xff]  ;;  %v20878_v47 = vld [vmem:[#allocation3_spill] sm:$0xff] }
  0xd0   :  { %14774 = vmatpush3.bf16.xpose.msk.msra.mxu0 %vm15965_vm1, %v14769_v39  ;;  %14780 = vmatpush3.bf16.xpose.msk.msra.mxu1 %vm15965_vm1, %v14775_v26  ;;  %v16967_v39 = vld [vmem:[%s20612_s7 + $0x30] sm:$0xff] }
  0xd1   :  { %14783 = vmatprep.subr.msk.bf16.mxu0 %vm15965_vm1, %v14781_v54  ;;  %14789 = vmatprep.subr.msk.bf16.mxu1 %vm15965_vm1, %v14787_v15 }
  0xd2   :  { %13905 = vmatprep.mubr.msk.f32.mxu0 %vm384_vm0, %v16374_v45  ;;  %13912 = vmatprep.mubr.msk.f32.mxu1 %vm384_vm0, %v16384_v52  ;;  %v16893_v45 = vld [vmem:[%s20612_s7] sm:$0xff]  ;;  %v20879_v52 = vld [vmem:[#allocation20_spill] sm:$0xff] }
  0xd7   :  { %13906 = vmatmul.mubr.msk.f32.vlgmr.msra.gmra.mrb[28].mxu0 %vm384_vm0, %v16379_v48  ;;  %13913 = vmatmul.mubr.msk.f32.vlgmr.msra.gmra.mrb[28].mxu1 %vm384_vm0, %v20874_v32  ;;  %v16898_v48 = vld [vmem:[%s20612_s7 + $0x10] sm:$0xff]  ;;  %v20888_v32 = vld [vmem:[#allocation6_spill] sm:$0xff] }
  0xd8   :  { %14786 = vmatpush3.bf16.xpose.msk.msra.mxu0 %vm15965_vm1, %v14781_v54  ;;  %14792 = vmatpush3.bf16.xpose.msk.msra.mxu1 %vm15965_vm1, %v14787_v15 }
  0xd9   :  { %13919 = vmatprep.mubr.msk.f32.mxu0 %vm384_vm0, %v20875_v37  ;;  %13926 = vmatprep.mubr.msk.f32.mxu1 %vm384_vm0, %v20876_v41  ;;  %v20889_v37 = vld [vmem:[#allocation7_spill] sm:$0xff] }
  0xda   :  { %14795 = vmatprep.subr.msk.bf16.mxu0 %vm15965_vm1, %v20877_v44  ;;  %14801 = vmatprep.subr.msk.bf16.mxu1 %vm15965_vm1, %v20878_v47 }
  0xdf   :  { %13920 = vmatmul.mubr.msk.f32.vlgmr.msra.gmra.mrb[30].mxu0 %vm384_vm0, %v20879_v52  ;;  %13927 = vmatmul.mubr.msk.f32.vlgmr.msra.gmra.mrb[30].mxu1 %vm384_vm0, %v20880_v9  ;;  %v13711_v23 = vpop.f32.mrb[0].mxu0 }
  0xe0   :  { %14798 = vmatpush3.bf16.xpose.msk.msra.mxu0 %vm15965_vm1, %v20877_v44  ;;  %14804 = vmatpush3.bf16.xpose.msk.msra.mxu1 %vm15965_vm1, %v20878_v47  ;;  %v5666_v38 = vmul.f32 0.25, %v13711_v23  ;;  %v13718_v62 = vpop.f32.mrb[0].mxu1  ;;  %v463_v33 = vpop.f32.mrb[1].mxu0  ;;  %v17000_v47 = vld [vmem:[%s20612_s7 + $0x28] sm:$0xf] }
  0xe1   :  { %13933 = vmatprep.mubr.msk.f32.mxu0 %vm384_vm0, %v16893_v45  ;;  %13940 = vmatprep.mubr.msk.f32.mxu1 %vm384_vm0, %v16898_v48  ;;  %v5668_v1 = vmul.f32 0.25, %v13718_v62  ;;  %v550_v6 = vpop.f32.mrb[1].mxu1  ;;  %v5665_v10 = vmul.f32 0.25, %v463_v33  ;;  %v17009_v23 = vld [vmem:[%s20612_s7 + $0x38] sm:$0xf] }
  0xe2   :  { %14807 = vmatprep.subr.msk.bf16.mxu0 %vm15965_vm1, %v20881_v13  ;;  %14813 = vmatprep.subr.msk.bf16.mxu1 %vm15965_vm1, %v20882_v51  ;;  %v5667_v59 = vmul.f32 0.25, %v550_v6  ;;  %v16931_v53 = vadd.f32 %v5666_v38, %v16907_v43  ;;  %v17014_v38 = vld [vmem:[%s20612_s7 + $0x40] sm:$0xff] }
  0xe3   :  { %v16934_v21 = vadd.f32 %v5668_v1, %v16907_v43  ;;  %v16973_v4 = vadd.f32 %v5665_v10, %v16922_v8 }
  0xe4   :  { %20883 = vst [vmem:[#allocation18_spill] sm:$0xff] %v16931_v53  ;;  %v5926_v5 = vsel %vm5925_vm2, %v16931_v53, -inf  ;;  %v16949_v29 = vadd.f32 %v5667_v59, %v16922_v8 }
  0xe5   :  { %20884 = vst [vmem:[#allocation19_spill] sm:$0xff] %v16934_v21  ;;  %5927 = vmax.xlane.f32.xlu0 %v5926_v5  ;;  %v5932_v28 = vsel %vm5925_vm2, %v16934_v21, -inf  ;;  %20886 = vst [vmem:[#allocation2_spill] sm:$0xff] %v16973_v4  ;;  %v5922_v52 = vsel %vm5921_vm3, %v16973_v4, -inf  ;;  %v20912_v4 = vld [vmem:[#allocation14_spill] sm:$0xff] }
  0xe6   :  { %20885 = vst [vmem:[#allocation21_spill] sm:$0xff] %v16949_v29  ;;  %v5929_v58 = vsel %vm5921_vm3, %v16949_v29, -inf }
  0xe7   :  { %13934 = vmatmul.mubr.msk.f32.vlgmr.msra.gmra.mrb[32].mxu0 %vm384_vm0, %v16939_v19  ;;  %13941 = vmatmul.mubr.msk.f32.vlgmr.msra.gmra.mrb[32].mxu1 %vm384_vm0, %v16944_v22  ;;  %v13725_v26 = vpop.f32.mrb[2].mxu0 }
  0xe8   :  { %5930 = vmax.xlane.f32.xlu1 %v5929_v58  ;;  %14810 = vmatpush3.bf16.xpose.msk.msra.mxu0 %vm15965_vm1, %v20881_v13  ;;  %v5670_v55 = vmul.f32 0.25, %v13725_v26  ;;  %v637_v31 = vpop.f32.mrb[3].mxu0  ;;  %v13732_v40 = vpop.f32.mrb[2].mxu1  ;;  %v17033_v13 = vld [vmem:[%s20612_s7 + $0x50] sm:$0xff] }
  0xe9   :  { %14816 = vmatpush3.bf16.xpose.msk.msra.mxu1 %vm15965_vm1, %v20882_v51  ;;  %13947 = vmatprep.mubr.msk.f32.mxu0 %vm384_vm0, %v16954_v35  ;;  %v5669_v3 = vmul.f32 0.25, %v637_v31  ;;  %v5672_v20 = vmul.f32 0.25, %v13732_v40  ;;  %v724_v17 = vpop.f32.mrb[3].mxu1  ;;  %v20894_v40 = vld [vmem:[#allocation8_spill] sm:$0xff] }
  0xea   :  { %5933 = vmax.xlane.f32.xlu0 %v5932_v28  ;;  %13954 = vmatprep.mubr.msk.f32.mxu1 %vm384_vm0, %v16967_v39  ;;  %v16983_v54 = vadd.f32 %v5670_v55, %v16907_v43  ;;  %v5671_v15 = vmul.f32 0.25, %v724_v17  ;;  %v17059_v17 = vld [vmem:[%s20612_s7 + $0x48] sm:$0xf] }
  0xeb   :  { %14819 = vmatprep.subr.msk.bf16.mxu0 %vm15965_vm1, %v20888_v32  ;;  %14825 = vmatprep.subr.msk.bf16.mxu1 %vm15965_vm1, %v20889_v37  ;;  %v16992_v41 = vadd.f32 %v5672_v20, %v16907_v43  ;;  %v16995_v44 = vadd.f32 %v5669_v3, %v16922_v8 }
  0xec   :  { %20887 = vst [vmem:[#allocation3_spill] sm:$0xff] %v16983_v54  ;;  %v5938_v9 = vsel %vm5925_vm2, %v16983_v54, -inf  ;;  %v17021_v1 = vadd.f32 %v5671_v15, %v16922_v8  ;;  %v20897_v15 = vld [vmem:[#allocation9_spill] sm:$0xff] }
  0xed   :  { %20890 = vst [vmem:[#allocation20_spill] sm:$0xff] %v16992_v41  ;;  %20891 = vst [vmem:[#allocation22_spill] sm:$0xff] %v16995_v44  ;;  %5939 = vmax.xlane.f32.xlu1 %v5938_v9  ;;  %v5944_v62 = vsel %vm5925_vm2, %v16992_v41, -inf  ;;  %v5935_v33 = vsel %vm5921_vm3, %v16995_v44, -inf  ;;  %v20906_v44 = vld [vmem:[#allocation12_spill] sm:$0xff] }
  0xee   :  { %5923 = vmax.xlane.f32.xlu0 %v5922_v52  ;;  %20892 = vst [vmem:[#allocation4_spill] sm:$0xff] %v17021_v1  ;;  %v5941_v26 = vsel %vm5921_vm3, %v17021_v1, -inf  ;;  %v17074_v52 = vld [vmem:[%s20612_s7 + $0x60] sm:$0xff] }
  0xef   :  { %13948 = vmatmul.mubr.msk.f32.vlgmr.msra.gmra.mrb[34].mxu0 %vm384_vm0, %v17000_v47  ;;  %v13739_v6 = vpop.f32.mrb[4].mxu0 }
  0xf0   :  { %13955 = vmatmul.mubr.msk.f32.vlgmr.msra.gmra.mrb[34].mxu1 %vm384_vm0, %v17009_v23  ;;  %14822 = vmatpush3.bf16.xpose.msk.msra.mxu0 %vm15965_vm1, %v20888_v32  ;;  %v5674_v51 = vmul.f32 0.25, %v13739_v6  ;;  %v811_v59 = vpop.f32.mrb[5].mxu0  ;;  %v13746_v10 = vpop.f32.mrb[4].mxu1 }
  0xf1   :  { %14828 = vmatpush3.bf16.xpose.msk.msra.mxu1 %vm15965_vm1, %v20889_v37  ;;  %13961 = vmatprep.mubr.msk.f32.mxu0 %vm384_vm0, %v17014_v38  ;;  %v5673_v5 = vmul.f32 0.25, %v811_v59  ;;  %v5676_v58 = vmul.f32 0.25, %v13746_v10  ;;  %v898_v28 = vpop.f32.mrb[5].mxu1  ;;  %v17069_v37 = vld [vmem:[%s20612_s7 + $0x58] sm:$0xf] }
  0xf2   :  { %5945 = vmax.xlane.f32.xlu0 %v5944_v62  ;;  %5936 = vmax.xlane.f32.xlu1 %v5935_v33  ;;  %v17043_v55 = vadd.f32 %v5674_v51, %v16907_v43  ;;  %v5675_v31 = vmul.f32 0.25, %v898_v28  ;;  %v17093_v51 = vld [vmem:[%s20612_s7 + $0x70] sm:$0xff] }
  0xf3   :  { %13968 = vmatprep.mubr.msk.f32.mxu1 %vm384_vm0, %v17033_v13  ;;  %14831 = vmatprep.subr.msk.bf16.mxu0 %vm15965_vm1, %v20894_v40  ;;  %v17051_v3 = vadd.f32 %v5676_v58, %v16907_v43  ;;  %v17054_v20 = vadd.f32 %v5673_v5, %v16922_v8 }
  0xf4   :  { %20893 = vst [vmem:[#allocation5_spill] sm:$0xff] %v17043_v55  ;;  %14837 = vmatprep.subr.msk.bf16.mxu1 %vm15965_vm1, %v20897_v15  ;;  %v5950_v32 = vsel %vm5925_vm2, %v17043_v55, -inf  ;;  %v17081_v33 = vadd.f32 %v5675_v31, %v16922_v8 }
  0xf5   :  { %20895 = vst [vmem:[#allocation6_spill] sm:$0xff] %v17051_v3  ;;  %20896 = vst [vmem:[#allocation7_spill] sm:$0xff] %v17054_v20  ;;  %v5956_v9 = vsel %vm5925_vm2, %v17051_v3, -inf  ;;  %v5947_v62 = vsel %vm5921_vm3, %v17054_v20, -inf }
  0xf6   :  { %5942 = vmax.xlane.f32.xlu0 %v5941_v26  ;;  %5951 = vmax.xlane.f32.xlu1 %v5950_v32  ;;  %20898 = vst [vmem:[#allocation8_spill] sm:$0xff] %v17081_v33  ;;  %v5953_v31 = vsel %vm5921_vm3, %v17081_v33, -inf }
  0xf7   :  { %13962 = vmatmul.mubr.msk.f32.vlgmr.msra.gmra.mrb[36].mxu0 %vm384_vm0, %v17059_v17  ;;  %v13753_v6 = vpop.f32.mrb[6].mxu0 }
  0xf8   :  { %13969 = vmatmul.mubr.msk.f32.vlgmr.msra.gmra.mrb[36].mxu1 %vm384_vm0, %v17069_v37  ;;  %14834 = vmatpush3.bf16.xpose.msk.msra.mxu0 %vm15965_vm1, %v20894_v40  ;;  %v5678_v59 = vmul.f32 0.25, %v13753_v6  ;;  %v985_v10 = vpop.f32.mrb[7].mxu0  ;;  %v13760_v5 = vpop.f32.mrb[6].mxu1  ;;  %v20900_v6 = vld [vmem:[#allocation10_spill] sm:$0xff] }
  0xf9   :  { %14840 = vmatpush3.bf16.xpose.msk.msra.mxu1 %vm15965_vm1, %v20897_v15  ;;  %13975 = vmatprep.mubr.msk.f32.mxu0 %vm384_vm0, %v17074_v52  ;;  %v5677_v58 = vmul.f32 0.25, %v985_v10  ;;  %v5680_v28 = vmul.f32 0.25, %v13760_v5  ;;  %v1072_v26 = vpop.f32.mrb[7].mxu1  ;;  %v17129_v5 = vld [vmem:[%s20612_s7 + $0x78] sm:$0xf] }
  0xfa   :  { %5957 = vmax.xlane.f32.xlu0 %v5956_v9  ;;  %5948 = vmax.xlane.f32.xlu1 %v5947_v62  ;;  %v17103_v40 = vadd.f32 %v5678_v59, %v16907_v43  ;;  %v5679_v32 = vmul.f32 0.25, %v1072_v26  ;;  %v17119_v62 = vld [vmem:[%s20612_s7 + $0x68] sm:$0xf] }
  0xfb   :  { %13982 = vmatprep.mubr.msk.f32.mxu1 %vm384_vm0, %v17093_v51  ;;  %14843 = vmatprep.subr.msk.bf16.mxu0 %vm15965_vm1, %v20900_v6  ;;  %v17111_v15 = vadd.f32 %v5680_v28, %v16907_v43  ;;  %v17114_v9 = vadd.f32 %v5677_v58, %v16922_v8  ;;  %v20903_v59 = vld [vmem:[#allocation11_spill] sm:$0xff]  ;;  %v17134_v58 = vld [vmem:[%s20612_s7 + $0x80] sm:$0xff] }
  0xfc   :  { %20899 = vst [vmem:[#allocation9_spill] sm:$0xff] %v17103_v40  ;;  %14849 = vmatprep.subr.msk.bf16.mxu1 %vm15965_vm1, %v20903_v59  ;;  %v5962_v10 = vsel %vm5925_vm2, %v17103_v40, -inf  ;;  %v17141_v40 = vadd.f32 %v5679_v32, %v16922_v8 }
  0xfd   :  { %20901 = vst [vmem:[#allocation10_spill] sm:$0xff] %v17111_v15  ;;  %20902 = vst [vmem:[#allocation27_spill] sm:$0xff] %v17114_v9  ;;  %v5968_v28 = vsel %vm5925_vm2, %v17111_v15, -inf  ;;  %v5959_v26 = vsel %vm5921_vm3, %v17114_v9, -inf }
  0xfe   :  { %5954 = vmax.xlane.f32.xlu0 %v5953_v31  ;;  %5963 = vmax.xlane.f32.xlu1 %v5962_v10  ;;  %20904 = vst [vmem:[#allocation11_spill] sm:$0xff] %v17141_v40  ;;  %v17153_v31 = vld [vmem:[%s20612_s7 + $0x90] sm:$0xff]  ;;  %v5965_v55 = vsel %vm5921_vm3, %v17141_v40, -inf }
  0xff   :  { %13976 = vmatmul.mubr.msk.f32.vlgmr.msra.gmra.mrb[38].mxu0 %vm384_vm0, %v17119_v62  ;;  %v13767_v20 = vpop.f32.mrb[8].mxu0 }
 0x100   :  { %13983 = vmatmul.mubr.msk.f32.vlgmr.msra.gmra.mrb[38].mxu1 %vm384_vm0, %v17129_v5  ;;  %14846 = vmatpush3.bf16.xpose.msk.msra.mxu0 %vm15965_vm1, %v20900_v6  ;;  %v5682_v10 = vmul.f32 0.25, %v13767_v20  ;;  %v1159_v9 = vpop.f32.mrb[9].mxu0  ;;  %v13774_v32 = vpop.f32.mrb[8].mxu1 }
 0x101   :  { %14852 = vmatpush3.bf16.xpose.msk.msra.mxu1 %vm15965_vm1, %v20903_v59  ;;  %13989 = vmatprep.mubr.msk.f32.mxu0 %vm384_vm0, %v17134_v58  ;;  %v5681_v15 = vmul.f32 0.25, %v1159_v9  ;;  %v5684_v33 = vmul.f32 0.25, %v13774_v32  ;;  %v1246_v6 = vpop.f32.mrb[9].mxu1 }
 0x102   :  { %5969 = vmax.xlane.f32.xlu0 %v5968_v28  ;;  %5960 = vmax.xlane.f32.xlu1 %v5959_v26  ;;  %v17163_v3 = vadd.f32 %v5682_v10, %v16907_v43  ;;  %v5683_v20 = vmul.f32 0.25, %v1246_v6  ;;  %v17179_v28 = vld [vmem:[%s20612_s7 + $0x88] sm:$0xf]  ;;  %v20909_v26 = vld [vmem:[#allocation13_spill] sm:$0xff] }
 0x103   :  { %13996 = vmatprep.mubr.msk.f32.mxu1 %vm384_vm0, %v17153_v31  ;;  %14855 = vmatprep.subr.msk.bf16.mxu0 %vm15965_vm1, %v20906_v44  ;;  %v17171_v59 = vadd.f32 %v5684_v33, %v16907_v43  ;;  %v17174_v9 = vadd.f32 %v5681_v15, %v16922_v8  ;;  %v17189_v33 = vld [vmem:[%s20612_s7 + $0x98] sm:$0xf]  ;;  %v17194_v15 = vld [vmem:[%s20612_s7 + $0xa0] sm:$0xff] }
 0x104   :  { %20905 = vst [vmem:[#allocation28_spill] sm:$0xff] %v17163_v3  ;;  %14861 = vmatprep.subr.msk.bf16.mxu1 %vm15965_vm1, %v20909_v26  ;;  %v5974_v10 = vsel %vm5925_vm2, %v17163_v3, -inf  ;;  %v17201_v3 = vadd.f32 %v5683_v20, %v16922_v8 }
 0x105   :  { %20907 = vst [vmem:[#allocation12_spill] sm:$0xff] %v17171_v59  ;;  %20908 = vst [vmem:[#allocation29_spill] sm:$0xff] %v17174_v9  ;;  %v5980_v32 = vsel %vm5925_vm2, %v17171_v59, -inf  ;;  %v5971_v6 = vsel %vm5921_vm3, %v17174_v9, -inf }
 0x106   :  { %5966 = vmax.xlane.f32.xlu0 %v5965_v55  ;;  %5975 = vmax.xlane.f32.xlu1 %v5974_v10  ;;  %20910 = vst [vmem:[#allocation13_spill] sm:$0xff] %v17201_v3  ;;  %v17213_v55 = vld [vmem:[%s20612_s7 + $0xb0] sm:$0xff]  ;;  %v5977_v54 = vsel %vm5921_vm3, %v17201_v3, -inf }
 0x107   :  { %13990 = vmatmul.mubr.msk.f32.vlgmr.msra.gmra.mrb[40].mxu0 %vm384_vm0, %v17179_v28  ;;  %v13781_v40 = vpop.f32.mrb[10].mxu0 }
 0x108   :  { %13997 = vmatmul.mubr.msk.f32.vlgmr.msra.gmra.mrb[40].mxu1 %vm384_vm0, %v17189_v33  ;;  %14858 = vmatpush3.bf16.xpose.msk.msra.mxu0 %vm15965_vm1, %v20906_v44  ;;  %v5686_v10 = vmul.f32 0.25, %v13781_v40  ;;  %v1333_v9 = vpop.f32.mrb[11].mxu0  ;;  %v13788_v20 = vpop.f32.mrb[10].mxu1 }
 0x109   :  { %14864 = vmatpush3.bf16.xpose.msk.msra.mxu1 %vm15965_vm1, %v20909_v26  ;;  %14003 = vmatprep.mubr.msk.f32.mxu0 %vm384_vm0, %v17194_v15  ;;  %v5685_v59 = vmul.f32 0.25, %v1333_v9  ;;  %v5688_v1 = vmul.f32 0.25, %v13788_v20  ;;  %v1420_v44 = vpop.f32.mrb[11].mxu1 }
 0x10a   :  { %5981 = vmax.xlane.f32.xlu0 %v5980_v32  ;;  %5972 = vmax.xlane.f32.xlu1 %v5971_v6  ;;  %v17223_v41 = vadd.f32 %v5686_v10, %v16907_v43  ;;  %v5687_v40 = vmul.f32 0.25, %v1420_v44  ;;  %v17239_v32 = vld [vmem:[%s20612_s7 + $0xa8] sm:$0xf] }
 0x10b   :  { %14010 = vmatprep.mubr.msk.f32.mxu1 %vm384_vm0, %v17213_v55  ;;  %14867 = vmatprep.subr.msk.bf16.mxu0 %vm15965_vm1, %v20912_v4  ;;  %v17231_v26 = vadd.f32 %v5688_v1, %v16907_v43  ;;  %v17234_v9 = vadd.f32 %v5685_v59, %v16922_v8  ;;  %v20915_v6 = vld [vmem:[#allocation15_spill] sm:$0xff]  ;;  %v17249_v1 = vld [vmem:[%s20612_s7 + $0xb8] sm:$0xf]  ;;  %v17254_v59 = vld [vmem:[%s20612_s7 + $0xc0] sm:$0xff] }
 0x10c   :  { %20911 = vst [vmem:[#allocation30_spill] sm:$0xff] %v17223_v41  ;;  %14873 = vmatprep.subr.msk.bf16.mxu1 %vm15965_vm1, %v20915_v6  ;;  %v5986_v10 = vsel %vm5925_vm2, %v17223_v41, -inf  ;;  %v17261_v41 = vadd.f32 %v5687_v40, %v16922_v8 }
 0x10d   :  { %20913 = vst [vmem:[#allocation14_spill] sm:$0xff] %v17231_v26  ;;  %20914 = vst [vmem:[#allocation31_spill] sm:$0xff] %v17234_v9  ;;  %v5992_v20 = vsel %vm5925_vm2, %v17231_v26, -inf  ;;  %v5983_v44 = vsel %vm5921_vm3, %v17234_v9, -inf }
 0x10e   :  { %5978 = vmax.xlane.f32.xlu0 %v5977_v54  ;;  %5987 = vmax.xlane.f32.xlu1 %v5986_v10  ;;  %20916 = vst [vmem:[#allocation15_spill] sm:$0xff] %v17261_v41  ;;  %v17273_v54 = vld [vmem:[%s20612_s7 + $0xd0] sm:$0xff]  ;;  %v5989_v21 = vsel %vm5921_vm3, %v17261_v41, -inf }
 0x10f   :  { %14004 = vmatmul.mubr.msk.f32.vlgmr.msra.gmra.mrb[42].mxu0 %vm384_vm0, %v17239_v32  ;;  %v13795_v3 = vpop.f32.mrb[12].mxu0 }
 0x110   :  { %14011 = vmatmul.mubr.msk.f32.vlgmr.msra.gmra.mrb[42].mxu1 %vm384_vm0, %v17249_v1  ;;  %14870 = vmatpush3.bf16.xpose.msk.msra.mxu0 %vm15965_vm1, %v20912_v4  ;;  %v5690_v10 = vmul.f32 0.25, %v13795_v3  ;;  %v1507_v9 = vpop.f32.mrb[13].mxu0  ;;  %v13802_v40 = vpop.f32.mrb[12].mxu1 }
 0x111   :  { %14876 = vmatpush3.bf16.xpose.msk.msra.mxu1 %vm15965_vm1, %v20915_v6  ;;  %14017 = vmatprep.mubr.msk.f32.mxu0 %vm384_vm0, %v17254_v59  ;;  %v5689_v26 = vmul.f32 0.25, %v1507_v9  ;;  %v5692_v29 = vmul.f32 0.25, %v13802_v40  ;;  %v1594_v4 = vpop.f32.mrb[13].mxu1 }
 0x112   :  { %5993 = vmax.xlane.f32.xlu0 %v5992_v20  ;;  %5984 = vmax.xlane.f32.xlu1 %v5983_v44  ;;  %v17283_v53 = vadd.f32 %v5690_v10, %v16907_v43  ;;  %v5691_v3 = vmul.f32 0.25, %v1594_v4  ;;  %v17299_v20 = vld [vmem:[%s20612_s7 + $0xc8] sm:$0xf]  ;;  %v20921_v44 = vld [vmem:[#allocation17_spill] sm:$0xff] }
 0x113   :  { %14024 = vmatprep.mubr.msk.f32.mxu1 %vm384_vm0, %v17273_v54  ;;  %14879 = vmatprep.subr.msk.bf16.mxu0 %vm15965_vm1, %v20918_v49  ;;  %v17291_v6 = vadd.f32 %v5692_v29, %v16907_v43  ;;  %v17294_v9 = vadd.f32 %v5689_v26, %v16922_v8  ;;  %v17309_v29 = vld [vmem:[%s20612_s7 + $0xd8] sm:$0xf]  ;;  %v17314_v26 = vld [vmem:[%s20612_s7 + $0xe0] sm:$0xff] }
 0x114   :  { %20917 = vst [vmem:[#allocation32_spill] sm:$0xff] %v17283_v53  ;;  %14885 = vmatprep.subr.msk.bf16.mxu1 %vm15965_vm1, %v20921_v44  ;;  %v5998_v10 = vsel %vm5925_vm2, %v17283_v53, -inf  ;;  %v14889_v53 = vpack.c.bf16 %v16939_v19, %v16893_v45  ;;  %v17323_v41 = vadd.f32 %v5691_v3, %v16922_v8  ;;  %v17337_v45 = vld [vmem:[%s20612_s7 + $0xf0] sm:$0xff] }
 0x115   :  { %20919 = vst [vmem:[#allocation16_spill] sm:$0xff] %v17291_v6  ;;  %20920 = vst [vmem:[#allocation33_spill] sm:$0xff] %v17294_v9  ;;  %v6004_v40 = vsel %vm5925_vm2, %v17291_v6, -inf  ;;  %v5995_v4 = vsel %vm5921_vm3, %v17294_v9, -inf }
 0x116   :  { %5990 = vmax.xlane.f32.xlu0 %v5989_v21  ;;  %5999 = vmax.xlane.f32.xlu1 %v5998_v10  ;;  %v14895_v10 = vpack.c.bf16 %v16944_v22, %v16898_v48  ;;  %v6001_v6 = vsel %vm5921_vm3, %v17323_v41, -inf }
 0x117   :  { %14018 = vmatmul.mubr.msk.f32.vlgmr.msra.gmra.mrb[44].mxu0 %vm384_vm0, %v17299_v20  ;;  %v13809_v21 = vpop.f32.mrb[14].mxu0 }
 0x118   :  { %14025 = vmatmul.mubr.msk.f32.vlgmr.msra.gmra.mrb[44].mxu1 %vm384_vm0, %v17309_v29  ;;  %14882 = vmatpush3.bf16.xpose.msk.msra.mxu0 %vm15965_vm1, %v20918_v49  ;;  %v5694_v19 = vmul.f32 0.25, %v13809_v21  ;;  %v1681_v3 = vpop.f32.mrb[15].mxu0  ;;  %v13816_v9 = vpop.f32.mrb[14].mxu1 }
 0x119   :  { %14888 = vmatpush3.bf16.xpose.msk.msra.mxu1 %vm15965_vm1, %v20921_v44  ;;  %14031 = vmatprep.mubr.msk.f32.mxu0 %vm384_vm0, %v17314_v26  ;;  %v5693_v48 = vmul.f32 0.25, %v1681_v3  ;;  %v5696_v22 = vmul.f32 0.25, %v13816_v9  ;;  %v1768_v49 = vpop.f32.mrb[15].mxu1  ;;  %v17362_v9 = vld [vmem:[%s20612_s7 + $0xe8] sm:$0xf] }
 0x11a   :  { %6005 = vmax.xlane.f32.xlu0 %v6004_v40  ;;  %5996 = vmax.xlane.f32.xlu1 %v5995_v4  ;;  %v17347_v30 = vadd.f32 %v5694_v19, %v16907_v43  ;;  %v5695_v21 = vmul.f32 0.25, %v1768_v49  ;;  %v17371_v19 = vld [vmem:[%s20612_s7 + $0xf8] sm:$0xf]  ;;  %v14901_v49 = vpack.c.bf16 %v17000_v47, %v16954_v35  ;;  %v20924_v47 = vld [vmem:[#allocation24_spill] sm:$0xff] }
 0x11b   :  { %14038 = vmatprep.mubr.msk.f32.mxu1 %vm384_vm0, %v17337_v45  ;;  %14891 = vmatprep.subr.msk.bf16.mxu0 %vm15965_vm1, %v14889_v53  ;;  %v17354_v44 = vadd.f32 %v5696_v22, %v16907_v43  ;;  %v17357_v40 = vadd.f32 %v5693_v48, %v16922_v8 }
 0x11c   :  { %20922 = vst [vmem:[#allocation17_spill] sm:$0xff] %v17347_v30  ;;  %14897 = vmatprep.subr.msk.bf16.mxu1 %vm15965_vm1, %v14895_v10  ;;  %v6010_v4 = vsel %vm5925_vm2, %v17347_v30, -inf  ;;  %v17378_v22 = vadd.f32 %v5695_v21, %v16922_v8  ;;  %v14907_v30 = vpack.c.bf16 %v17009_v23, %v16967_v39  ;;  %v14919_v39 = vpack.c.bf16 %v17069_v37, %v17033_v13  ;;  %v15889_v23 = vld [vmem:[%s20611_s6 + $0x8] sm:$0xf]  ;;  %v15892_v13 = vld [vmem:[%s20611_s6 + $0x30] sm:$0xff] }
 0x11d   :  { %v6016_v3 = vsel %vm5925_vm2, %v17354_v44, -inf  ;;  %v6007_v48 = vsel %vm5921_vm3, %v17357_v40, -inf  ;;  %v15893_v37 = vld [vmem:[%s20611_s6 + $0x28] sm:$0xf]  ;;  %v15894_v21 = vld [vmem:[%s20611_s6 + $0x38] sm:$0xf] }
 0x11e   :  { %6002 = vmax.xlane.f32.xlu0 %v6001_v6  ;;  %6011 = vmax.xlane.f32.xlu1 %v6010_v4  ;;  %v20923_v6 = vld [vmem:[#allocation23_spill] sm:$0xff]  ;;  %v6013_v35 = vsel %vm5921_vm3, %v17378_v22, -inf }
 0x11f   :  { %14032 = vmatmul.mubr.msk.f32.vlgmr.msra.gmra.mrb[46].mxu0 %vm384_vm0, %v17362_v9 }
 0x120   :  { %14039 = vmatmul.mubr.msk.f32.vlgmr.msra.gmra.mrb[46].mxu1 %vm384_vm0, %v17371_v19  ;;  %14894 = vmatpush3.bf16.xpose.msk.msra.mxu0 %vm15965_vm1, %v14889_v53  ;;  %v14913_v53 = vpack.c.bf16 %v17059_v17, %v17014_v38  ;;  %v15891_v38 = vld [vmem:[%s20611_s6 + $0x20] sm:$0xff]  ;;  %v14931_v17 = vpack.c.bf16 %v17129_v5, %v17093_v51  ;;  %v14943_v51 = vpack.c.bf16 %v17189_v33, %v17153_v31 }
 0x121   :  { %14900 = vmatpush3.bf16.xpose.msk.msra.mxu1 %vm15965_vm1, %v14895_v10  ;;  %14045 = vmatprep.mubr.msk.f32.mxu0 %vm384_vm0, %v20923_v6  ;;  %v15890_v10 = vld [vmem:[%s20611_s6 + $0x18] sm:$0xf]  ;;  %v14955_v5 = vpack.c.bf16 %v17249_v1, %v17213_v55 }
 0x122   :  { %6017 = vmax.xlane.f32.xlu0 %v6016_v3  ;;  %6008 = vmax.xlane.f32.xlu1 %v6007_v48 }
 0x123   :  { %14052 = vmatprep.mubr.msk.f32.mxu1 %vm384_vm0, %v20924_v47  ;;  %14903 = vmatprep.subr.msk.bf16.mxu0 %vm15965_vm1, %v14901_v49 }
 0x124   :  { %14909 = vmatprep.subr.msk.bf16.mxu1 %vm15965_vm1, %v14907_v30 }
 0x126   :  { %6014 = vmax.xlane.f32.xlu0 %v6013_v35 }
 0x127   :  { %14046 = vmatmul.mubr.msk.f32.vlgmr.msra.gmra.mrb[48].mxu0 %vm384_vm0, %v15889_v23 }
 0x128   :  { %14053 = vmatmul.mubr.msk.f32.vlgmr.msra.gmra.mrb[48].mxu1 %vm384_vm0, %v15890_v10  ;;  %14906 = vmatpush3.bf16.xpose.msk.msra.mxu0 %vm15965_vm1, %v14901_v49 }
 0x129   :  { %14912 = vmatpush3.bf16.xpose.msk.msra.mxu1 %vm15965_vm1, %v14907_v30  ;;  %14059 = vmatprep.mubr.msk.f32.mxu0 %vm384_vm0, %v15891_v38  ;;  %v14925_v30 = vpack.c.bf16 %v17119_v62, %v17074_v52  ;;  %v14937_v52 = vpack.c.bf16 %v17179_v28, %v17134_v58  ;;  %v15895_v62 = vld [vmem:[%s20611_s6 + $0x48] sm:$0xf] }
 0x12a   :  { %14066 = vmatprep.mubr.msk.f32.mxu1 %vm384_vm0, %v15892_v13  ;;  %14915 = vmatprep.subr.msk.bf16.mxu0 %vm15965_vm1, %v14913_v53 }
 0x12b   :  { %14921 = vmatprep.subr.msk.bf16.mxu1 %vm15965_vm1, %v14919_v39 }
 0x12f   :  { %14060 = vmatmul.mubr.msk.f32.vlgmr.msra.gmra.mrb[50].mxu0 %vm384_vm0, %v15893_v37 }
 0x130   :  { %14067 = vmatmul.mubr.msk.f32.vlgmr.msra.gmra.mrb[50].mxu1 %vm384_vm0, %v15894_v21  ;;  %14918 = vmatpush3.bf16.xpose.msk.msra.mxu0 %vm15965_vm1, %v14913_v53 }
 0x131   :  { %14924 = vmatpush3.bf16.xpose.msk.msra.mxu1 %vm15965_vm1, %v14919_v39  ;;  %14073 = vmatprep.mubr.msk.f32.mxu0 %vm384_vm0, %v16522_v16  ;;  %v14949_v16 = vpack.c.bf16 %v17239_v32, %v17194_v15  ;;  %v20929_v32 = vld [vmem:[#allocation21_spill] sm:$0xff] }
 0x132   :  { %14080 = vmatprep.mubr.msk.f32.mxu1 %vm384_vm0, %v16527_v60  ;;  %14927 = vmatprep.subr.msk.bf16.mxu0 %vm15965_vm1, %v14925_v30  ;;  %v15896_v60 = vld [vmem:[%s20611_s6 + $0x58] sm:$0xf] }
 0x133   :  { %14933 = vmatprep.subr.msk.bf16.mxu1 %vm15965_vm1, %v14931_v17 }
 0x137   :  { %14074 = vmatmul.mubr.msk.f32.vlgmr.msra.gmra.mrb[52].mxu0 %vm384_vm0, %v15895_v62 }
 0x138   :  { %14081 = vmatmul.mubr.msk.f32.vlgmr.msra.gmra.mrb[52].mxu1 %vm384_vm0, %v15896_v60  ;;  %14930 = vmatpush3.bf16.xpose.msk.msra.mxu0 %vm15965_vm1, %v14925_v30 }
 0x139   :  { %14936 = vmatpush3.bf16.xpose.msk.msra.mxu1 %vm15965_vm1, %v14931_v17  ;;  %14087 = vmatprep.mubr.msk.f32.mxu0 %vm384_vm0, %v16570_v0  ;;  %v14973_v0 = vpack.c.bf16 %v17362_v9, %v17314_v26 }
 0x13a   :  { %14094 = vmatprep.mubr.msk.f32.mxu1 %vm384_vm0, %v16578_v7  ;;  %14939 = vmatprep.subr.msk.bf16.mxu0 %vm15965_vm1, %v14937_v52  ;;  %v14979_v7 = vpack.c.bf16 %v17371_v19, %v17337_v45 }
 0x13b   :  { %14945 = vmatprep.subr.msk.bf16.mxu1 %vm15965_vm1, %v14943_v51 }
 0x13f   :  { %14088 = vmatmul.mubr.msk.f32.vlgmr.msra.gmra.mrb[54].mxu0 %vm384_vm0, %v16554_v63  ;;  %v14961_v63 = vpack.c.bf16 %v17299_v20, %v17254_v59 }
 0x140   :  { %14095 = vmatmul.mubr.msk.f32.vlgmr.msra.gmra.mrb[54].mxu1 %vm384_vm0, %v16559_v34  ;;  %14942 = vmatpush3.bf16.xpose.msk.msra.mxu0 %vm15965_vm1, %v14937_v52  ;;  %v14967_v34 = vpack.c.bf16 %v17309_v29, %v17273_v54  ;;  %v20930_v54 = vld [vmem:[#allocation2_spill] sm:$0xff] }
 0x141   :  { %14948 = vmatpush3.bf16.xpose.msk.msra.mxu1 %vm15965_vm1, %v14943_v51  ;;  %14101 = vmatprep.mubr.msk.f32.mxu0 %vm384_vm0, %v16622_v46 }
 0x142   :  { %14108 = vmatprep.mubr.msk.f32.mxu1 %vm384_vm0, %v16629_v50  ;;  %14951 = vmatprep.subr.msk.bf16.mxu0 %vm15965_vm1, %v14949_v16 }
 0x143   :  { %14957 = vmatprep.subr.msk.bf16.mxu1 %vm15965_vm1, %v14955_v5 }
 0x147   :  { %14102 = vmatmul.mubr.msk.f32.vlgmr.msra.gmra.mrb[56].mxu0 %vm384_vm0, %v16607_v27  ;;  %v20925_v27 = vld [vmem:[#allocation25_spill] sm:$0xff] }
 0x148   :  { %14109 = vmatmul.mubr.msk.f32.vlgmr.msra.gmra.mrb[56].mxu1 %vm384_vm0, %v16612_v42  ;;  %14954 = vmatpush3.bf16.xpose.msk.msra.mxu0 %vm15965_vm1, %v14949_v16  ;;  %v20926_v42 = vld [vmem:[#allocation26_spill] sm:$0xff]  ;;  %v20936_v16 = vld [vmem:[#allocation20_spill] sm:$0xff] }
 0x149   :  { %14960 = vmatpush3.bf16.xpose.msk.msra.mxu1 %vm15965_vm1, %v14955_v5  ;;  %14115 = vmatprep.mubr.msk.f32.mxu0 %vm384_vm0, %v16677_v56 }
 0x14a   :  { %14122 = vmatprep.mubr.msk.f32.mxu1 %vm384_vm0, %v16684_v24  ;;  %14963 = vmatprep.subr.msk.bf16.mxu0 %vm15965_vm1, %v14961_v63  ;;  %v20928_v24 = vld [vmem:[#allocation19_spill] sm:$0xff] }
 0x14b   :  { %14969 = vmatprep.subr.msk.bf16.mxu1 %vm15965_vm1, %v14967_v34 }
 0x14f   :  { %14116 = vmatmul.mubr.msk.f32.vlgmr.msra.gmra.mrb[58].mxu0 %vm384_vm0, %v16663_v61  ;;  %v20927_v61 = vld [vmem:[#allocation18_spill] sm:$0xff] }
 0x150   :  { %14123 = vmatmul.mubr.msk.f32.vlgmr.msra.gmra.mrb[58].mxu1 %vm384_vm0, %v16668_v14  ;;  %14966 = vmatpush3.bf16.xpose.msk.msra.mxu0 %vm15965_vm1, %v14961_v63 }
 0x151   :  { %14972 = vmatpush3.bf16.xpose.msk.msra.mxu1 %vm15965_vm1, %v14967_v34  ;;  %14129 = vmatprep.mubr.msk.f32.mxu0 %vm384_vm0, %v16734_v12 }
 0x152   :  { %14136 = vmatprep.mubr.msk.f32.mxu1 %vm384_vm0, %v16741_v36  ;;  %14975 = vmatprep.subr.msk.bf16.mxu0 %vm15965_vm1, %v14973_v0 }
 0x153   :  { %14981 = vmatprep.subr.msk.bf16.mxu1 %vm15965_vm1, %v14979_v7 }
 0x157   :  { %14130 = vmatmul.mubr.msk.f32.vlgmr.msra.gmra.mrb[60].mxu0 %vm384_vm0, %v16719_v18 }
 0x158   :  { %14137 = vmatmul.mubr.msk.f32.vlgmr.msra.gmra.mrb[60].mxu1 %vm384_vm0, %v16724_v25  ;;  %14978 = vmatpush3.bf16.xpose.msk.msra.mxu0 %vm15965_vm1, %v14973_v0 }
 0x159   :  { %14984 = vmatpush3.bf16.xpose.msk.msra.mxu1 %vm15965_vm1, %v14979_v7  ;;  %14143 = vmatprep.mubr.msk.f32.mxu0 %vm384_vm0, %v16789_v57  ;;  %v20937_v7 = vld [vmem:[#allocation3_spill] sm:$0xff] }
 0x15a   :  { %14150 = vmatprep.mubr.msk.f32.mxu1 %vm384_vm0, %v16796_v11 }
 0x15f   :  { %14144 = vmatmul.mubr.msk.f32.vlgmr.msra.gmra.mrb[62].mxu0 %vm384_vm0, %v20925_v27 }
 0x160   :  { %14151 = vmatmul.mubr.msk.f32.vlgmr.msra.gmra.mrb[62].mxu1 %vm384_vm0, %v20926_v42 }
 0x172   :  { %v5928_v46 = vpop.xlane.xlu0 %5927 }
 0x173   :  { %v6308_v14 = vsub.f32 %v20927_v61, %v5928_v46 }
 0x175   :  { %v5931_v56 = vpop.xlane.xlu1 %5930  ;;  %v6437_v33 = vmul.f32 1.442695, %v6308_v14 }
 0x176   :  { %v6309_v1 = vsub.f32 %v20929_v32, %v5931_v56 }
 0x177   :  { %v5934_v50 = vpop.xlane.xlu0 %5933  ;;  %15377 = vpow2.f32 %v6437_v33 }
 0x178   :  { %v6310_v2 = vsub.f32 %v20928_v24, %v5934_v50  ;;  %v6439_v4 = vmul.f32 1.442695, %v6309_v1 }
 0x17a   :  { %v13823_v18 = vpop.f32.mrb[16].mxu0  ;;  %v13830_v25 = vpop.f32.mrb[16].mxu1  ;;  %v6441_v59 = vmul.f32 1.442695, %v6310_v2  ;;  %v20938_v2 = vld [vmem:[#allocation4_spill] sm:$0xff] }
 0x17b   :  { %v5698_v12 = vmul.f32 0.25, %v13823_v18  ;;  %v5700_v36 = vmul.f32 0.25, %v13830_v25  ;;  %v1849_v57 = vpop.f32.mrb[17].mxu0  ;;  %v1930_v58 = vpop.f32.mrb[17].mxu1 }
 0x17c   :  { %v5697_v11 = vmul.f32 0.25, %v1849_v57  ;;  %v5699_v31 = vmul.f32 0.25, %v1930_v58  ;;  %v5924_v28 = vpop.xlane.xlu0 %5923  ;;  %15379 = vpow2.f32 %v6441_v59  ;;  %v5940_v49 = vpop.xlane.xlu1 %5939 }
 0x17d   :  { %v17557_v15 = vadd.f32 %v5700_v36, %v16907_v43  ;;  %v17560_v55 = vadd.f32 %v5698_v12, %v16907_v43  ;;  %v6307_v20 = vsub.f32 %v20930_v54, %v5924_v28  ;;  %15381 = vpow2.f32 %v6439_v4  ;;  %v20939_v36 = vld [vmem:[#allocation22_spill] sm:$0xff] }
 0x17e   :  { %v17569_v45 = vadd.f32 %v5699_v31, %v16922_v8  ;;  %v17572_v9 = vadd.f32 %v5697_v11, %v16922_v8  ;;  %v6312_v27 = vsub.f32 %v20937_v7, %v5940_v49 }
 0x17f   :  { %v6028_v29 = vsel %vm5925_vm2, %v17557_v15, -inf  ;;  %v6022_v26 = vsel %vm5925_vm2, %v17560_v55, -inf  ;;  %v6435_v19 = vmul.f32 1.442695, %v6307_v20 }
 0x180   :  { %20931 = vst [vmem:[#allocation23_spill] sm:$0xff] %v17572_v9  ;;  %6029 = vmax.xlane.f32.xlu0 %v6028_v29  ;;  %6023 = vmax.xlane.f32.xlu1 %v6022_v26  ;;  %v5946_v6 = vpop.xlane.xlu0 %5945  ;;  %v6025_v53 = vsel %vm5921_vm3, %v17569_v45, -inf  ;;  %v6019_v39 = vsel %vm5921_vm3, %v17572_v9, -inf  ;;  %v5937_v62 = vpop.xlane.xlu1 %5936  ;;  %v6445_v12 = vmul.f32 1.442695, %v6312_v27 }
 0x181   :  { %15383 = vpow2.f32 %v6435_v19  ;;  %v6314_v5 = vsub.f32 %v20936_v16, %v5946_v6  ;;  %v17595_v0 = vpop.eup %15377  ;;  %v6311_v57 = vsub.f32 %v20939_v36, %v5937_v62  ;;  %v20945_v62 = vld [vmem:[#allocation5_spill] sm:$0xff] }
 0x182   :  { %v13837_v3 = vpop.f32.mrb[18].mxu0  ;;  %v13844_v48 = vpop.f32.mrb[18].mxu1  ;;  %v6694_v31 = vsel %vm5925_vm2, %v17595_v0, 0.0 }
 0x183   :  { %v5702_v35 = vmul.f32 0.25, %v13837_v3  ;;  %v5704_v47 = vmul.f32 0.25, %v13844_v48  ;;  %v2011_v23 = vpop.f32.mrb[19].mxu0  ;;  %v2092_v10 = vpop.f32.mrb[19].mxu1  ;;  %v6449_v24 = vmul.f32 1.442695, %v6314_v5 }
 0x184   :  { %6026 = vmax.xlane.f32.xlu0 %v6025_v53  ;;  %6020 = vmax.xlane.f32.xlu1 %v6019_v39  ;;  %v5701_v38 = vmul.f32 0.25, %v2011_v23  ;;  %v5703_v13 = vmul.f32 0.25, %v2092_v10  ;;  %v5943_v60 = vpop.xlane.xlu0 %5942  ;;  %v5952_v33 = vpop.xlane.xlu1 %5951  ;;  %v6443_v26 = vmul.f32 1.442695, %v6311_v57 }
 0x185   :  { %v17579_v30 = vadd.f32 %v5704_v47, %v16907_v43  ;;  %v17582_v17 = vadd.f32 %v5702_v35, %v16907_v43  ;;  %v6313_v18 = vsub.f32 %v20938_v2, %v5943_v60  ;;  %15385 = vpow2.f32 %v6449_v24  ;;  %v20947_v2 = vld [vmem:[#allocation7_spill] sm:$0xff] }
 0x186   :  { %v17587_v21 = vadd.f32 %v5703_v13, %v16922_v8  ;;  %v17592_v51 = vadd.f32 %v5701_v38, %v16922_v8  ;;  %v17600_v61 = vpop.eup %15379  ;;  %15387 = vpow2.f32 %v6445_v12  ;;  %v20944_v38 = vld [vmem:[#allocation6_spill] sm:$0xff]  ;;  %v6316_v60 = vsub.f32 %v20945_v62, %v5952_v33 }
 0x187   :  { %20932 = vst [vmem:[#allocation24_spill] sm:$0xff] %v17579_v30  ;;  %20933 = vst [vmem:[#allocation25_spill] sm:$0xff] %v17582_v17  ;;  %v6040_v37 = vsel %vm5925_vm2, %v17579_v30, -inf  ;;  %v6034_v52 = vsel %vm5925_vm2, %v17582_v17, -inf  ;;  %v6700_v58 = vsel %vm5925_vm2, %v17600_v61, 0.0  ;;  %v17608_v11 = vpop.eup %15381  ;;  %v20994_v30 = vld [vmem:[#allocation33_spill] sm:$0xff] }
 0x188   :  { %20934 = vst [vmem:[#allocation26_spill] sm:$0xff] %v17587_v21  ;;  %6041 = vmax.xlane.f32.xlu0 %v6040_v37  ;;  %20935 = vst [vmem:[#allocation18_spill] sm:$0xff] %v17592_v51  ;;  %6035 = vmax.xlane.f32.xlu1 %v6034_v52  ;;  %v6037_v42 = vsel %vm5921_vm3, %v17587_v21, -inf  ;;  %v6031_v14 = vsel %vm5921_vm3, %v17592_v51, -inf  ;;  %v5958_v32 = vpop.xlane.xlu0 %5957  ;;  %v6447_v59 = vmul.f32 1.442695, %v6313_v18  ;;  %v5949_v23 = vpop.xlane.xlu1 %5948 }
 0x189   :  { %v6697_v19 = vsel %vm5921_vm3, %v17608_v11, 0.0  ;;  %v6318_v13 = vsub.f32 %v20944_v38, %v5958_v32  ;;  %v6453_v24 = vmul.f32 1.442695, %v6316_v60  ;;  %v6315_v18 = vsub.f32 %v20947_v2, %v5949_v23  ;;  %v20953_v60 = vld [vmem:[#allocation10_spill] sm:$0xff]  ;;  %v20983_v21 = vld [vmem:[#allocation31_spill] sm:$0xff] }
 0x18a   :  { %v13851_v63 = vpop.f32.mrb[20].mxu0  ;;  %v13858_v34 = vpop.f32.mrb[20].mxu1  ;;  %15389 = vpow2.f32 %v6447_v59 }
 0x18b   :  { %v2173_v46 = vpop.f32.mrb[21].mxu0  ;;  %v2254_v50 = vpop.f32.mrb[21].mxu1  ;;  %v5708_v56 = vmul.f32 0.25, %v13858_v34  ;;  %v5706_v25 = vmul.f32 0.25, %v13851_v63  ;;  %15391 = vpow2.f32 %v6443_v26  ;;  %v6451_v26 = vmul.f32 1.442695, %v6315_v18 }
 0x18c   :  { %6038 = vmax.xlane.f32.xlu0 %v6037_v42  ;;  %6032 = vmax.xlane.f32.xlu1 %v6031_v14  ;;  %v17612_v28 = vpop.eup %15383  ;;  %v5707_v4 = vmul.f32 0.25, %v2254_v50  ;;  %v5705_v49 = vmul.f32 0.25, %v2173_v46  ;;  %v5955_v10 = vpop.xlane.xlu0 %5954  ;;  %v6457_v46 = vmul.f32 1.442695, %v6318_v13  ;;  %v20946_v50 = vld [vmem:[#allocation8_spill] sm:$0xff] }
 0x18d   :  { %v17615_v1 = vadd.f32 %v5708_v56, %v16907_v43  ;;  %v17618_v54 = vadd.f32 %v5706_v25, %v16907_v43  ;;  %v6691_v6 = vsel %vm5921_vm3, %v17612_v28, 0.0  ;;  %v6317_v14 = vsub.f32 %v20946_v50, %v5955_v10 }
 0x18e   :  { %v17629_v53 = vadd.f32 %v5707_v4, %v16922_v8  ;;  %v17632_v39 = vadd.f32 %v5705_v49, %v16922_v8  ;;  %15393 = vpow2.f32 %v6457_v46 }
 0x18f   :  { %20940 = vst [vmem:[#allocation19_spill] sm:$0xff] %v17615_v1  ;;  %20941 = vst [vmem:[#allocation21_spill] sm:$0xff] %v17618_v54  ;;  %v6052_v35 = vsel %vm5925_vm2, %v17615_v1, -inf  ;;  %v6046_v47 = vsel %vm5925_vm2, %v17618_v54, -inf  ;;  %v17644_v34 = vpop.eup %15385  ;;  %v6455_v32 = vmul.f32 1.442695, %v6317_v14  ;;  %15395 = vpow2.f32 %v6453_v24 }
 0x190   :  { %6701 = vadd.xlane.f32.xlu0 %v6700_v58  ;;  %6695 = vadd.xlane.f32.xlu1 %v6694_v31  ;;  %20942 = vst [vmem:[#allocation2_spill] sm:$0xff] %v17629_v53  ;;  %20943 = vst [vmem:[#allocation20_spill] sm:$0xff] %v17632_v39  ;;  %v6049_v16 = vsel %vm5921_vm3, %v17629_v53, -inf  ;;  %v6043_v7 = vsel %vm5921_vm3, %v17632_v39, -inf  ;;  %v17648_v27 = vpop.eup %15387  ;;  %v6712_v25 = vsel %vm5925_vm2, %v17644_v34, 0.0  ;;  %v5964_v58 = vpop.xlane.xlu1 %5963 }
 0x191   :  { %v6706_v36 = vsel %vm5925_vm2, %v17648_v27, 0.0  ;;  %v5970_v31 = vpop.xlane.xlu0 %5969  ;;  %15397 = vpow2.f32 %v6455_v32 }
 0x192   :  { %v13865_v20 = vpop.f32.mrb[22].mxu0  ;;  %v13872_v29 = vpop.f32.mrb[22].mxu1  ;;  %15399 = vpow2.f32 %v6451_v26 }
 0x193   :  { %v2335_v3 = vpop.f32.mrb[23].mxu0  ;;  %v2416_v48 = vpop.f32.mrb[23].mxu1  ;;  %v5712_v42 = vmul.f32 0.25, %v13872_v29  ;;  %v5710_v56 = vmul.f32 0.25, %v13865_v20 }
 0x194   :  { %6698 = vadd.xlane.f32.xlu0 %v6697_v19  ;;  %6692 = vadd.xlane.f32.xlu1 %v6691_v6  ;;  %v17654_v12 = vpop.eup %15389  ;;  %v5711_v4 = vmul.f32 0.25, %v2416_v48  ;;  %v5961_v13 = vpop.xlane.xlu1 %5960 }
 0x195   :  { %v17658_v57 = vpop.eup %15391  ;;  %v17661_v33 = vadd.f32 %v5712_v42, %v16907_v43  ;;  %v17664_v59 = vadd.f32 %v5710_v56, %v16907_v43  ;;  %v6709_v19 = vsel %vm5921_vm3, %v17654_v12, 0.0  ;;  %v5967_v62 = vpop.xlane.xlu0 %5966 }
 0x196   :  { %v6703_v43 = vsel %vm5921_vm3, %v17658_v57, 0.0  ;;  %v17683_v23 = vadd.f32 %v5711_v4, %v16922_v8 }
 0x197   :  { %20948 = vst [vmem:[#allocation3_spill] sm:$0xff] %v17661_v33  ;;  %20949 = vst [vmem:[#allocation4_spill] sm:$0xff] %v17664_v59  ;;  %v6058_v48 = vsel %vm5925_vm2, %v17664_v59, -inf }
 0x198   :  { %6053 = vmax.xlane.f32.xlu0 %v6052_v35  ;;  %6047 = vmax.xlane.f32.xlu1 %v6046_v47  ;;  %v5709_v35 = vmul.f32 0.25, %v2335_v3  ;;  %v6064_v47 = vsel %vm5925_vm2, %v17661_v33, -inf  ;;  %20950 = vst [vmem:[#allocation22_spill] sm:$0xff] %v17683_v23  ;;  %v20952_v3 = vld [vmem:[#allocation9_spill] sm:$0xff]  ;;  %v6061_v46 = vsel %vm5921_vm3, %v17683_v23, -inf }
 0x199   :  { %v6320_v38 = vsub.f32 %v20952_v3, %v5964_v58  ;;  %v97_v3 = vld [vmem:[%s20614_s5 + $0x8] sm:$0xf]  ;;  %v20971_v33 = vld [vmem:[#allocation29_spill] sm:$0xff] }
 0x19a   :  { %v17635_v37 = vpop.f32.mrb[24].mxu0  ;;  %v13886_v52 = vpop.f32.mrb[24].mxu1  ;;  %v17686_v10 = vadd.f32 %v5709_v35, %v16922_v8 }
 0x19b   :  { %v17640_v5 = vpop.f32.mrb[25].mxu0  ;;  %v17642_v63 = vpop.f32.mrb[25].mxu1  ;;  %v6461_v2 = vmul.f32 1.442695, %v6320_v38  ;;  %v5716_v18 = vmul.f32 0.25, %v13886_v52  ;;  %v5714_v26 = vmul.f32 0.25, %v17635_v37 }
 0x19c   :  { %6050 = vmax.xlane.f32.xlu0 %v6049_v16  ;;  %6044 = vmax.xlane.f32.xlu1 %v6043_v7  ;;  %20951 = vst [vmem:[#allocation6_spill] sm:$0xff] %v17686_v10  ;;  %v6322_v16 = vsub.f32 %v20953_v60, %v5970_v31  ;;  %v17700_v8 = vpop.eup %15393  ;;  %v6055_v56 = vsel %vm5921_vm3, %v17686_v10, -inf  ;;  %v20957_v31 = vld [vmem:[#allocation11_spill] sm:$0xff]  ;;  %v5982_v52 = vpop.xlane.xlu0 %5981 }
 0x19d   :  { %20954 = vst [vmem:[#allocation5_spill] sm:$0xff] %v17700_v8  ;;  %v17704_v24 = vpop.eup %15395  ;;  %v6321_v32 = vsub.f32 %v20957_v31, %v5967_v62  ;;  %v6724_v4 = vsel %vm5925_vm2, %v17700_v8, 0.0  ;;  %15401 = vpow2.f32 %v6461_v2  ;;  %v98_v31 = vld [vmem:[%s20614_s5 + $0x10] sm:$0xff] }
 0x19e   :  { %20955 = vst [vmem:[#allocation8_spill] sm:$0xff] %v17704_v24  ;;  %v6718_v35 = vsel %vm5925_vm2, %v17704_v24, 0.0 }
 0x1a0   :  { %6713 = vadd.xlane.f32.xlu0 %v6712_v25  ;;  %6707 = vadd.xlane.f32.xlu1 %v6706_v36  ;;  %v6465_v25 = vmul.f32 1.442695, %v6322_v16  ;;  %v20956_v36 = vld [vmem:[#allocation27_spill] sm:$0xff] }
 0x1a1   :  { %v6319_v58 = vsub.f32 %v20956_v36, %v5961_v13  ;;  %v6463_v13 = vmul.f32 1.442695, %v6321_v32  ;;  %v5713_v36 = vmul.f32 0.25, %v17640_v5  ;;  %v99_v32 = vld [vmem:[%s20614_s5 + $0x18] sm:$0xf] }
 0x1a2   :  { %v17666_v20 = vpop.f32.mrb[26].mxu0  ;;  %v17668_v29 = vpop.f32.mrb[26].mxu1  ;;  %15403 = vpow2.f32 %v6465_v25 }
 0x1a3   :  { %v17672_v49 = vpop.f32.mrb[27].mxu0  ;;  %v17674_v6 = vpop.f32.mrb[27].mxu1  ;;  %v6459_v38 = vmul.f32 1.442695, %v6319_v58  ;;  %15405 = vpow2.f32 %v6463_v13  ;;  %v17778_v13 = vpack.c.bf16 %v99_v32, %v98_v31  ;;  %v5718_v59 = vmul.f32 0.25, %v17666_v20 }
 0x1a4   :  { %6710 = vadd.xlane.f32.xlu0 %v6709_v19  ;;  %6704 = vadd.xlane.f32.xlu1 %v6703_v43  ;;  %v17711_v19 = vpop.eup %15397 }
 0x1a5   :  { %v17715_v43 = vpop.eup %15399  ;;  %15407 = vpow2.f32 %v6459_v38  ;;  %20965 = vst [vmem:[#allocation34_spill] sm:$0xff] %v17778_v13  ;;  %v5979_v38 = vpop.xlane.xlu0 %5978  ;;  %14993 = vmatprep.subr.msk.bf16.mxu1 %vm17760_vm6, %v17778_v13 }
 0x1a6   :  { %v6715_v58 = vsel %vm5921_vm3, %v17715_v43, 0.0  ;;  %14996 = vmatpush3.bf16.msk.msra.mxu1 %vm17760_vm6, %v17778_v13 }
 0x1a8   :  { %6065 = vmax.xlane.f32.xlu0 %v6064_v47  ;;  %6059 = vmax.xlane.f32.xlu1 %v6058_v48  ;;  %v17720_v47 = vld [vmem:[%s20613_s2 + $0x8] sm:$0xf]  ;;  %v96_v48 = vld [vmem:[%s20614_s5] sm:$0xff] }
 0x1a9   :  { %v17723_v37 = vadd.f32 %v17720_v47, %v5716_v18  ;;  %v17732_v62 = vadd.f32 %v17720_v47, %v5714_v26  ;;  %v17745_v25 = vpack.c.bf16 %v97_v3, %v96_v48  ;;  %v5976_v26 = vpop.xlane.xlu1 %5975 }
 0x1aa   :  { %v17690_v7 = vpop.f32.mrb[28].mxu0  ;;  %v17692_v42 = vpop.f32.mrb[28].mxu1 }
 0x1ab   :  { %v17696_v50 = vpop.f32.mrb[29].mxu0  ;;  %v17698_v14 = vpop.f32.mrb[29].mxu1  ;;  %20958 = vst [vmem:[#allocation7_spill] sm:$0xff] %v17723_v37  ;;  %20959 = vst [vmem:[#allocation9_spill] sm:$0xff] %v17732_v62  ;;  %v6070_v5 = vsel %vm5925_vm2, %v17732_v62, -inf  ;;  %14987 = vmatprep.subr.msk.bf16.mxu0 %vm17760_vm6, %v17745_v25  ;;  %v5722_v51 = vmul.f32 0.25, %v17690_v7 }
 0x1ac   :  { %6062 = vmax.xlane.f32.xlu0 %v6061_v46  ;;  %6056 = vmax.xlane.f32.xlu1 %v6055_v56  ;;  %v5715_v46 = vmul.f32 0.25, %v17642_v63  ;;  %v6721_v56 = vsel %vm5921_vm3, %v17711_v19, 0.0  ;;  %20960 = vst [vmem:[#allocation10_spill] sm:$0xff] %v17745_v25  ;;  %v6076_v63 = vsel %vm5925_vm2, %v17723_v37, -inf }
 0x1ad   :  { %14990 = vmatpush3.bf16.msk.msra.mxu0 %vm17760_vm6, %v17745_v25 }
 0x1b0   :  { %6725 = vadd.xlane.f32.xlu0 %v6724_v4  ;;  %6719 = vadd.xlane.f32.xlu1 %v6718_v35  ;;  %v17767_v35 = vld [vmem:[%s20613_s2] sm:$0xff] }
 0x1b1   :  { %v17770_v48 = vadd.f32 %v17767_v35, %v5715_v46  ;;  %v17776_v3 = vadd.f32 %v17767_v35, %v5713_v36  ;;  %v20967_v46 = vld [vmem:[#allocation12_spill] sm:$0xff]  ;;  %v17792_v36 = vpop.eup %15401 }
 0x1b2   :  { %v17734_v60 = vpop.f32.mrb[30].mxu0  ;;  %v17736_v16 = vpop.f32.mrb[30].mxu1  ;;  %v6326_v62 = vsub.f32 %v20967_v46, %v5982_v52 }
 0x1b3   :  { %v17741_v2 = vpop.f32.mrb[31].mxu0  ;;  %v17743_v18 = vpop.f32.mrb[31].mxu1  ;;  %20963 = vst [vmem:[#allocation27_spill] sm:$0xff] %v17770_v48  ;;  %20964 = vst [vmem:[#allocation11_spill] sm:$0xff] %v17776_v3 }
 0x1b4   :  { %6722 = vadd.xlane.f32.xlu0 %v6721_v56  ;;  %6716 = vadd.xlane.f32.xlu1 %v6715_v58  ;;  %v20966_v56 = vld [vmem:[#allocation28_spill] sm:$0xff]  ;;  %v17803_v52 = vpop.eup %15403  ;;  %v6473_v25 = vmul.f32 1.442695, %v6326_v62 }
 0x1b5   :  { %v6324_v58 = vsub.f32 %v20966_v56, %v5976_v26  ;;  %20968 = vst [vmem:[#allocation28_spill] sm:$0xff] %v17792_v36  ;;  %20969 = vst [vmem:[#allocation12_spill] sm:$0xff] %v17803_v52  ;;  %v5973_v26 = vpop.xlane.xlu1 %5972  ;;  %v5720_v56 = vmul.f32 0.25, %v17668_v29  ;;  %v6736_v13 = vsel %vm5925_vm2, %v17803_v52, 0.0  ;;  %v102_v29 = vld [vmem:[%s20614_s5 + $0x30] sm:$0xff]  ;;  %v17822_v62 = vpop.eup %15405 }
 0x1b6   :  { %v6323_v39 = vsub.f32 %v20971_v33, %v5973_v26  ;;  %v6730_v33 = vsel %vm5925_vm2, %v17792_v36, 0.0  ;;  %15409 = vpow2.f32 %v6473_v25 }
 0x1b7   :  { %v6469_v46 = vmul.f32 1.442695, %v6324_v58  ;;  %v17834_v58 = vadd.f32 %v17720_v47, %v5720_v56  ;;  %v6733_v56 = vsel %vm5921_vm3, %v17822_v62, 0.0 }
 0x1b8   :  { %6077 = vmax.xlane.f32.xlu0 %v6076_v63  ;;  %6071 = vmax.xlane.f32.xlu1 %v6070_v5  ;;  %v6073_v63 = vsel %vm5921_vm3, %v17770_v48, -inf  ;;  %v6067_v5 = vsel %vm5921_vm3, %v17776_v3, -inf  ;;  %v20970_v48 = vld [vmem:[#allocation13_spill] sm:$0xff] }
 0x1b9   :  { %v6325_v23 = vsub.f32 %v20970_v48, %v5979_v38  ;;  %20972 = vst [vmem:[#allocation13_spill] sm:$0xff] %v17822_v62  ;;  %v103_v48 = vld [vmem:[%s20614_s5 + $0x38] sm:$0xf]  ;;  %v17831_v38 = vpop.eup %15407  ;;  %20974 = vst [vmem:[#allocation35_spill] sm:$0xff] %v17834_v58  ;;  %15411 = vpow2.f32 %v6469_v46 }
 0x1ba   :  { %v17785_v37 = vpop.f32.mrb[32].mxu0  ;;  %v17787_v10 = vpop.f32.mrb[32].mxu1  ;;  %20973 = vst [vmem:[#allocation29_spill] sm:$0xff] %v17831_v38  ;;  %v17836_v26 = vpack.c.bf16 %v103_v48, %v102_v29 }
 0x1bb   :  { %v17796_v31 = vpop.f32.mrb[33].mxu0  ;;  %v17798_v32 = vpop.f32.mrb[33].mxu1  ;;  %v6471_v3 = vmul.f32 1.442695, %v6325_v23  ;;  %v5717_v23 = vmul.f32 0.25, %v17672_v49 }
 0x1bc   :  { %6074 = vmax.xlane.f32.xlu0 %v6073_v63  ;;  %6068 = vmax.xlane.f32.xlu1 %v6067_v5  ;;  %v100_v63 = vld [vmem:[%s20614_s5 + $0x20] sm:$0xff]  ;;  %v101_v5 = vld [vmem:[%s20614_s5 + $0x28] sm:$0xf] }
 0x1bd   :  { %v17826_v20 = vpack.c.bf16 %v101_v5, %v100_v63  ;;  %v6467_v63 = vmul.f32 1.442695, %v6323_v39  ;;  %v5719_v5 = vmul.f32 0.25, %v17674_v6  ;;  %15005 = vmatprep.subr.msk.bf16.mxu1 %vm17760_vm6, %v17836_v26  ;;  %v6727_v39 = vsel %vm5921_vm3, %v17831_v38, 0.0 }
 0x1be   :  { %v6088_v6 = vsel %vm5925_vm2, %v17834_v58, -inf  ;;  %15413 = vpow2.f32 %v6471_v3  ;;  %v17869_v49 = vadd.f32 %v17767_v35, %v5717_v23  ;;  %v20979_v58 = vld [vmem:[#allocation30_spill] sm:$0xff] }
 0x1bf   :  { %14999 = vmatprep.subr.msk.bf16.mxu0 %vm17760_vm6, %v17826_v20  ;;  %15415 = vpow2.f32 %v6467_v63  ;;  %v17866_v54 = vadd.f32 %v17767_v35, %v5719_v5 }
 0x1c0   :  { %6737 = vadd.xlane.f32.xlu0 %v6736_v13  ;;  %6731 = vadd.xlane.f32.xlu1 %v6730_v33  ;;  %v17839_v13 = vadd.f32 %v17720_v47, %v5718_v59  ;;  %v5994_v59 = vpop.xlane.xlu0 %5993  ;;  %v5988_v33 = vpop.xlane.xlu1 %5987  ;;  %20977 = vst [vmem:[#allocation38_spill] sm:$0xff] %v17869_v49  ;;  %v6079_v23 = vsel %vm5921_vm3, %v17869_v49, -inf }
 0x1c1   :  { %20976 = vst [vmem:[#allocation37_spill] sm:$0xff] %v17866_v54  ;;  %v6328_v3 = vsub.f32 %v20979_v58, %v5988_v33  ;;  %v6085_v52 = vsel %vm5921_vm3, %v17866_v54, -inf  ;;  %v17881_v5 = vpop.eup %15409  ;;  %v5724_v58 = vmul.f32 0.25, %v17692_v42  ;;  %v17905_v42 = vadd.f32 %v17720_v47, %v5722_v51 }
 0x1c2   :  { %20975 = vst [vmem:[#allocation36_spill] sm:$0xff] %v17839_v13  ;;  %v17841_v53 = vpop.f32.mrb[34].mxu0  ;;  %v6082_v48 = vsel %vm5925_vm2, %v17839_v13, -inf }
 0x1c3   :  { %v17849_v29 = vpop.f32.mrb[34].mxu1  ;;  %v17851_v25 = vpop.f32.mrb[35].mxu0  ;;  %v6477_v38 = vmul.f32 1.442695, %v6328_v3  ;;  %20987 = vst [vmem:[#allocation40_spill] sm:$0xff] %v17905_v42  ;;  %v5723_v3 = vmul.f32 0.25, %v17698_v14 }
 0x1c4   :  { %6734 = vadd.xlane.f32.xlu0 %v6733_v56  ;;  %v17859_v46 = vpop.f32.mrb[35].mxu1  ;;  %6728 = vadd.xlane.f32.xlu1 %v6727_v39  ;;  %v20978_v56 = vld [vmem:[#allocation14_spill] sm:$0xff]  ;;  %v5991_v39 = vpop.xlane.xlu0 %5990 }
 0x1c5   :  { %v6330_v1 = vsub.f32 %v20978_v56, %v5994_v59  ;;  %20980 = vst [vmem:[#allocation14_spill] sm:$0xff] %v17881_v5  ;;  %v20982_v56 = vld [vmem:[#allocation15_spill] sm:$0xff] }
 0x1c6   :  { %v6329_v54 = vsub.f32 %v20982_v56, %v5991_v39 }
 0x1c7   :  { %v6481_v33 = vmul.f32 1.442695, %v6330_v1  ;;  %v17902_v1 = vadd.f32 %v17720_v47, %v5724_v58 }
 0x1c8   :  { %6089 = vmax.xlane.f32.xlu0 %v6088_v6  ;;  %6083 = vmax.xlane.f32.xlu1 %v6082_v48  ;;  %v5985_v6 = vpop.xlane.xlu1 %5984  ;;  %v17887_v48 = vpop.eup %15411  ;;  %v6479_v7 = vmul.f32 1.442695, %v6329_v54 }
 0x1c9   :  { %20981 = vst [vmem:[#allocation30_spill] sm:$0xff] %v17887_v48  ;;  %v6327_v62 = vsub.f32 %v20983_v21, %v5985_v6  ;;  %v17895_v17 = vpop.eup %15413  ;;  %v6742_v49 = vsel %vm5925_vm2, %v17887_v48, 0.0  ;;  %20986 = vst [vmem:[#allocation39_spill] sm:$0xff] %v17902_v1  ;;  %15417 = vpow2.f32 %v6481_v33  ;;  %v6006_v58 = vpop.xlane.xlu0 %6005  ;;  %v5721_v33 = vmul.f32 0.25, %v17696_v50 }
 0x1ca   :  { %v17872_v36 = vpop.f32.mrb[36].mxu0  ;;  %20984 = vst [vmem:[#allocation15_spill] sm:$0xff] %v17895_v17  ;;  %15419 = vpow2.f32 %v6477_v38  ;;  %v6745_v6 = vsel %vm5921_vm3, %v17895_v17, 0.0  ;;  %v6100_v14 = vsel %vm5925_vm2, %v17902_v1, -inf  ;;  %v6094_v38 = vsel %vm5925_vm2, %v17905_v42, -inf  ;;  %v20991_v1 = vld [vmem:[#allocation32_spill] sm:$0xff] }
 0x1cb   :  { %v17877_v13 = vpop.f32.mrb[36].mxu1  ;;  %v17879_v63 = vpop.f32.mrb[37].mxu0  ;;  %v6475_v39 = vmul.f32 1.442695, %v6327_v62  ;;  %15421 = vpow2.f32 %v6479_v7  ;;  %v17929_v50 = vadd.f32 %v17767_v35, %v5721_v33 }
 0x1cc   :  { %6086 = vmax.xlane.f32.xlu0 %v6085_v52  ;;  %v17885_v59 = vpop.f32.mrb[37].mxu1  ;;  %6080 = vmax.xlane.f32.xlu1 %v6079_v23  ;;  %v6748_v52 = vsel %vm5925_vm2, %v17881_v5, 0.0  ;;  %v17899_v23 = vpop.eup %15415 }
 0x1cd   :  { %20985 = vst [vmem:[#allocation31_spill] sm:$0xff] %v17899_v23  ;;  %v6739_v51 = vsel %vm5921_vm3, %v17899_v23, 0.0  ;;  %v6000_v62 = vpop.xlane.xlu1 %5999  ;;  %15423 = vpow2.f32 %v6475_v39  ;;  %20989 = vst [vmem:[#allocation42_spill] sm:$0xff] %v17929_v50  ;;  %v6091_v33 = vsel %vm5921_vm3, %v17929_v50, -inf }
 0x1ce   :  { %v6332_v7 = vsub.f32 %v20991_v1, %v6000_v62  ;;  %v5728_v1 = vmul.f32 0.25, %v17736_v16 }
 0x1d0   :  { %6749 = vadd.xlane.f32.xlu0 %v6748_v52  ;;  %6743 = vadd.xlane.f32.xlu1 %v6742_v49  ;;  %v17926_v52 = vadd.f32 %v17767_v35, %v5723_v3  ;;  %v6485_v17 = vmul.f32 1.442695, %v6332_v7  ;;  %v17962_v16 = vadd.f32 %v17720_v47, %v5728_v1 }
 0x1d2   :  { %v17907_v21 = vpop.f32.mrb[38].mxu0  ;;  %20988 = vst [vmem:[#allocation41_spill] sm:$0xff] %v17926_v52  ;;  %v6097_v23 = vsel %vm5921_vm3, %v17926_v52, -inf  ;;  %v5726_v52 = vmul.f32 0.25, %v17734_v60  ;;  %20997 = vst [vmem:[#allocation44_spill] sm:$0xff] %v17962_v16 }
 0x1d3   :  { %v17912_v56 = vpop.f32.mrb[38].mxu1  ;;  %v17914_v49 = vpop.f32.mrb[39].mxu0 }
 0x1d4   :  { %6746 = vadd.xlane.f32.xlu0 %v6745_v6  ;;  %v17919_v54 = vpop.f32.mrb[39].mxu1  ;;  %6740 = vadd.xlane.f32.xlu1 %v6739_v51  ;;  %v20990_v6 = vld [vmem:[#allocation16_spill] sm:$0xff]  ;;  %v6003_v51 = vpop.xlane.xlu0 %6002  ;;  %v17965_v60 = vadd.f32 %v17720_v47, %v5726_v52 }
 0x1d5   :  { %v6334_v48 = vsub.f32 %v20990_v6, %v6006_v58  ;;  %v17941_v3 = vpop.eup %15417  ;;  %v6333_v6 = vsub.f32 %v17323_v41, %v6003_v51  ;;  %v5727_v51 = vmul.f32 0.25, %v17743_v18 }
 0x1d6   :  { %20992 = vst [vmem:[#allocation16_spill] sm:$0xff] %v17941_v3  ;;  %20998 = vst [vmem:[#allocation45_spill] sm:$0xff] %v17965_v60  ;;  %v6106_v18 = vsel %vm5925_vm2, %v17965_v60, -inf }
 0x1d7   :  { %v6489_v62 = vmul.f32 1.442695, %v6334_v48  ;;  %v6487_v41 = vmul.f32 1.442695, %v6333_v6 }
 0x1d8   :  { %6101 = vmax.xlane.f32.xlu0 %v6100_v14  ;;  %6095 = vmax.xlane.f32.xlu1 %v6094_v38  ;;  %v5997_v14 = vpop.xlane.xlu1 %5996  ;;  %v17947_v38 = vpop.eup %15419 }
 0x1d9   :  { %20993 = vst [vmem:[#allocation32_spill] sm:$0xff] %v17947_v38  ;;  %v6331_v24 = vsub.f32 %v20994_v30, %v5997_v14  ;;  %v17955_v8 = vpop.eup %15421  ;;  %v6754_v50 = vsel %vm5925_vm2, %v17947_v38, 0.0  ;;  %15425 = vpow2.f32 %v6489_v62  ;;  %v6018_v1 = vpop.xlane.xlu0 %6017  ;;  %v5725_v62 = vmul.f32 0.25, %v17741_v2 }
 0x1da   :  { %v17932_v5 = vpop.f32.mrb[40].mxu0  ;;  %20995 = vst [vmem:[#allocation33_spill] sm:$0xff] %v17955_v8  ;;  %15427 = vpow2.f32 %v6485_v17  ;;  %v6757_v7 = vsel %vm5921_vm3, %v17955_v8, 0.0  ;;  %v6112_v17 = vsel %vm5925_vm2, %v17962_v16, -inf  ;;  %v21001_v16 = vld [vmem:[#allocation17_spill] sm:$0xff] }
 0x1db   :  { %v17937_v42 = vpop.f32.mrb[40].mxu1  ;;  %v17939_v39 = vpop.f32.mrb[41].mxu0  ;;  %v6483_v48 = vmul.f32 1.442695, %v6331_v24  ;;  %15429 = vpow2.f32 %v6487_v41  ;;  %v17989_v2 = vadd.f32 %v17767_v35, %v5725_v62 }
 0x1dc   :  { %6098 = vmax.xlane.f32.xlu0 %v6097_v23  ;;  %v17945_v58 = vpop.f32.mrb[41].mxu1  ;;  %6092 = vmax.xlane.f32.xlu1 %v6091_v33  ;;  %v6760_v23 = vsel %vm5925_vm2, %v17941_v3, 0.0  ;;  %v17959_v33 = vpop.eup %15423 }
 0x1dd   :  { %20996 = vst [vmem:[#allocation43_spill] sm:$0xff] %v17959_v33  ;;  %v6751_v52 = vsel %vm5921_vm3, %v17959_v33, 0.0  ;;  %v6012_v24 = vpop.xlane.xlu1 %6011  ;;  %15431 = vpow2.f32 %v6483_v48  ;;  %21000 = vst [vmem:[#allocation47_spill] sm:$0xff] %v17989_v2  ;;  %v6103_v62 = vsel %vm5921_vm3, %v17989_v2, -inf }
 0x1de   :  { %v6336_v41 = vsub.f32 %v21001_v16, %v6012_v24  ;;  %v5732_v16 = vmul.f32 0.25, %v17787_v10 }
 0x1e0   :  { %6761 = vadd.xlane.f32.xlu0 %v6760_v23  ;;  %6755 = vadd.xlane.f32.xlu1 %v6754_v50  ;;  %v17986_v23 = vadd.f32 %v17767_v35, %v5727_v51  ;;  %v6493_v33 = vmul.f32 1.442695, %v6336_v41  ;;  %v18022_v10 = vadd.f32 %v17720_v47, %v5732_v16  ;;  %v5729_v16 = vmul.f32 0.25, %v17796_v31 }
 0x1e2   :  { %v17967_v30 = vpop.f32.mrb[42].mxu0  ;;  %20999 = vst [vmem:[#allocation46_spill] sm:$0xff] %v17986_v23  ;;  %v6109_v3 = vsel %vm5921_vm3, %v17986_v23, -inf  ;;  %v5730_v23 = vmul.f32 0.25, %v17785_v37  ;;  %21006 = vst [vmem:[#allocation51_spill] sm:$0xff] %v18022_v10  ;;  %v18049_v31 = vadd.f32 %v17767_v35, %v5729_v16 }
 0x1e3   :  { %v17972_v14 = vpop.f32.mrb[42].mxu1  ;;  %v17974_v50 = vpop.f32.mrb[43].mxu0 }
 0x1e4   :  { %6758 = vadd.xlane.f32.xlu0 %v6757_v7  ;;  %v17979_v6 = vpop.f32.mrb[43].mxu1  ;;  %6752 = vadd.xlane.f32.xlu1 %v6751_v52  ;;  %v6338_v7 = vsub.f32 %v17354_v44, %v6018_v1  ;;  %v6015_v52 = vpop.xlane.xlu0 %6014  ;;  %v18025_v37 = vadd.f32 %v17720_v47, %v5730_v23  ;;  %21009 = vst [vmem:[#allocation54_spill] sm:$0xff] %v18049_v31 }
 0x1e5   :  { %v18001_v51 = vpop.eup %15425 }
 0x1e6   :  { %21002 = vst [vmem:[#allocation17_spill] sm:$0xff] %v18001_v51  ;;  %v18007_v1 = vpop.eup %15427  ;;  %v6497_v24 = vmul.f32 1.442695, %v6338_v7  ;;  %21007 = vst [vmem:[#allocation52_spill] sm:$0xff] %v18025_v37 }
 0x1e7   :  { %21003 = vst [vmem:[#allocation48_spill] sm:$0xff] %v18007_v1  ;;  %v18015_v9 = vpop.eup %15429  ;;  %v6766_v2 = vsel %vm5925_vm2, %v18007_v1, 0.0 }
 0x1e8   :  { %6113 = vmax.xlane.f32.xlu0 %v6112_v17  ;;  %6107 = vmax.xlane.f32.xlu1 %v6106_v18  ;;  %v6009_v17 = vpop.xlane.xlu1 %6008  ;;  %v6337_v18 = vsub.f32 %v17378_v22, %v6015_v52  ;;  %21004 = vst [vmem:[#allocation49_spill] sm:$0xff] %v18015_v9  ;;  %15433 = vpow2.f32 %v6497_v24  ;;  %v5731_v52 = vmul.f32 0.25, %v17798_v32  ;;  %v6769_v41 = vsel %vm5921_vm3, %v18015_v9, 0.0 }
 0x1e9   :  { %v6335_v8 = vsub.f32 %v17357_v40, %v6009_v17  ;;  %15435 = vpow2.f32 %v6493_v33  ;;  %v6118_v32 = vsel %vm5925_vm2, %v18025_v37, -inf }
 0x1ea   :  { %v17992_v38 = vpop.f32.mrb[44].mxu0  ;;  %v6495_v22 = vmul.f32 1.442695, %v6337_v18  ;;  %v18046_v33 = vadd.f32 %v17767_v35, %v5731_v52 }
 0x1eb   :  { %v17997_v60 = vpop.f32.mrb[44].mxu1  ;;  %v17999_v48 = vpop.f32.mrb[45].mxu0  ;;  %v6491_v7 = vmul.f32 1.442695, %v6335_v8  ;;  %v6124_v8 = vsel %vm5925_vm2, %v18022_v10, -inf }
 0x1ec   :  { %6110 = vmax.xlane.f32.xlu0 %v6109_v3  ;;  %v18005_v44 = vpop.f32.mrb[45].mxu1  ;;  %6104 = vmax.xlane.f32.xlu1 %v6103_v62  ;;  %v6772_v3 = vsel %vm5925_vm2, %v18001_v51, 0.0  ;;  %v18019_v62 = vpop.eup %15431  ;;  %15437 = vpow2.f32 %v6495_v22  ;;  %21008 = vst [vmem:[#allocation53_spill] sm:$0xff] %v18046_v33  ;;  %v5738_v51 = vmul.f32 0.25, %v17872_v36 }
 0x1ed   :  { %21005 = vst [vmem:[#allocation50_spill] sm:$0xff] %v18019_v62  ;;  %v6763_v23 = vsel %vm5921_vm3, %v18019_v62, 0.0  ;;  %15439 = vpow2.f32 %v6491_v7  ;;  %v6115_v7 = vsel %vm5921_vm3, %v18049_v31, -inf }
 0x1f0   :  { %6773 = vadd.xlane.f32.xlu0 %v6772_v3  ;;  %6767 = vadd.xlane.f32.xlu1 %v6766_v2  ;;  %v6121_v3 = vsel %vm5921_vm3, %v18046_v33, -inf }
 0x1f2   :  { %v18027_v40 = vpop.f32.mrb[46].mxu0 }
 0x1f3   :  { %v18032_v17 = vpop.f32.mrb[46].mxu1  ;;  %v18034_v2 = vpop.f32.mrb[47].mxu0 }
 0x1f4   :  { %6770 = vadd.xlane.f32.xlu0 %v6769_v41  ;;  %v18039_v24 = vpop.f32.mrb[47].mxu1  ;;  %6764 = vadd.xlane.f32.xlu1 %v6763_v23  ;;  %v18059_v23 = vpop.eup %15433 }
 0x1f5   :  { %21010 = vst [vmem:[#allocation55_spill] sm:$0xff] %v18059_v23  ;;  %v18065_v16 = vpop.eup %15435  ;;  %v6784_v33 = vsel %vm5925_vm2, %v18059_v23, 0.0 }
 0x1f6   :  { %21011 = vst [vmem:[#allocation56_spill] sm:$0xff] %v18065_v16  ;;  %v18071_v37 = vpop.eup %15437 }
 0x1f7   :  { %21012 = vst [vmem:[#allocation57_spill] sm:$0xff] %v18071_v37  ;;  %v18075_v10 = vpop.eup %15439  ;;  %v6781_v23 = vsel %vm5921_vm3, %v18071_v37, 0.0 }
 0x1f8   :  { %6125 = vmax.xlane.f32.xlu0 %v6124_v8  ;;  %6119 = vmax.xlane.f32.xlu1 %v6118_v32  ;;  %v5736_v8 = vmul.f32 0.25, %v17849_v29  ;;  %v5734_v32 = vmul.f32 0.25, %v17841_v53  ;;  %21013 = vst [vmem:[#allocation58_spill] sm:$0xff] %v18075_v10  ;;  %v5735_v53 = vmul.f32 0.25, %v17859_v46  ;;  %v5740_v46 = vmul.f32 0.25, %v17877_v13 }
 0x1fa   :  { %v18051_v18 = vpop.f32.mrb[48].mxu0  ;;  %v18078_v31 = vadd.f32 %v17720_v47, %v5736_v8  ;;  %v6775_v8 = vsel %vm5921_vm3, %v18075_v10, 0.0  ;;  %v18104_v62 = vadd.f32 %v17767_v35, %v5735_v53 }
 0x1fb   :  { %v18055_v41 = vpop.f32.mrb[48].mxu1  ;;  %v18057_v22 = vpop.f32.mrb[49].mxu0 }
 0x1fc   :  { %6122 = vmax.xlane.f32.xlu0 %v6121_v3  ;;  %v18063_v52 = vpop.f32.mrb[49].mxu1  ;;  %6116 = vmax.xlane.f32.xlu1 %v6115_v7  ;;  %v6778_v3 = vsel %vm5925_vm2, %v18065_v16, 0.0  ;;  %21014 = vst [vmem:[#allocation59_spill] sm:$0xff] %v18078_v31  ;;  %v18081_v7 = vadd.f32 %v17720_v47, %v5734_v32  ;;  %v5733_v16 = vmul.f32 0.25, %v17851_v25  ;;  %v6136_v32 = vsel %vm5925_vm2, %v18078_v31, -inf  ;;  %21016 = vst [vmem:[#allocation61_spill] sm:$0xff] %v18104_v62 }
 0x1fd   :  { %v6133_v36 = vsel %vm5921_vm3, %v18104_v62, -inf  ;;  %v5744_v62 = vmul.f32 0.25, %v17912_v56 }
 0x1fe   :  { %21015 = vst [vmem:[#allocation60_spill] sm:$0xff] %v18081_v7  ;;  %v6130_v37 = vsel %vm5925_vm2, %v18081_v7, -inf  ;;  %v18107_v25 = vadd.f32 %v17767_v35, %v5733_v16  ;;  %v5739_v7 = vmul.f32 0.25, %v17885_v59  ;;  %v5737_v16 = vmul.f32 0.25, %v17879_v63 }
 0x1ff   :  { %v5742_v63 = vmul.f32 0.25, %v17907_v21  ;;  %v18148_v9 = vadd.f32 %v17720_v47, %v5744_v62  ;;  %v5743_v21 = vmul.f32 0.25, %v17919_v54  ;;  %v5748_v54 = vmul.f32 0.25, %v17937_v42 }
 0x200   :  { %6785 = vadd.xlane.f32.xlu0 %v6784_v33  ;;  %6779 = vadd.xlane.f32.xlu1 %v6778_v3  ;;  %21017 = vst [vmem:[#allocation62_spill] sm:$0xff] %v18107_v25 }
 0x201   :  { %21022 = vst [vmem:[#allocation67_spill] sm:$0xff] %v18148_v9  ;;  %v18153_v56 = vadd.f32 %v17720_v47, %v5742_v63  ;;  %v18188_v42 = vadd.f32 %v17720_v47, %v5748_v54 }
 0x202   :  { %v18083_v29 = vpop.f32.mrb[50].mxu0 }
 0x203   :  { %v18088_v33 = vpop.f32.mrb[50].mxu1  ;;  %v18090_v1 = vpop.f32.mrb[51].mxu0  ;;  %21024 = vst [vmem:[#allocation69_spill] sm:$0xff] %v18153_v56  ;;  %21031 = vst [vmem:[#allocation76_spill] sm:$0xff] %v18188_v42 }
 0x204   :  { %6782 = vadd.xlane.f32.xlu0 %v6781_v23  ;;  %v18095_v3 = vpop.f32.mrb[51].mxu1  ;;  %6776 = vadd.xlane.f32.xlu1 %v6775_v8  ;;  %v18110_v23 = vadd.f32 %v17720_v47, %v5740_v46  ;;  %v18113_v8 = vadd.f32 %v17720_v47, %v5738_v51 }
 0x206   :  { %21018 = vst [vmem:[#allocation63_spill] sm:$0xff] %v18110_v23  ;;  %21019 = vst [vmem:[#allocation64_spill] sm:$0xff] %v18113_v8  ;;  %v6148_v59 = vsel %vm5925_vm2, %v18110_v23, -inf  ;;  %v6142_v10 = vsel %vm5925_vm2, %v18113_v8, -inf }
 0x208   :  { %6137 = vmax.xlane.f32.xlu0 %v6136_v32  ;;  %6131 = vmax.xlane.f32.xlu1 %v6130_v37  ;;  %v6127_v37 = vsel %vm5921_vm3, %v18107_v25, -inf  ;;  %v18143_v25 = vadd.f32 %v17767_v35, %v5737_v16 }
 0x20a   :  { %v18115_v13 = vpop.f32.mrb[52].mxu0  ;;  %21021 = vst [vmem:[#allocation66_spill] sm:$0xff] %v18143_v25  ;;  %v6139_v62 = vsel %vm5921_vm3, %v18143_v25, -inf }
 0x20b   :  { %v18120_v53 = vpop.f32.mrb[52].mxu1  ;;  %v18122_v31 = vpop.f32.mrb[53].mxu0 }
 0x20c   :  { %6134 = vmax.xlane.f32.xlu0 %v6133_v36  ;;  %v18127_v32 = vpop.f32.mrb[53].mxu1  ;;  %6128 = vmax.xlane.f32.xlu1 %v6127_v37  ;;  %v18140_v36 = vadd.f32 %v17767_v35, %v5739_v7 }
 0x20d   :  { %v18129_v51 = vpop.xlane.xlu0 %6029  ;;  %v18131_v46 = vpop.xlane.xlu1 %6023 }
 0x20e   :  { %21020 = vst [vmem:[#allocation65_spill] sm:$0xff] %v18140_v36  ;;  %v6145_v7 = vsel %vm5921_vm3, %v18140_v36, -inf }
 0x210   :  { %6149 = vmax.xlane.f32.xlu0 %v6148_v59  ;;  %6143 = vmax.xlane.f32.xlu1 %v6142_v10  ;;  %v5741_v59 = vmul.f32 0.25, %v17914_v49  ;;  %v5746_v49 = vmul.f32 0.25, %v17932_v5  ;;  %v5747_v5 = vmul.f32 0.25, %v17945_v58  ;;  %v6172_v58 = vsel %vm5925_vm2, %v18188_v42, -inf }
 0x211   :  { %v18145_v37 = vpop.xlane.xlu0 %6026  ;;  %v18150_v23 = vpop.xlane.xlu1 %6020 }
 0x212   :  { %21023 = vst [vmem:[#allocation68_spill] sm:$0xff] %v18150_v23  ;;  %v18155_v8 = vpop.f32.mrb[54].mxu0  ;;  %v6160_v23 = vsel %vm5925_vm2, %v18148_v9, -inf  ;;  %v18191_v25 = vadd.f32 %v17720_v47, %v5746_v49 }
 0x213   :  { %21025 = vst [vmem:[#allocation70_spill] sm:$0xff] %v18155_v8  ;;  %v18160_v16 = vpop.f32.mrb[54].mxu1  ;;  %v18162_v10 = vpop.f32.mrb[55].mxu0 }
 0x214   :  { %21026 = vst [vmem:[#allocation71_spill] sm:$0xff] %v18162_v10  ;;  %6146 = vmax.xlane.f32.xlu0 %v6145_v7  ;;  %6140 = vmax.xlane.f32.xlu1 %v6139_v62  ;;  %v18172_v8 = vpop.f32.mrb[55].mxu1  ;;  %v6154_v10 = vsel %vm5925_vm2, %v18153_v56, -inf  ;;  %v18180_v7 = vadd.f32 %v17767_v35, %v5743_v21  ;;  %v18183_v62 = vadd.f32 %v17767_v35, %v5741_v59  ;;  %21032 = vst [vmem:[#allocation77_spill] sm:$0xff] %v18191_v25 }
 0x215   :  { %v18167_v63 = vpop.xlane.xlu0 %6041  ;;  %v18174_v36 = vpop.xlane.xlu1 %6035 }
 0x216   :  { %21027 = vst [vmem:[#allocation72_spill] sm:$0xff] %v18174_v36  ;;  %21028 = vst [vmem:[#allocation73_spill] sm:$0xff] %v18180_v7  ;;  %v6157_v21 = vsel %vm5921_vm3, %v18180_v7, -inf  ;;  %v6151_v54 = vsel %vm5921_vm3, %v18183_v62, -inf }
 0x217   :  { %21029 = vst [vmem:[#allocation74_spill] sm:$0xff] %v18183_v62 }
 0x218   :  { %6161 = vmax.xlane.f32.xlu0 %v6160_v23  ;;  %6155 = vmax.xlane.f32.xlu1 %v6154_v10  ;;  %v5745_v10 = vmul.f32 0.25, %v17939_v39  ;;  %v18216_v39 = vadd.f32 %v17767_v35, %v5747_v5  ;;  %v5751_v5 = vmul.f32 0.25, %v17979_v6 }
 0x219   :  { %v18185_v9 = vpop.xlane.xlu0 %6038  ;;  %v18193_v36 = vpop.xlane.xlu1 %6032 }
 0x21a   :  { %21030 = vst [vmem:[#allocation75_spill] sm:$0xff] %v18185_v9  ;;  %21033 = vst [vmem:[#allocation78_spill] sm:$0xff] %v18193_v36  ;;  %v18195_v56 = vpop.f32.mrb[56].mxu0  ;;  %v6166_v9 = vsel %vm5925_vm2, %v18191_v25, -inf }
 0x21b   :  { %21034 = vst [vmem:[#allocation79_spill] sm:$0xff] %v18195_v56  ;;  %v18200_v59 = vpop.f32.mrb[56].mxu1  ;;  %v18202_v23 = vpop.f32.mrb[57].mxu0  ;;  %v5752_v56 = vmul.f32 0.25, %v17972_v14  ;;  %21036 = vst [vmem:[#allocation81_spill] sm:$0xff] %v18216_v39 }
 0x21c   :  { %21035 = vst [vmem:[#allocation80_spill] sm:$0xff] %v18202_v23  ;;  %6158 = vmax.xlane.f32.xlu0 %v6157_v21  ;;  %v18207_v49 = vpop.f32.mrb[57].mxu1  ;;  %6152 = vmax.xlane.f32.xlu1 %v6151_v54  ;;  %v5750_v23 = vmul.f32 0.25, %v17967_v30  ;;  %v18219_v21 = vadd.f32 %v17767_v35, %v5745_v10 }
 0x21d   :  { %v6702_v36 = vpop.xlane.xlu0 %6701  ;;  %v6696_v7 = vpop.xlane.xlu1 %6695  ;;  %v18222_v54 = vadd.f32 %v17720_v47, %v5752_v56  ;;  %v5749_v56 = vmul.f32 0.25, %v17974_v50  ;;  %v5754_v50 = vmul.f32 0.25, %v17992_v38 }
 0x21e   :  { %21037 = vst [vmem:[#allocation82_spill] sm:$0xff] %v18219_v21  ;;  %15441 = vrcp.f32 %v6702_v36  ;;  %v18225_v42 = vadd.f32 %v17720_v47, %v5750_v23  ;;  %v6169_v36 = vsel %vm5921_vm3, %v18216_v39, -inf }
 0x21f   :  { %15443 = vrcp.f32 %v6696_v7  ;;  %21038 = vst [vmem:[#allocation83_spill] sm:$0xff] %v18222_v54  ;;  %v6163_v7 = vsel %vm5921_vm3, %v18219_v21, -inf  ;;  %v6184_v6 = vsel %vm5925_vm2, %v18222_v54, -inf  ;;  %v18255_v21 = vadd.f32 %v17767_v35, %v5749_v56 }
 0x220   :  { %6173 = vmax.xlane.f32.xlu0 %v6172_v58  ;;  %6167 = vmax.xlane.f32.xlu1 %v6166_v9  ;;  %21039 = vst [vmem:[#allocation84_spill] sm:$0xff] %v18225_v42  ;;  %v6178_v39 = vsel %vm5925_vm2, %v18225_v42, -inf  ;;  %v18263_v62 = vadd.f32 %v17720_v47, %v5754_v50 }
 0x221   :  { %v6699_v14 = vpop.xlane.xlu0 %6698  ;;  %v6693_v25 = vpop.xlane.xlu1 %6692  ;;  %21045 = vst [vmem:[#allocation90_spill] sm:$0xff] %v18255_v21  ;;  %v6175_v50 = vsel %vm5921_vm3, %v18255_v21, -inf  ;;  %v104_v21 = vld [vmem:[%s20614_s5 + $0x40] sm:$0xff] }
 0x222   :  { %15445 = vrcp.f32 %v6699_v14  ;;  %v18227_v30 = vpop.f32.mrb[58].mxu0 }
 0x223   :  { %21040 = vst [vmem:[#allocation85_spill] sm:$0xff] %v18227_v30  ;;  %15447 = vrcp.f32 %v6693_v25  ;;  %v18232_v10 = vpop.f32.mrb[58].mxu1  ;;  %v18234_v9 = vpop.f32.mrb[59].mxu0  ;;  %v5756_v25 = vmul.f32 0.25, %v17997_v60  ;;  %v105_v30 = vld [vmem:[%s20614_s5 + $0x48] sm:$0xf] }
 0x224   :  { %21041 = vst [vmem:[#allocation86_spill] sm:$0xff] %v18232_v10  ;;  %21042 = vst [vmem:[#allocation87_spill] sm:$0xff] %v18234_v9  ;;  %6170 = vmax.xlane.f32.xlu0 %v6169_v36  ;;  %v18239_v23 = vpop.f32.mrb[59].mxu1  ;;  %6164 = vmax.xlane.f32.xlu1 %v6163_v7  ;;  %v18252_v36 = vadd.f32 %v17767_v35, %v5751_v5  ;;  %v5755_v9 = vmul.f32 0.25, %v18005_v44  ;;  %v107_v44 = vld [vmem:[%s20614_s5 + $0x58] sm:$0xf] }
 0x225   :  { %21043 = vst [vmem:[#allocation88_spill] sm:$0xff] %v18239_v23  ;;  %v18241_v58 = vpop.xlane.xlu0 %6053  ;;  %v18246_v14 = vpop.xlane.xlu1 %6047  ;;  %v18258_v7 = vadd.f32 %v17720_v47, %v5756_v25  ;;  %v5753_v23 = vmul.f32 0.25, %v17999_v48 }
 0x226   :  { %21044 = vst [vmem:[#allocation89_spill] sm:$0xff] %v18252_v36  ;;  %v6181_v56 = vsel %vm5921_vm3, %v18252_v36, -inf }
 0x227   :  { %21046 = vst [vmem:[#allocation91_spill] sm:$0xff] %v18258_v7  ;;  %v6196_v48 = vsel %vm5925_vm2, %v18258_v7, -inf  ;;  %v18309_v10 = vadd.f32 %v17767_v35, %v5753_v23 }
 0x228   :  { %6185 = vmax.xlane.f32.xlu0 %v6184_v6  ;;  %6179 = vmax.xlane.f32.xlu1 %v6178_v39  ;;  %v15442_v60 = vpop.eup %15441 }
 0x229   :  { %v18260_v54 = vpop.xlane.xlu0 %6050  ;;  %v18265_v42 = vpop.xlane.xlu1 %6044  ;;  %21054 = vst [vmem:[#allocation99_spill] sm:$0xff] %v18309_v10 }
 0x22a   :  { %21047 = vst [vmem:[#allocation92_spill] sm:$0xff] %v18260_v54  ;;  %21048 = vst [vmem:[#allocation93_spill] sm:$0xff] %v18265_v42  ;;  %v18267_v38 = vpop.f32.mrb[60].mxu0  ;;  %v15444_v5 = vpop.eup %15443 }
 0x22b   :  { %21049 = vst [vmem:[#allocation94_spill] sm:$0xff] %v18267_v38  ;;  %v18272_v39 = vpop.f32.mrb[60].mxu1  ;;  %v18274_v6 = vpop.f32.mrb[61].mxu0  ;;  %v106_v38 = vld [vmem:[%s20614_s5 + $0x50] sm:$0xff] }
 0x22c   :  { %21050 = vst [vmem:[#allocation95_spill] sm:$0xff] %v18272_v39  ;;  %21051 = vst [vmem:[#allocation96_spill] sm:$0xff] %v18274_v6  ;;  %v15446_v25 = vpop.eup %15445  ;;  %6182 = vmax.xlane.f32.xlu0 %v6181_v56  ;;  %v18285_v36 = vpop.f32.mrb[61].mxu1  ;;  %6176 = vmax.xlane.f32.xlu1 %v6175_v50  ;;  %v5760_v56 = vmul.f32 0.25, %v18032_v17  ;;  %v6190_v50 = vsel %vm5925_vm2, %v18263_v62, -inf  ;;  %v7082_v17 = vmul.f32 %v15442_v60, %v17600_v61 }
 0x22d   :  { %21052 = vst [vmem:[#allocation97_spill] sm:$0xff] %v18285_v36  ;;  %v15448_v39 = vpop.eup %15447  ;;  %v6714_v6 = vpop.xlane.xlu0 %6713  ;;  %v7080_v42 = vmul.f32 %v15446_v25, %v17608_v11  ;;  %v5758_v11 = vmul.f32 0.25, %v18027_v40  ;;  %v18302_v25 = vadd.f32 %v17767_v35, %v5755_v9  ;;  %v18306_v7 = vpack.c.bf16 %v107_v44, %v106_v38 }
 0x22e   :  { %v6708_v54 = vpop.xlane.xlu1 %6707  ;;  %v7076_v36 = vmul.f32 %v15448_v39, %v17612_v28  ;;  %15449 = vrcp.f32 %v6714_v6  ;;  %v7078_v28 = vmul.f32 %v15444_v5, %v17595_v0  ;;  %v18313_v39 = vpack.c.bf16 %v105_v30, %v104_v21 }
 0x22f   :  { %14164 = vmatprep.mubr.msk.f32.mxu1 %vm5921_vm3, %v7080_v42  ;;  %21053 = vst [vmem:[#allocation98_spill] sm:$0xff] %v18306_v7  ;;  %15451 = vrcp.f32 %v6708_v54  ;;  %v18317_v40 = vadd.f32 %v17720_v47, %v5760_v56  ;;  %v18321_v42 = vadd.f32 %v17720_v47, %v5758_v11  ;;  %v5759_v21 = vmul.f32 0.25, %v18039_v24 }
 0x230   :  { %14157 = vmatprep.mubr.msk.f32.mxu0 %vm5921_vm3, %v7076_v36  ;;  %6197 = vmax.xlane.f32.xlu0 %v6196_v48  ;;  %21055 = vst [vmem:[#allocation100_spill] sm:$0xff] %v18313_v39  ;;  %v6193_v54 = vsel %vm5921_vm3, %v18302_v25, -inf  ;;  %v5757_v36 = vmul.f32 0.25, %v18034_v2  ;;  %v6187_v24 = vsel %vm5921_vm3, %v18309_v10, -inf  ;;  %v5764_v6 = vmul.f32 0.25, %v18055_v41 }
 0x231   :  { %14165 = vmatmul.mubr.msk.f32.vlgmr.msra.gmra.mrb[64].mxu1 %vm5921_vm3, %v7082_v17  ;;  %6191 = vmax.xlane.f32.xlu1 %v6190_v50  ;;  %21056 = vst [vmem:[#allocation101_spill] sm:$0xff] %v18317_v40  ;;  %v6711_v61 = vpop.xlane.xlu0 %6710  ;;  %21057 = vst [vmem:[#allocation102_spill] sm:$0xff] %v18321_v42  ;;  %v6208_v5 = vsel %vm5925_vm2, %v18317_v40, -inf  ;;  %v6202_v2 = vsel %vm5925_vm2, %v18321_v42, -inf  ;;  %v5762_v48 = vmul.f32 0.25, %v18051_v18  ;;  %v18360_v56 = vadd.f32 %v17767_v35, %v5759_v21 }
 0x232   :  { %14158 = vmatmul.mubr.msk.f32.vlgmr.msra.gmra.mrb[64].mxu0 %vm5921_vm3, %v7078_v28  ;;  %15453 = vrcp.f32 %v6711_v61  ;;  %v6705_v9 = vpop.xlane.xlu1 %6704  ;;  %15008 = vmatpush3.bf16.msk.msra.mxu1 %vm17760_vm6, %v17836_v26  ;;  %v18326_v0 = vpop.f32.mrb[62].mxu0  ;;  %v18363_v50 = vadd.f32 %v17767_v35, %v5757_v36  ;;  %v18366_v11 = vadd.f32 %v17720_v47, %v5764_v6  ;;  %v5761_v36 = vmul.f32 0.25, %v18057_v22  ;;  %v111_v6 = vld [vmem:[%s20614_s5 + $0x78] sm:$0xf] }
 0x233   :  { %15455 = vrcp.f32 %v6705_v9  ;;  %15002 = vmatpush3.bf16.msk.msra.mxu0 %vm17760_vm6, %v17826_v20  ;;  %15017 = vmatprep.subr.msk.bf16.mxu1 %vm17760_vm6, %v18306_v7  ;;  %v18337_v30 = vpop.f32.mrb[62].mxu1  ;;  %v18339_v23 = vpop.f32.mrb[63].mxu0  ;;  %21058 = vst [vmem:[#allocation103_spill] sm:$0xff] %v18360_v56  ;;  %v18371_v28 = vadd.f32 %v17720_v47, %v5762_v48  ;;  %v5763_v9 = vmul.f32 0.25, %v18063_v52  ;;  %v6205_v21 = vsel %vm5921_vm3, %v18360_v56, -inf }
 0x234   :  { %6194 = vmax.xlane.f32.xlu0 %v6193_v54  ;;  %15011 = vmatprep.subr.msk.bf16.mxu0 %vm17760_vm6, %v18313_v39  ;;  %v18347_v60 = vpop.f32.mrb[63].mxu1  ;;  %21059 = vst [vmem:[#allocation104_spill] sm:$0xff] %v18363_v50  ;;  %21060 = vst [vmem:[#allocation105_spill] sm:$0xff] %v18366_v11  ;;  %v6220_v22 = vsel %vm5925_vm2, %v18366_v11, -inf  ;;  %v109_v56 = vld [vmem:[%s20614_s5 + $0x68] sm:$0xf]  ;;  %v18409_v10 = vadd.f32 %v17767_v35, %v5761_v36 }
 0x235   :  { %6188 = vmax.xlane.f32.xlu1 %v6187_v24  ;;  %v18349_v38 = vpop.xlane.xlu0 %6065  ;;  %v6199_v24 = vsel %vm5921_vm3, %v18363_v50, -inf  ;;  %v108_v50 = vld [vmem:[%s20614_s5 + $0x60] sm:$0xff] }
 0x236   :  { %v18354_v44 = vpop.xlane.xlu1 %6059 }
 0x238   :  { %6209 = vmax.xlane.f32.xlu0 %v6208_v5  ;;  %v15450_v41 = vpop.eup %15449  ;;  %v110_v5 = vld [vmem:[%s20614_s5 + $0x70] sm:$0xff] }
 0x239   :  { %6203 = vmax.xlane.f32.xlu1 %v6202_v2  ;;  %v18368_v17 = vpop.xlane.xlu0 %6062  ;;  %v15452_v18 = vpop.eup %15451  ;;  %v18406_v11 = vpack.c.bf16 %v111_v6, %v110_v5  ;;  %v6340_v6 = vsub.f32 %v17560_v55, %v18131_v46 }
 0x23a   :  { %v18373_v61 = vpop.xlane.xlu1 %6056 }
 0x23b   :  { %21061 = vst [vmem:[#allocation106_spill] sm:$0xff] %v18406_v11 }
 0x23c   :  { %v15454_v54 = vpop.eup %15453  ;;  %6206 = vmax.xlane.f32.xlu0 %v6205_v21  ;;  %v5768_v21 = vmul.f32 0.25, %v18088_v33  ;;  %v7090_v33 = vmul.f32 %v15450_v41, %v17644_v34 }
 0x23d   :  { %v15456_v2 = vpop.eup %15455  ;;  %6200 = vmax.xlane.f32.xlu1 %v6199_v24  ;;  %v6726_v52 = vpop.xlane.xlu0 %6725  ;;  %v7088_v48 = vmul.f32 %v15454_v54, %v17654_v12  ;;  %v6214_v24 = vsel %vm5925_vm2, %v18371_v28, -inf  ;;  %v5766_v12 = vmul.f32 0.25, %v18083_v29  ;;  %v18402_v54 = vadd.f32 %v17767_v35, %v5763_v9 }
 0x23e   :  { %v6720_v42 = vpop.xlane.xlu1 %6719  ;;  %v7084_v40 = vmul.f32 %v15456_v2, %v17658_v57  ;;  %15457 = vrcp.f32 %v6726_v52  ;;  %v7086_v57 = vmul.f32 %v15452_v18, %v17648_v27  ;;  %v18413_v2 = vpack.c.bf16 %v109_v56, %v108_v50 }
 0x23f   :  { %14178 = vmatprep.mubr.msk.f32.mxu1 %vm5921_vm3, %v7088_v48  ;;  %15459 = vrcp.f32 %v6720_v42  ;;  %v18417_v29 = vadd.f32 %v17720_v47, %v5768_v21  ;;  %v18421_v41 = vadd.f32 %v17720_v47, %v5766_v12  ;;  %v5767_v27 = vmul.f32 0.25, %v18095_v3 }
 0x240   :  { %14171 = vmatprep.mubr.msk.f32.mxu0 %vm5921_vm3, %v7084_v40  ;;  %6221 = vmax.xlane.f32.xlu0 %v6220_v22  ;;  %21062 = vst [vmem:[#allocation107_spill] sm:$0xff] %v18413_v2  ;;  %v6217_v42 = vsel %vm5921_vm3, %v18402_v54, -inf  ;;  %v5765_v47 = vmul.f32 0.25, %v18090_v1  ;;  %v6211_v56 = vsel %vm5921_vm3, %v18409_v10, -inf  ;;  %v5770_v18 = vmul.f32 0.25, %v18115_v13 }
 0x241   :  { %14179 = vmatmul.mubr.msk.f32.vlgmr.msra.gmra.mrb[66].mxu1 %vm5921_vm3, %v7090_v33  ;;  %6215 = vmax.xlane.f32.xlu1 %v6214_v24  ;;  %v6723_v34 = vpop.xlane.xlu0 %6722  ;;  %v6232_v50 = vsel %vm5925_vm2, %v18417_v29, -inf  ;;  %v5772_v9 = vmul.f32 0.25, %v18120_v53  ;;  %v6342_v1 = vsub.f32 %v17557_v15, %v18129_v51  ;;  %v6226_v5 = vsel %vm5925_vm2, %v18421_v41, -inf  ;;  %v18464_v15 = vld [vmem:[%s20613_s2 + $0x8] sm:$0xf] }
 0x242   :  { %14172 = vmatmul.mubr.msk.f32.vlgmr.msra.gmra.mrb[66].mxu0 %vm5921_vm3, %v7086_v57  ;;  %15461 = vrcp.f32 %v6723_v34  ;;  %v6717_v40 = vpop.xlane.xlu1 %6716  ;;  %15020 = vmatpush3.bf16.msk.msra.mxu1 %vm17760_vm6, %v18306_v7  ;;  %v18456_v52 = vadd.f32 %v17767_v35, %v5767_v27  ;;  %v18459_v48 = vadd.f32 %v17767_v35, %v5765_v47  ;;  %v18467_v13 = vadd.f32 %v18464_v15, %v5770_v18  ;;  %v114_v35 = vld [vmem:[%s20614_s5 + $0x90] sm:$0xff]  ;;  %v115_v51 = vld [vmem:[%s20614_s5 + $0x98] sm:$0xf] }
 0x243   :  { %15463 = vrcp.f32 %v6717_v40  ;;  %15014 = vmatpush3.bf16.msk.msra.mxu0 %vm17760_vm6, %v18313_v39  ;;  %15029 = vmatprep.subr.msk.bf16.mxu1 %vm17760_vm6, %v18406_v11  ;;  %v18470_v53 = vadd.f32 %v18464_v15, %v5772_v9  ;;  %v6505_v22 = vmul.f32 1.442695, %v6342_v1  ;;  %v6501_v12 = vmul.f32 1.442695, %v6340_v6  ;;  %v113_v1 = vld [vmem:[%s20614_s5 + $0x88] sm:$0xf] }
 0x244   :  { %6218 = vmax.xlane.f32.xlu0 %v6217_v42  ;;  %15023 = vmatprep.subr.msk.bf16.mxu0 %vm17760_vm6, %v18413_v2  ;;  %21063 = vst [vmem:[#allocation108_spill] sm:$0xff] %v18467_v13  ;;  %v5771_v33 = vmul.f32 0.25, %v18127_v32  ;;  %v6229_v57 = vsel %vm5921_vm3, %v18456_v52, -inf  ;;  %v5769_v40 = vmul.f32 0.25, %v18122_v31  ;;  %v6223_v27 = vsel %vm5921_vm3, %v18459_v48, -inf  ;;  %v112_v31 = vld [vmem:[%s20614_s5 + $0x80] sm:$0xff] }
 0x245   :  { %6212 = vmax.xlane.f32.xlu1 %v6211_v56  ;;  %v18441_v3 = vpop.xlane.xlu0 %6077  ;;  %v18488_v42 = vpack.c.bf16 %v115_v51, %v114_v35  ;;  %v6244_v32 = vsel %vm5925_vm2, %v18470_v53, -inf  ;;  %v6238_v18 = vsel %vm5925_vm2, %v18467_v13, -inf  ;;  %v5776_v9 = vmul.f32 0.25, %v18160_v16  ;;  %v21065_v35 = vld [vmem:[#allocation70_spill] sm:$0xff]  ;;  %v21067_v16 = vld [vmem:[#allocation23_spill] sm:$0xff]  ;;  %v21087_v7 = vld [vmem:[#allocation29_spill] sm:$0xff] }
 0x246   :  { %v18449_v36 = vpop.xlane.xlu1 %6071  ;;  %15465 = vpow2.f32 %v6505_v22  ;;  %v5774_v51 = vmul.f32 0.25, %v21065_v35  ;;  %v21071_v22 = vld [vmem:[#allocation8_spill] sm:$0xff] }
 0x247   :  { %21064 = vst [vmem:[#allocation109_spill] sm:$0xff] %v18488_v42  ;;  %15467 = vpow2.f32 %v6501_v12 }
 0x248   :  { %6233 = vmax.xlane.f32.xlu0 %v6232_v50  ;;  %v15458_v46 = vpop.eup %15457 }
 0x249   :  { %6227 = vmax.xlane.f32.xlu1 %v6226_v5  ;;  %v18472_v55 = vpop.xlane.xlu0 %6074  ;;  %v15460_v24 = vpop.eup %15459 }
 0x24a   :  { %v18480_v21 = vpop.xlane.xlu1 %6068  ;;  %v7094_v12 = vmul.f32 %v15460_v24, %v21071_v22 }
 0x24c   :  { %v15462_v34 = vpop.eup %15461  ;;  %6230 = vmax.xlane.f32.xlu0 %v6229_v57  ;;  %v21066_v57 = vld [vmem:[#allocation68_spill] sm:$0xff] }
 0x24d   :  { %v15464_v47 = vpop.eup %15463  ;;  %6224 = vmax.xlane.f32.xlu1 %v6223_v27  ;;  %v6738_v56 = vpop.xlane.xlu0 %6737  ;;  %v7096_v50 = vmul.f32 %v15462_v34, %v17711_v19  ;;  %v6341_v19 = vsub.f32 %v17569_v45, %v18145_v37  ;;  %v6339_v34 = vsub.f32 %v21067_v16, %v21066_v57  ;;  %v18511_v27 = vld [vmem:[%s20613_s2] sm:$0xff]  ;;  %v21069_v45 = vld [vmem:[#allocation5_spill] sm:$0xff]  ;;  %v21077_v57 = vld [vmem:[#allocation72_spill] sm:$0xff] }
 0x24e   :  { %v6732_v5 = vpop.xlane.xlu1 %6731  ;;  %v7092_v6 = vmul.f32 %v15464_v47, %v17715_v43  ;;  %v18514_v39 = vadd.f32 %v18511_v27, %v5771_v33  ;;  %v7098_v37 = vmul.f32 %v15458_v46, %v21069_v45  ;;  %v18519_v43 = vadd.f32 %v18511_v27, %v5769_v40  ;;  %v21078_v16 = vld [vmem:[#allocation25_spill] sm:$0xff] }
 0x24f   :  { %14192 = vmatprep.mubr.msk.f32.mxu1 %vm5921_vm3, %v7096_v50  ;;  %15469 = vrcp.f32 %v6738_v56  ;;  %v18523_v47 = vpack.c.bf16 %v113_v1, %v112_v31  ;;  %v18527_v33 = vadd.f32 %v18464_v15, %v5776_v9  ;;  %v6503_v46 = vmul.f32 1.442695, %v6341_v19  ;;  %v21075_v9 = vld [vmem:[#allocation71_spill] sm:$0xff] }
 0x250   :  { %21068 = vst [vmem:[#allocation70_spill] sm:$0xff] %v18514_v39  ;;  %21070 = vst [vmem:[#allocation68_spill] sm:$0xff] %v18519_v43  ;;  %14185 = vmatprep.mubr.msk.f32.mxu0 %vm5921_vm3, %v7092_v6  ;;  %6245 = vmax.xlane.f32.xlu0 %v6244_v32  ;;  %15471 = vrcp.f32 %v6732_v5  ;;  %v18531_v40 = vadd.f32 %v18464_v15, %v5774_v51  ;;  %v6499_v24 = vmul.f32 1.442695, %v6339_v34  ;;  %v5775_v32 = vmul.f32 0.25, %v18172_v8  ;;  %v21076_v5 = vld [vmem:[#allocation24_spill] sm:$0xff] }
 0x251   :  { %21072 = vst [vmem:[#allocation23_spill] sm:$0xff] %v18523_v47  ;;  %14193 = vmatmul.mubr.msk.f32.vlgmr.msra.gmra.mrb[68].mxu1 %vm5921_vm3, %v7098_v37  ;;  %6239 = vmax.xlane.f32.xlu1 %v6238_v18  ;;  %21073 = vst [vmem:[#allocation5_spill] sm:$0xff] %v18527_v33  ;;  %v6735_v50 = vpop.xlane.xlu0 %6734  ;;  %v6241_v18 = vsel %vm5921_vm3, %v18514_v39, -inf  ;;  %v5773_v31 = vmul.f32 0.25, %v21075_v9  ;;  %v6235_v1 = vsel %vm5921_vm3, %v18519_v43, -inf  ;;  %v6256_v19 = vsel %vm5925_vm2, %v18527_v33, -inf  ;;  %v18566_v37 = vpop.eup %15465 }
 0x252   :  { %14186 = vmatmul.mubr.msk.f32.vlgmr.msra.gmra.mrb[68].mxu0 %vm5921_vm3, %v7094_v12  ;;  %21074 = vst [vmem:[#allocation8_spill] sm:$0xff] %v18531_v40  ;;  %15473 = vrcp.f32 %v6735_v50  ;;  %v6729_v56 = vpop.xlane.xlu1 %6728  ;;  %15032 = vmatpush3.bf16.msk.msra.mxu1 %vm17760_vm6, %v18406_v11  ;;  %v6346_v6 = vsub.f32 %v21076_v5, %v18167_v63  ;;  %v6250_v51 = vsel %vm5925_vm2, %v18531_v40, -inf  ;;  %v6344_v34 = vsub.f32 %v21078_v16, %v21077_v57  ;;  %v18571_v12 = vpop.eup %15467  ;;  %v21085_v11 = vld [vmem:[#allocation75_spill] sm:$0xff]  ;;  %v21091_v43 = vld [vmem:[#allocation12_spill] sm:$0xff] }
 0x253   :  { %15475 = vrcp.f32 %v6729_v56  ;;  %15026 = vmatpush3.bf16.msk.msra.mxu0 %vm17760_vm6, %v18413_v2  ;;  %15041 = vmatprep.subr.msk.bf16.mxu1 %vm17760_vm6, %v18488_v42  ;;  %v18564_v45 = vadd.f32 %v18511_v27, %v5775_v32  ;;  %21080 = vst [vmem:[#allocation24_spill] sm:$0xff] %v18566_v37  ;;  %v18569_v22 = vadd.f32 %v18511_v27, %v5773_v31  ;;  %21082 = vst [vmem:[#allocation25_spill] sm:$0xff] %v18571_v12  ;;  %v119_v32 = vld [vmem:[%s20614_s5 + $0xb8] sm:$0xf] }
 0x254   :  { %6242 = vmax.xlane.f32.xlu0 %v6241_v18  ;;  %15035 = vmatprep.subr.msk.bf16.mxu0 %vm17760_vm6, %v18523_v47  ;;  %15477 = vpow2.f32 %v6503_v46  ;;  %v6513_v46 = vmul.f32 1.442695, %v6346_v6  ;;  %v6509_v9 = vmul.f32 1.442695, %v6344_v34  ;;  %v5780_v16 = vmul.f32 0.25, %v18200_v59  ;;  %v116_v34 = vld [vmem:[%s20614_s5 + $0xa0] sm:$0xff] }
 0x255   :  { %6236 = vmax.xlane.f32.xlu1 %v6235_v1  ;;  %v18551_v8 = vpop.xlane.xlu0 %6089  ;;  %15479 = vpow2.f32 %v6499_v24  ;;  %21079 = vst [vmem:[#allocation71_spill] sm:$0xff] %v18564_v45  ;;  %21081 = vst [vmem:[#allocation72_spill] sm:$0xff] %v18569_v22  ;;  %v118_v24 = vld [vmem:[%s20614_s5 + $0xb0] sm:$0xff]  ;;  %v6253_v31 = vsel %vm5921_vm3, %v18564_v45, -inf  ;;  %v21089_v59 = vld [vmem:[#allocation78_spill] sm:$0xff]  ;;  %v6796_v33 = vsel %vm5925_vm2, %v18566_v37, 0.0 }
 0x256   :  { %v18557_v35 = vpop.xlane.xlu1 %6083  ;;  %v18589_v2 = vpack.c.bf16 %v119_v32, %v118_v24  ;;  %15481 = vpow2.f32 %v6513_v46  ;;  %v21090_v24 = vld [vmem:[#allocation18_spill] sm:$0xff] }
 0x257   :  { %15483 = vpow2.f32 %v6509_v9  ;;  %v6343_v32 = vsub.f32 %v21090_v24, %v21089_v59  ;;  %v21100_v24 = vld [vmem:[#allocation21_spill] sm:$0xff] }
 0x258   :  { %6257 = vmax.xlane.f32.xlu0 %v6256_v19  ;;  %v6247_v19 = vsel %vm5921_vm3, %v18569_v22, -inf  ;;  %v21086_v22 = vld [vmem:[#allocation26_spill] sm:$0xff] }
 0x259   :  { %6251 = vmax.xlane.f32.xlu1 %v6250_v51  ;;  %v18573_v63 = vpop.xlane.xlu0 %6086  ;;  %v15470_v50 = vpop.eup %15469  ;;  %v21083_v51 = vld [vmem:[#allocation13_spill] sm:$0xff]  ;;  %v6345_v45 = vsub.f32 %v21086_v22, %v21085_v11  ;;  %v21093_v11 = vld [vmem:[#allocation28_spill] sm:$0xff] }
 0x25a   :  { %v18575_v56 = vpop.xlane.xlu1 %6080  ;;  %v15472_v18 = vpop.eup %15471  ;;  %21084 = vst [vmem:[#allocation13_spill] sm:$0xff] %v18589_v2  ;;  %v7106_v39 = vmul.f32 %v15470_v50, %v21091_v43  ;;  %v18619_v43 = vadd.f32 %v18464_v15, %v5780_v16 }
 0x25b   :  { %v7102_v22 = vmul.f32 %v15472_v18, %v21093_v11  ;;  %v6507_v18 = vmul.f32 1.442695, %v6343_v32  ;;  %v6348_v32 = vsub.f32 %v21100_v24, %v18246_v14  ;;  %v122_v14 = vld [vmem:[%s20614_s5 + $0xd0] sm:$0xff] }
 0x25c   :  { %v15474_v1 = vpop.eup %15473  ;;  %6254 = vmax.xlane.f32.xlu0 %v6253_v31  ;;  %v117_v31 = vld [vmem:[%s20614_s5 + $0xa8] sm:$0xf] }
 0x25d   :  { %v15476_v5 = vpop.eup %15475  ;;  %6248 = vmax.xlane.f32.xlu1 %v6247_v19  ;;  %v6750_v6 = vpop.xlane.xlu0 %6749  ;;  %v7104_v57 = vmul.f32 %v15474_v1, %v21083_v51  ;;  %v21088_v1 = vld [vmem:[#allocation79_spill] sm:$0xff]  ;;  %v18613_v9 = vpack.c.bf16 %v117_v31, %v116_v34  ;;  %v6268_v31 = vsel %vm5925_vm2, %v18619_v43, -inf }
 0x25e   :  { %v6744_v19 = vpop.xlane.xlu1 %6743  ;;  %v7100_v40 = vmul.f32 %v15476_v5, %v21087_v7  ;;  %v5778_v51 = vmul.f32 0.25, %v21088_v1  ;;  %v18607_v46 = vpop.eup %15477  ;;  %15485 = vrcp.f32 %v6750_v6  ;;  %v6790_v7 = vsel %vm5925_vm2, %v18571_v12, 0.0  ;;  %21096 = vst [vmem:[#allocation79_spill] sm:$0xff] %v18619_v43  ;;  %v21110_v12 = vld [vmem:[#allocation31_spill] sm:$0xff] }
 0x25f   :  { %14206 = vmatprep.mubr.msk.f32.mxu1 %vm5921_vm3, %v7104_v57  ;;  %21092 = vst [vmem:[#allocation75_spill] sm:$0xff] %v18607_v46  ;;  %21094 = vst [vmem:[#allocation26_spill] sm:$0xff] %v18613_v9  ;;  %v18615_v5 = vpop.eup %15479  ;;  %15487 = vrcp.f32 %v6744_v19  ;;  %v6511_v6 = vmul.f32 1.442695, %v6345_v45  ;;  %v6793_v57 = vsel %vm5921_vm3, %v18607_v46, 0.0  ;;  %v21098_v45 = vld [vmem:[#allocation80_spill] sm:$0xff] }
 0x260   :  { %14199 = vmatprep.mubr.msk.f32.mxu0 %vm5921_vm3, %v7100_v40  ;;  %6797 = vadd.xlane.f32.xlu0 %v6796_v33  ;;  %21095 = vst [vmem:[#allocation29_spill] sm:$0xff] %v18615_v5  ;;  %v18623_v33 = vadd.f32 %v18464_v15, %v5778_v51  ;;  %v5777_v16 = vmul.f32 0.25, %v21098_v45  ;;  %v6787_v34 = vsel %vm5921_vm3, %v18615_v5, 0.0  ;;  %v21099_v19 = vld [vmem:[#allocation19_spill] sm:$0xff]  ;;  %v18658_v11 = vpop.eup %15481  ;;  %v6517_v45 = vmul.f32 1.442695, %v6348_v32 }
 0x261   :  { %14207 = vmatmul.mubr.msk.f32.vlgmr.msra.gmra.mrb[70].mxu1 %vm5921_vm3, %v7106_v39  ;;  %6791 = vadd.xlane.f32.xlu1 %v6790_v7  ;;  %v6747_v50 = vpop.xlane.xlu0 %6746  ;;  %v5779_v39 = vmul.f32 0.25, %v18207_v49  ;;  %v6350_v1 = vsub.f32 %v21099_v19, %v18241_v58  ;;  %21102 = vst [vmem:[#allocation12_spill] sm:$0xff] %v18658_v11  ;;  %v120_v32 = vld [vmem:[%s20614_s5 + $0xc0] sm:$0xff]  ;;  %v6808_v5 = vsel %vm5925_vm2, %v18658_v11, 0.0 }
 0x262   :  { %14200 = vmatmul.mubr.msk.f32.vlgmr.msra.gmra.mrb[70].mxu0 %vm5921_vm3, %v7102_v22  ;;  %21097 = vst [vmem:[#allocation78_spill] sm:$0xff] %v18623_v33  ;;  %15489 = vrcp.f32 %v6747_v50  ;;  %v6741_v40 = vpop.xlane.xlu1 %6740  ;;  %15044 = vmatpush3.bf16.msk.msra.mxu1 %vm17760_vm6, %v18488_v42  ;;  %v6262_v59 = vsel %vm5925_vm2, %v18623_v33, -inf  ;;  %v18661_v22 = vadd.f32 %v18511_v27, %v5777_v16  ;;  %v18663_v50 = vpop.eup %15483  ;;  %v21106_v42 = vld [vmem:[#allocation86_spill] sm:$0xff] }
 0x263   :  { %15491 = vrcp.f32 %v6741_v40  ;;  %15038 = vmatpush3.bf16.msk.msra.mxu0 %vm17760_vm6, %v18523_v47  ;;  %15053 = vmatprep.subr.msk.bf16.mxu1 %vm17760_vm6, %v18589_v2  ;;  %v18656_v7 = vadd.f32 %v18511_v27, %v5779_v39  ;;  %21104 = vst [vmem:[#allocation80_spill] sm:$0xff] %v18663_v50  ;;  %v6521_v40 = vmul.f32 1.442695, %v6350_v1  ;;  %v123_v39 = vld [vmem:[%s20614_s5 + $0xd8] sm:$0xf]  ;;  %v5784_v47 = vmul.f32 0.25, %v21106_v42 }
 0x264   :  { %6794 = vadd.xlane.f32.xlu0 %v6793_v57  ;;  %15047 = vmatprep.subr.msk.bf16.mxu0 %vm17760_vm6, %v18613_v9  ;;  %15493 = vpow2.f32 %v6511_v6  ;;  %21103 = vst [vmem:[#allocation28_spill] sm:$0xff] %v18661_v22  ;;  %v18681_v33 = vpack.c.bf16 %v123_v39, %v122_v14  ;;  %v21112_v42 = vld [vmem:[#allocation93_spill] sm:$0xff]  ;;  %v21113_v14 = vld [vmem:[#allocation20_spill] sm:$0xff]  ;;  %v21114_v46 = vld [vmem:[#allocation14_spill] sm:$0xff] }
 0x265   :  { %6788 = vadd.xlane.f32.xlu1 %v6787_v34  ;;  %v18643_v49 = vpop.xlane.xlu0 %6101  ;;  %15495 = vpow2.f32 %v6507_v18  ;;  %21101 = vst [vmem:[#allocation18_spill] sm:$0xff] %v18656_v7  ;;  %v6265_v16 = vsel %vm5921_vm3, %v18656_v7, -inf  ;;  %v21108_v7 = vld [vmem:[#allocation92_spill] sm:$0xff]  ;;  %v6347_v39 = vsub.f32 %v21113_v14, %v21112_v42 }
 0x266   :  { %v18649_v51 = vpop.xlane.xlu1 %6095  ;;  %21107 = vst [vmem:[#allocation19_spill] sm:$0xff] %v18681_v33  ;;  %15497 = vpow2.f32 %v6521_v40 }
 0x267   :  { %15499 = vpow2.f32 %v6517_v45 }
 0x268   :  { %6269 = vmax.xlane.f32.xlu0 %v6268_v31  ;;  %v15486_v6 = vpop.eup %15485  ;;  %v6259_v31 = vsel %vm5921_vm3, %v18661_v22, -inf  ;;  %v21109_v22 = vld [vmem:[#allocation2_spill] sm:$0xff] }
 0x269   :  { %6263 = vmax.xlane.f32.xlu1 %v6262_v59  ;;  %v18665_v58 = vpop.xlane.xlu0 %6098  ;;  %v15488_v57 = vpop.eup %15487  ;;  %v21105_v59 = vld [vmem:[#allocation15_spill] sm:$0xff]  ;;  %v6349_v43 = vsub.f32 %v21109_v22, %v21108_v7  ;;  %v7114_v13 = vmul.f32 %v15486_v6, %v21114_v46  ;;  %v21116_v7 = vld [vmem:[#allocation30_spill] sm:$0xff]  ;;  %v18711_v46 = vadd.f32 %v18464_v15, %v5784_v47 }
 0x26a   :  { %v18667_v18 = vpop.xlane.xlu1 %6092  ;;  %v7110_v22 = vmul.f32 %v15488_v57, %v21116_v7  ;;  %v6515_v57 = vmul.f32 1.442695, %v6347_v39 }
 0x26b   :  { %21119 = vst [vmem:[#allocation92_spill] sm:$0xff] %v18711_v46 }
 0x26c   :  { %v15490_v34 = vpop.eup %15489  ;;  %6266 = vmax.xlane.f32.xlu0 %v6265_v16  ;;  %v121_v16 = vld [vmem:[%s20614_s5 + $0xc8] sm:$0xf] }
 0x26d   :  { %v15492_v19 = vpop.eup %15491  ;;  %6260 = vmax.xlane.f32.xlu1 %v6259_v31  ;;  %v6762_v1 = vpop.xlane.xlu0 %6761  ;;  %v7112_v24 = vmul.f32 %v15490_v34, %v21105_v59  ;;  %v21111_v34 = vld [vmem:[#allocation85_spill] sm:$0xff]  ;;  %v18705_v45 = vpack.c.bf16 %v121_v16, %v120_v32 }
 0x26e   :  { %v6756_v31 = vpop.xlane.xlu1 %6755  ;;  %v7108_v37 = vmul.f32 %v15492_v19, %v21110_v12  ;;  %v5782_v59 = vmul.f32 0.25, %v21111_v34  ;;  %v18699_v40 = vpop.eup %15493  ;;  %15501 = vrcp.f32 %v6762_v1  ;;  %v6802_v12 = vsel %vm5925_vm2, %v18663_v50, 0.0  ;;  %v21133_v50 = vld [vmem:[#allocation43_spill] sm:$0xff] }
 0x26f   :  { %14220 = vmatprep.mubr.msk.f32.mxu1 %vm5921_vm3, %v7112_v24  ;;  %21115 = vst [vmem:[#allocation21_spill] sm:$0xff] %v18699_v40  ;;  %21117 = vst [vmem:[#allocation15_spill] sm:$0xff] %v18705_v45  ;;  %v18707_v19 = vpop.eup %15495  ;;  %15503 = vrcp.f32 %v6756_v31  ;;  %v6519_v1 = vmul.f32 1.442695, %v6349_v43  ;;  %v6805_v47 = vsel %vm5921_vm3, %v18699_v40, 0.0  ;;  %v21122_v43 = vld [vmem:[#allocation87_spill] sm:$0xff] }
 0x270   :  { %14213 = vmatprep.mubr.msk.f32.mxu0 %vm5921_vm3, %v7108_v37  ;;  %6809 = vadd.xlane.f32.xlu0 %v6808_v5  ;;  %21118 = vst [vmem:[#allocation86_spill] sm:$0xff] %v18707_v19  ;;  %v18715_v37 = vadd.f32 %v18464_v15, %v5782_v59  ;;  %v5781_v32 = vmul.f32 0.25, %v21122_v43  ;;  %v6799_v16 = vsel %vm5921_vm3, %v18707_v19, 0.0  ;;  %v6280_v34 = vsel %vm5925_vm2, %v18711_v46, -inf  ;;  %v21123_v59 = vld [vmem:[#allocation3_spill] sm:$0xff]  ;;  %v21136_v19 = vld [vmem:[#allocation16_spill] sm:$0xff] }
 0x271   :  { %14221 = vmatmul.mubr.msk.f32.vlgmr.msra.gmra.mrb[72].mxu1 %vm5921_vm3, %v7114_v13  ;;  %6803 = vadd.xlane.f32.xlu1 %v6802_v12  ;;  %v6759_v6 = vpop.xlane.xlu0 %6758  ;;  %v21121_v13 = vld [vmem:[#allocation88_spill] sm:$0xff]  ;;  %v6354_v42 = vsub.f32 %v21123_v59, %v18349_v38 }
 0x272   :  { %14214 = vmatmul.mubr.msk.f32.vlgmr.msra.gmra.mrb[72].mxu0 %vm5921_vm3, %v7110_v22  ;;  %21120 = vst [vmem:[#allocation2_spill] sm:$0xff] %v18715_v37  ;;  %15505 = vrcp.f32 %v6759_v6  ;;  %v6753_v5 = vpop.xlane.xlu1 %6752  ;;  %15056 = vmatpush3.bf16.msk.msra.mxu1 %vm17760_vm6, %v18589_v2  ;;  %v5783_v24 = vmul.f32 0.25, %v21121_v13  ;;  %v6274_v39 = vsel %vm5925_vm2, %v18715_v37, -inf  ;;  %v21124_v12 = vld [vmem:[#allocation4_spill] sm:$0xff]  ;;  %v18750_v6 = vpop.eup %15497 }
 0x273   :  { %15507 = vrcp.f32 %v6753_v5  ;;  %15050 = vmatpush3.bf16.msk.msra.mxu0 %vm17760_vm6, %v18613_v9  ;;  %15065 = vmatprep.subr.msk.bf16.mxu1 %vm17760_vm6, %v18681_v33  ;;  %v6352_v7 = vsub.f32 %v21124_v12, %v18354_v44  ;;  %21126 = vst [vmem:[#allocation85_spill] sm:$0xff] %v18750_v6  ;;  %v18753_v5 = vadd.f32 %v18511_v27, %v5781_v32  ;;  %v126_v44 = vld [vmem:[%s20614_s5 + $0xf0] sm:$0xff]  ;;  %v21129_v12 = vld [vmem:[#allocation33_spill] sm:$0xff]  ;;  %v21130_v9 = vld [vmem:[#allocation95_spill] sm:$0xff] }
 0x274   :  { %6806 = vadd.xlane.f32.xlu0 %v6805_v47  ;;  %15059 = vmatprep.subr.msk.bf16.mxu0 %vm17760_vm6, %v18705_v45  ;;  %15509 = vpow2.f32 %v6519_v1  ;;  %v18748_v22 = vadd.f32 %v18511_v27, %v5783_v24  ;;  %v18755_v1 = vpop.eup %15499  ;;  %v6529_v47 = vmul.f32 1.442695, %v6354_v42  ;;  %v127_v24 = vld [vmem:[%s20614_s5 + $0xf8] sm:$0xf]  ;;  %v5788_v37 = vmul.f32 0.25, %v21130_v9  ;;  %v21135_v9 = vld [vmem:[#allocation6_spill] sm:$0xff] }
 0x275   :  { %6800 = vadd.xlane.f32.xlu1 %v6799_v16  ;;  %v18735_v31 = vpop.xlane.xlu0 %6113  ;;  %15511 = vpow2.f32 %v6515_v57  ;;  %21127 = vst [vmem:[#allocation93_spill] sm:$0xff] %v18753_v5  ;;  %21128 = vst [vmem:[#allocation20_spill] sm:$0xff] %v18755_v1  ;;  %v6525_v32 = vmul.f32 1.442695, %v6352_v7  ;;  %v6271_v59 = vsel %vm5921_vm3, %v18753_v5, -inf  ;;  %v18773_v46 = vpack.c.bf16 %v127_v24, %v126_v44  ;;  %v124_v7 = vld [vmem:[%s20614_s5 + $0xe0] sm:$0xff] }
 0x276   :  { %v18741_v14 = vpop.xlane.xlu1 %6107  ;;  %21125 = vst [vmem:[#allocation31_spill] sm:$0xff] %v18748_v22  ;;  %v6277_v16 = vsel %vm5921_vm3, %v18748_v22, -inf  ;;  %15513 = vpow2.f32 %v6529_v47  ;;  %v21132_v5 = vld [vmem:[#allocation22_spill] sm:$0xff]  ;;  %v6351_v44 = vsub.f32 %v21135_v9, %v18373_v61  ;;  %v6820_v24 = vsel %vm5925_vm2, %v18750_v6, 0.0 }
 0x277   :  { %21131 = vst [vmem:[#allocation14_spill] sm:$0xff] %v18773_v46  ;;  %v6353_v22 = vsub.f32 %v21132_v5, %v18368_v17  ;;  %15515 = vpow2.f32 %v6525_v32  ;;  %v6814_v17 = vsel %vm5925_vm2, %v18755_v1, 0.0 }
 0x278   :  { %6281 = vmax.xlane.f32.xlu0 %v6280_v34  ;;  %v15502_v13 = vpop.eup %15501 }
 0x279   :  { %6275 = vmax.xlane.f32.xlu1 %v6274_v39  ;;  %v18757_v38 = vpop.xlane.xlu0 %6110  ;;  %v15504_v43 = vpop.eup %15503  ;;  %v7122_v40 = vmul.f32 %v15502_v13, %v21136_v19  ;;  %v6527_v13 = vmul.f32 1.442695, %v6353_v22  ;;  %v21141_v22 = vld [vmem:[#allocation96_spill] sm:$0xff] }
 0x27a   :  { %v18759_v57 = vpop.xlane.xlu1 %6104 }
 0x27c   :  { %v15506_v34 = vpop.eup %15505  ;;  %6278 = vmax.xlane.f32.xlu0 %v6277_v16  ;;  %v125_v16 = vld [vmem:[%s20614_s5 + $0xe8] sm:$0xf] }
 0x27d   :  { %v15508_v42 = vpop.eup %15507  ;;  %6272 = vmax.xlane.f32.xlu1 %v6271_v59  ;;  %v6774_v39 = vpop.xlane.xlu0 %6773  ;;  %v7120_v2 = vmul.f32 %v15506_v34, %v21129_v12  ;;  %v21134_v34 = vld [vmem:[#allocation94_spill] sm:$0xff]  ;;  %v18797_v32 = vpack.c.bf16 %v125_v16, %v124_v7  ;;  %v5785_v7 = vmul.f32 0.25, %v21141_v22 }
 0x27e   :  { %v6768_v59 = vpop.xlane.xlu1 %6767  ;;  %v7116_v11 = vmul.f32 %v15508_v42, %v21133_v50  ;;  %v5786_v12 = vmul.f32 0.25, %v21134_v34  ;;  %v18791_v47 = vpop.eup %15509  ;;  %15517 = vrcp.f32 %v6774_v39  ;;  %v21137_v50 = vld [vmem:[#allocation32_spill] sm:$0xff]  ;;  %v6523_v42 = vmul.f32 1.442695, %v6351_v44 }
 0x27f   :  { %14234 = vmatprep.mubr.msk.f32.mxu1 %vm5921_vm3, %v7120_v2  ;;  %v7118_v5 = vmul.f32 %v15504_v43, %v21137_v50  ;;  %21138 = vst [vmem:[#allocation30_spill] sm:$0xff] %v18797_v32  ;;  %v18799_v61 = vpop.eup %15511  ;;  %15519 = vrcp.f32 %v6768_v59  ;;  %v18803_v2 = vadd.f32 %v18464_v15, %v5788_v37  ;;  %v6817_v37 = vsel %vm5921_vm3, %v18791_v47, 0.0 }
 0x280   :  { %14227 = vmatprep.mubr.msk.f32.mxu0 %vm5921_vm3, %v7116_v11  ;;  %6821 = vadd.xlane.f32.xlu0 %v6820_v24  ;;  %21139 = vst [vmem:[#allocation88_spill] sm:$0xff] %v18799_v61  ;;  %v18807_v11 = vadd.f32 %v18464_v15, %v5786_v12  ;;  %v6811_v16 = vsel %vm5921_vm3, %v18799_v61, 0.0  ;;  %v21142_v12 = vld [vmem:[#allocation7_spill] sm:$0xff]  ;;  %v21148_v61 = vld [vmem:[#allocation50_spill] sm:$0xff] }
 0x281   :  { %14235 = vmatmul.mubr.msk.f32.vlgmr.msra.gmra.mrb[74].mxu1 %vm5921_vm3, %v7122_v40  ;;  %6815 = vadd.xlane.f32.xlu1 %v6814_v17  ;;  %v6771_v19 = vpop.xlane.xlu0 %6770  ;;  %v21140_v40 = vld [vmem:[#allocation97_spill] sm:$0xff]  ;;  %v6292_v34 = vsel %vm5925_vm2, %v18803_v2, -inf  ;;  %v6358_v9 = vsub.f32 %v21142_v12, %v18441_v3 }
 0x282   :  { %14228 = vmatmul.mubr.msk.f32.vlgmr.msra.gmra.mrb[74].mxu0 %vm5921_vm3, %v7118_v5  ;;  %15521 = vrcp.f32 %v6771_v19  ;;  %v6765_v43 = vpop.xlane.xlu1 %6764  ;;  %15068 = vmatpush3.bf16.msk.msra.mxu1 %vm17760_vm6, %v18681_v33  ;;  %v5787_v39 = vmul.f32 0.25, %v21140_v40  ;;  %v6286_v24 = vsel %vm5925_vm2, %v18807_v11, -inf  ;;  %v21143_v17 = vld [vmem:[#allocation9_spill] sm:$0xff]  ;;  %v18842_v19 = vpop.eup %15513 }
 0x283   :  { %15523 = vrcp.f32 %v6765_v43  ;;  %15062 = vmatpush3.bf16.msk.msra.mxu0 %vm17760_vm6, %v18705_v45  ;;  %15077 = vmatprep.subr.msk.bf16.mxu1 %vm17760_vm6, %v18773_v46  ;;  %v6356_v50 = vsub.f32 %v21143_v17, %v18449_v36  ;;  %v18845_v43 = vadd.f32 %v18511_v27, %v5785_v7  ;;  %v5790_v45 = vmul.f32 0.25, %v18326_v0 }
 0x284   :  { %6818 = vadd.xlane.f32.xlu0 %v6817_v37  ;;  %15071 = vmatprep.subr.msk.bf16.mxu0 %vm17760_vm6, %v18797_v32  ;;  %15525 = vpow2.f32 %v6527_v13  ;;  %v18840_v5 = vadd.f32 %v18511_v27, %v5787_v39  ;;  %v18847_v13 = vpop.eup %15515  ;;  %v6537_v37 = vmul.f32 1.442695, %v6358_v9  ;;  %v5792_v9 = vmul.f32 0.25, %v18337_v30 }
 0x285   :  { %6812 = vadd.xlane.f32.xlu1 %v6811_v16  ;;  %v18827_v59 = vpop.xlane.xlu0 %6125  ;;  %15527 = vpow2.f32 %v6523_v42  ;;  %21144 = vst [vmem:[#allocation87_spill] sm:$0xff] %v18845_v43  ;;  %21145 = vst [vmem:[#allocation3_spill] sm:$0xff] %v18847_v13  ;;  %v6533_v36 = vmul.f32 1.442695, %v6356_v50  ;;  %v6283_v7 = vsel %vm5921_vm3, %v18845_v43, -inf  ;;  %v21147_v50 = vld [vmem:[#allocation27_spill] sm:$0xff] }
 0x286   :  { %v18833_v44 = vpop.xlane.xlu1 %6119  ;;  %v6289_v39 = vsel %vm5921_vm3, %v18840_v5, -inf  ;;  %15529 = vpow2.f32 %v6537_v37  ;;  %v6357_v33 = vsub.f32 %v21147_v50, %v18472_v55  ;;  %v6826_v30 = vsel %vm5925_vm2, %v18847_v13, 0.0  ;;  %v21151_v55 = vld [vmem:[#allocation48_spill] sm:$0xff] }
 0x287   :  { %15531 = vpow2.f32 %v6533_v36 }
 0x288   :  { %6293 = vmax.xlane.f32.xlu0 %v6292_v34  ;;  %v15518_v40 = vpop.eup %15517 }
 0x289   :  { %6287 = vmax.xlane.f32.xlu1 %v6286_v24  ;;  %v18849_v3 = vpop.xlane.xlu0 %6122  ;;  %v15520_v22 = vpop.eup %15519  ;;  %v21146_v24 = vld [vmem:[#allocation49_spill] sm:$0xff] }
 0x28a   :  { %v18851_v42 = vpop.xlane.xlu1 %6116 }
 0x28c   :  { %v15522_v16 = vpop.eup %15521  ;;  %6290 = vmax.xlane.f32.xlu0 %v6289_v39  ;;  %v21149_v39 = vld [vmem:[#allocation11_spill] sm:$0xff] }
 0x28d   :  { %v15524_v34 = vpop.eup %15523  ;;  %6284 = vmax.xlane.f32.xlu1 %v6283_v7  ;;  %v6786_v12 = vpop.xlane.xlu0 %6785  ;;  %v7128_v17 = vmul.f32 %v15522_v16, %v21146_v24  ;;  %v6355_v43 = vsub.f32 %v21149_v39, %v18480_v21  ;;  %v6832_v16 = vsel %vm5925_vm2, %v18842_v19, 0.0  ;;  %v21150_v7 = vld [vmem:[#allocation17_spill] sm:$0xff]  ;;  %v18879_v21 = vadd.f32 %v18464_v15, %v5790_v45 }
 0x28e   :  { %v6780_v1 = vpop.xlane.xlu1 %6779  ;;  %v7124_v6 = vmul.f32 %v15524_v34, %v21148_v61  ;;  %v7130_v0 = vmul.f32 %v15518_v40, %v21150_v7  ;;  %v18869_v24 = vpop.eup %15525  ;;  %15533 = vrcp.f32 %v6786_v12  ;;  %v7126_v61 = vmul.f32 %v15520_v22, %v21151_v55  ;;  %v21152_v34 = vld [vmem:[#allocation35_spill] sm:$0xff]  ;;  %v21157_v55 = vld [vmem:[#allocation38_spill] sm:$0xff] }
 0x28f   :  { %14248 = vmatprep.mubr.msk.f32.mxu1 %vm5921_vm3, %v7128_v17  ;;  %v18875_v37 = vpop.eup %15527  ;;  %15535 = vrcp.f32 %v6780_v1  ;;  %v18882_v40 = vadd.f32 %v18464_v15, %v5792_v9  ;;  %v6362_v12 = vsub.f32 %v21152_v34, %v18551_v8  ;;  %v5791_v1 = vmul.f32 0.25, %v18347_v60  ;;  %v21153_v17 = vld [vmem:[#allocation36_spill] sm:$0xff]  ;;  %v21154_v8 = vld [vmem:[#allocation34_spill] sm:$0xff] }
 0x290   :  { %14241 = vmatprep.mubr.msk.f32.mxu0 %vm5921_vm3, %v7124_v6  ;;  %6833 = vadd.xlane.f32.xlu0 %v6832_v16  ;;  %v6535_v6 = vmul.f32 1.442695, %v6357_v33  ;;  %v6531_v45 = vmul.f32 1.442695, %v6355_v43  ;;  %v6360_v15 = vsub.f32 %v21153_v17, %v18557_v35  ;;  %v6829_v33 = vsel %vm5921_vm3, %v18869_v24, 0.0  ;;  %v21155_v9 = vld [vmem:[#allocation10_spill] sm:$0xff]  ;;  %v18922_v34 = vpop.eup %15529 }
 0x291   :  { %14249 = vmatmul.mubr.msk.f32.vlgmr.msra.gmra.mrb[76].mxu1 %vm5921_vm3, %v7130_v0  ;;  %6827 = vadd.xlane.f32.xlu1 %v6826_v30  ;;  %v6783_v36 = vpop.xlane.xlu0 %6782  ;;  %v5789_v60 = vmul.f32 0.25, %v18339_v23  ;;  %v6823_v43 = vsel %vm5921_vm3, %v18875_v37, 0.0  ;;  %v6304_v50 = vsel %vm5925_vm2, %v18882_v40, -inf  ;;  %v6545_v39 = vmul.f32 1.442695, %v6362_v12  ;;  %v21156_v16 = vld [vmem:[#allocation37_spill] sm:$0xff] }
 0x292   :  { %14242 = vmatmul.mubr.msk.f32.vlgmr.msra.gmra.mrb[76].mxu0 %vm5921_vm3, %v7126_v61  ;;  %15537 = vrcp.f32 %v6783_v36  ;;  %v6777_v22 = vpop.xlane.xlu1 %6776  ;;  %15080 = vmatpush3.bf16.msk.msra.mxu1 %vm17760_vm6, %v18773_v46  ;;  %v6361_v7 = vsub.f32 %v21156_v16, %v18573_v63  ;;  %v6298_v0 = vsel %vm5925_vm2, %v18879_v21, -inf  ;;  %v6541_v30 = vmul.f32 1.442695, %v6360_v15  ;;  %v18927_v63 = vpop.eup %15531  ;;  %v21158_v17 = vld [vmem:[#allocation39_spill] sm:$0xff] }
 0x293   :  { %15539 = vrcp.f32 %v6777_v22  ;;  %15074 = vmatpush3.bf16.msk.msra.mxu0 %vm17760_vm6, %v18797_v32  ;;  %15089 = vmatprep.subr.msk.bf16.mxu1 %vm17760_vm6, %v21154_v8  ;;  %v6359_v61 = vsub.f32 %v21157_v55, %v18575_v56  ;;  %v18920_v36 = vadd.f32 %v18511_v27, %v5791_v1  ;;  %v6366_v56 = vsub.f32 %v21158_v17, %v18643_v49  ;;  %v21160_v49 = vld [vmem:[#allocation57_spill] sm:$0xff] }
 0x294   :  { %6830 = vadd.xlane.f32.xlu0 %v6829_v33  ;;  %15083 = vmatprep.subr.msk.bf16.mxu0 %vm17760_vm6, %v21155_v9  ;;  %15541 = vpow2.f32 %v6535_v6  ;;  %v18925_v6 = vadd.f32 %v18511_v27, %v5789_v60  ;;  %v21159_v27 = vld [vmem:[#allocation40_spill] sm:$0xff] }
 0x295   :  { %6824 = vadd.xlane.f32.xlu1 %v6823_v43  ;;  %v18907_v35 = vpop.xlane.xlu0 %6137  ;;  %15543 = vpow2.f32 %v6531_v45  ;;  %v6543_v45 = vmul.f32 1.442695, %v6361_v7  ;;  %v6539_v33 = vmul.f32 1.442695, %v6359_v61  ;;  %v6364_v60 = vsub.f32 %v21159_v27, %v18649_v51  ;;  %v21161_v51 = vld [vmem:[#allocation41_spill] sm:$0xff]  ;;  %v21162_v27 = vld [vmem:[#allocation58_spill] sm:$0xff] }
 0x296   :  { %v18913_v23 = vpop.xlane.xlu1 %6131  ;;  %15545 = vpow2.f32 %v6545_v39  ;;  %v6301_v43 = vsel %vm5921_vm3, %v18920_v36, -inf  ;;  %v6295_v39 = vsel %vm5921_vm3, %v18925_v6, -inf  ;;  %v6553_v55 = vmul.f32 1.442695, %v6366_v56 }
 0x297   :  { %15547 = vpow2.f32 %v6541_v30  ;;  %v6844_v30 = vsel %vm5925_vm2, %v18922_v34, 0.0  ;;  %v6365_v61 = vsub.f32 %v21161_v51, %v18665_v58  ;;  %v6549_v32 = vmul.f32 1.442695, %v6364_v60 }
 0x298   :  { %6305 = vmax.xlane.f32.xlu0 %v6304_v50  ;;  %v15534_v22 = vpop.eup %15533  ;;  %15549 = vpow2.f32 %v6543_v45  ;;  %v6838_v58 = vsel %vm5925_vm2, %v18927_v63, 0.0  ;;  %v21165_v45 = vld [vmem:[#allocation56_spill] sm:$0xff] }
 0x299   :  { %6299 = vmax.xlane.f32.xlu1 %v6298_v0  ;;  %v18929_v12 = vpop.xlane.xlu0 %6134  ;;  %v15536_v1 = vpop.eup %15535  ;;  %15551 = vpow2.f32 %v6539_v33  ;;  %v6551_v33 = vmul.f32 1.442695, %v6365_v61 }
 0x29a   :  { %v18933_v15 = vpop.xlane.xlu1 %6128  ;;  %v7134_v56 = vmul.f32 %v15536_v1, %v21165_v45  ;;  %15553 = vpow2.f32 %v6553_v55 }
 0x29b   :  { %15555 = vpow2.f32 %v6549_v32 }
 0x29c   :  { %v15538_v50 = vpop.eup %15537  ;;  %6302 = vmax.xlane.f32.xlu0 %v6301_v43  ;;  %15557 = vpow2.f32 %v6551_v33 }
 0x29d   :  { %v15540_v16 = vpop.eup %15539  ;;  %6296 = vmax.xlane.f32.xlu1 %v6295_v39  ;;  %v18941_v7 = vpop.xlane.xlu0 %6149  ;;  %v7136_v0 = vmul.f32 %v15538_v50, %v21160_v49  ;;  %v21163_v39 = vld [vmem:[#allocation42_spill] sm:$0xff]  ;;  %v21164_v50 = vld [vmem:[#allocation55_spill] sm:$0xff] }
 0x29e   :  { %v18948_v17 = vpop.xlane.xlu1 %6143  ;;  %v7132_v43 = vmul.f32 %v15540_v16, %v21162_v27  ;;  %v6363_v46 = vsub.f32 %v21163_v39, %v18667_v18  ;;  %v7138_v49 = vmul.f32 %v15534_v22, %v21164_v50  ;;  %v18955_v13 = vpop.eup %15541  ;;  %v21166_v22 = vld [vmem:[#allocation44_spill] sm:$0xff]  ;;  %v21169_v39 = vld [vmem:[#allocation47_spill] sm:$0xff] }
 0x29f   :  { %14262 = vmatprep.mubr.msk.f32.mxu1 %vm5921_vm3, %v7136_v0  ;;  %v18961_v16 = vpop.eup %15543  ;;  %v6370_v60 = vsub.f32 %v21166_v22, %v18735_v31  ;;  %v6841_v55 = vsel %vm5921_vm3, %v18955_v13, 0.0  ;;  %v6367_v50 = vsub.f32 %v21169_v39, %v18759_v57  ;;  %v21170_v22 = vld [vmem:[#allocation51_spill] sm:$0xff] }
 0x2a0   :  { %14255 = vmatprep.mubr.msk.f32.mxu0 %vm5921_vm3, %v7132_v43  ;;  %6845 = vadd.xlane.f32.xlu0 %v6844_v30  ;;  %v6547_v1 = vmul.f32 1.442695, %v6363_v46  ;;  %v21167_v30 = vld [vmem:[#allocation45_spill] sm:$0xff]  ;;  %v18984_v31 = vpop.eup %15545  ;;  %v6835_v46 = vsel %vm5921_vm3, %v18961_v16, 0.0 }
 0x2a1   :  { %14263 = vmatmul.mubr.msk.f32.vlgmr.msra.gmra.mrb[78].mxu1 %vm5921_vm3, %v7138_v49  ;;  %6839 = vadd.xlane.f32.xlu1 %v6838_v58  ;;  %v18964_v18 = vpop.xlane.xlu0 %6146  ;;  %v6368_v51 = vsub.f32 %v21167_v30, %v18741_v14  ;;  %v18991_v14 = vpop.eup %15547  ;;  %v6856_v49 = vsel %vm5925_vm2, %v18984_v31, 0.0  ;;  %v21171_v30 = vld [vmem:[#allocation52_spill] sm:$0xff] }
 0x2a2   :  { %14256 = vmatmul.mubr.msk.f32.vlgmr.msra.gmra.mrb[78].mxu0 %vm5921_vm3, %v7134_v56  ;;  %v18969_v0 = vpop.xlane.xlu1 %6140  ;;  %15092 = vmatpush3.bf16.msk.msra.mxu1 %vm17760_vm6, %v21154_v8  ;;  %v6561_v8 = vmul.f32 1.442695, %v6370_v60  ;;  %15559 = vpow2.f32 %v6547_v1  ;;  %v19003_v58 = vpop.eup %15549  ;;  %v6850_v45 = vsel %vm5925_vm2, %v18991_v14, 0.0  ;;  %v6374_v60 = vsub.f32 %v21170_v22, %v18827_v59 }
 0x2a3   :  { %15086 = vmatpush3.bf16.msk.msra.mxu0 %vm17760_vm6, %v21155_v9  ;;  %15101 = vmatprep.subr.msk.bf16.mxu1 %vm17760_vm6, %v17836_v26  ;;  %v21168_v9 = vld [vmem:[#allocation46_spill] sm:$0xff]  ;;  %v6557_v43 = vmul.f32 1.442695, %v6368_v51  ;;  %v19007_v56 = vpop.eup %15551  ;;  %v6555_v1 = vmul.f32 1.442695, %v6367_v50  ;;  %v6372_v51 = vsub.f32 %v21171_v30, %v18833_v44 }
 0x2a4   :  { %6842 = vadd.xlane.f32.xlu0 %v6841_v55  ;;  %15095 = vmatprep.subr.msk.bf16.mxu0 %vm17760_vm6, %v17826_v20  ;;  %v6369_v61 = vsub.f32 %v21168_v9, %v18757_v38  ;;  %15561 = vpow2.f32 %v6561_v8  ;;  %v6853_v55 = vsel %vm5921_vm3, %v19003_v58, 0.0  ;;  %v6847_v8 = vsel %vm5921_vm3, %v19007_v56, 0.0 }
 0x2a5   :  { %6836 = vadd.xlane.f32.xlu1 %v6835_v46  ;;  %v18993_v32 = vpop.xlane.xlu0 %6161  ;;  %15563 = vpow2.f32 %v6557_v43  ;;  %v19019_v46 = vpop.eup %15553  ;;  %v21174_v43 = vld [vmem:[#allocation53_spill] sm:$0xff]  ;;  %v6565_v50 = vmul.f32 1.442695, %v6372_v51  ;;  %v21177_v51 = vld [vmem:[#allocation59_spill] sm:$0xff] }
 0x2a6   :  { %v18997_v27 = vpop.xlane.xlu1 %6155  ;;  %v6559_v33 = vmul.f32 1.442695, %v6369_v61  ;;  %21172 = vst [vmem:[#allocation4_spill] sm:$0xff] %v19019_v46  ;;  %v19023_v9 = vpop.eup %15555  ;;  %v6569_v61 = vmul.f32 1.442695, %v6374_v60  ;;  %v6373_v39 = vsub.f32 %v21174_v43, %v18849_v3  ;;  %v6868_v22 = vsel %vm5925_vm2, %v19019_v46, 0.0 }
 0x2a7   :  { %21173 = vst [vmem:[#allocation33_spill] sm:$0xff] %v19023_v9  ;;  %v19035_v30 = vpop.eup %15557  ;;  %v21178_v43 = vld [vmem:[#allocation60_spill] sm:$0xff] }
 0x2a8   :  { %6857 = vadd.xlane.f32.xlu0 %v6856_v49  ;;  %15565 = vpow2.f32 %v6559_v33  ;;  %v21175_v49 = vld [vmem:[#allocation54_spill] sm:$0xff]  ;;  %v6862_v33 = vsel %vm5925_vm2, %v19023_v9, 0.0 }
 0x2a9   :  { %6851 = vadd.xlane.f32.xlu1 %v6850_v45  ;;  %v19009_v38 = vpop.xlane.xlu0 %6158  ;;  %15567 = vpow2.f32 %v6555_v1  ;;  %v6371_v45 = vsub.f32 %v21175_v49, %v18851_v42  ;;  %v6567_v1 = vmul.f32 1.442695, %v6373_v39  ;;  %v6376_v49 = vsub.f32 %v21178_v43, %v18913_v23  ;;  %v21182_v43 = vld [vmem:[#allocation62_spill] sm:$0xff] }
 0x2aa   :  { %v19013_v57 = vpop.xlane.xlu1 %6152  ;;  %15569 = vpow2.f32 %v6569_v61 }
 0x2ab   :  { %15571 = vpow2.f32 %v6565_v50 }
 0x2ac   :  { %6854 = vadd.xlane.f32.xlu0 %v6853_v55  ;;  %v19039_v60 = vpop.eup %15559  ;;  %v6378_v55 = vsub.f32 %v21177_v51, %v18907_v35  ;;  %15573 = vpow2.f32 %v6567_v1  ;;  %v6573_v51 = vmul.f32 1.442695, %v6376_v49  ;;  %v21185_v49 = vld [vmem:[#allocation63_spill] sm:$0xff] }
 0x2ad   :  { %6848 = vadd.xlane.f32.xlu1 %v6847_v8  ;;  %v19025_v59 = vpop.xlane.xlu0 %6173  ;;  %21176 = vst [vmem:[#allocation95_spill] sm:$0xff] %v19039_v60  ;;  %v6563_v8 = vmul.f32 1.442695, %v6371_v45  ;;  %v6859_v61 = vsel %vm5921_vm3, %v19039_v60, 0.0  ;;  %v21181_v45 = vld [vmem:[#allocation61_spill] sm:$0xff] }
 0x2ae   :  { %v19029_v44 = vpop.xlane.xlu1 %6167  ;;  %v19051_v9 = vpop.eup %15561  ;;  %v6577_v50 = vmul.f32 1.442695, %v6378_v55 }
 0x2af   :  { %21179 = vst [vmem:[#allocation22_spill] sm:$0xff] %v19051_v9  ;;  %v19055_v39 = vpop.eup %15563  ;;  %15575 = vpow2.f32 %v6563_v8  ;;  %v6880_v60 = vsel %vm5925_vm2, %v19051_v9, 0.0 }
 0x2b0   :  { %6869 = vadd.xlane.f32.xlu0 %v6868_v22  ;;  %v6865_v22 = vsel %vm5921_vm3, %v19035_v30, 0.0  ;;  %21180 = vst [vmem:[#allocation43_spill] sm:$0xff] %v19055_v39  ;;  %v6874_v1 = vsel %vm5925_vm2, %v19055_v39, 0.0  ;;  %15577 = vpow2.f32 %v6577_v50 }
 0x2b1   :  { %6863 = vadd.xlane.f32.xlu1 %v6862_v33  ;;  %v19041_v3 = vpop.xlane.xlu0 %6170  ;;  %v6377_v33 = vsub.f32 %v21181_v45, %v18929_v12  ;;  %15579 = vpow2.f32 %v6573_v51 }
 0x2b2   :  { %v19045_v42 = vpop.xlane.xlu1 %6164  ;;  %v19067_v46 = vpop.eup %15565 }
 0x2b3   :  { %21183 = vst [vmem:[#allocation94_spill] sm:$0xff] %v19067_v46  ;;  %v19071_v55 = vpop.eup %15567  ;;  %v6575_v8 = vmul.f32 1.442695, %v6377_v33  ;;  %v6877_v39 = vsel %vm5921_vm3, %v19067_v46, 0.0 }
 0x2b4   :  { %6866 = vadd.xlane.f32.xlu0 %v6865_v22  ;;  %v6375_v22 = vsub.f32 %v21182_v43, %v18933_v15  ;;  %21184 = vst [vmem:[#allocation6_spill] sm:$0xff] %v19071_v55  ;;  %v21186_v43 = vld [vmem:[#allocation64_spill] sm:$0xff]  ;;  %v19083_v9 = vpop.eup %15569  ;;  %v6871_v50 = vsel %vm5921_vm3, %v19071_v55, 0.0 }
 0x2b5   :  { %6860 = vadd.xlane.f32.xlu1 %v6859_v61  ;;  %v19057_v35 = vpop.xlane.xlu0 %6185  ;;  %v6382_v61 = vsub.f32 %v21185_v49, %v18941_v7  ;;  %21187 = vst [vmem:[#allocation16_spill] sm:$0xff] %v19083_v9  ;;  %v19087_v33 = vpop.eup %15571  ;;  %15581 = vpow2.f32 %v6575_v8  ;;  %v6892_v55 = vsel %vm5925_vm2, %v19083_v9, 0.0 }
 0x2b6   :  { %v19061_v23 = vpop.xlane.xlu1 %6179  ;;  %v6571_v45 = vmul.f32 1.442695, %v6375_v22  ;;  %21188 = vst [vmem:[#allocation32_spill] sm:$0xff] %v19087_v33  ;;  %v21189_v22 = vld [vmem:[#allocation65_spill] sm:$0xff]  ;;  %v19099_v46 = vpop.eup %15573  ;;  %v6886_v8 = vsel %vm5925_vm2, %v19087_v33, 0.0 }
 0x2b7   :  { %v6585_v51 = vmul.f32 1.442695, %v6382_v61  ;;  %21191 = vst [vmem:[#allocation97_spill] sm:$0xff] %v19099_v46  ;;  %v6889_v33 = vsel %vm5921_vm3, %v19099_v46, 0.0 }
 0x2b8   :  { %6881 = vadd.xlane.f32.xlu0 %v6880_v60  ;;  %v6380_v60 = vsub.f32 %v21186_v43, %v18948_v17  ;;  %15583 = vpow2.f32 %v6571_v45  ;;  %v21190_v43 = vld [vmem:[#allocation66_spill] sm:$0xff] }
 0x2b9   :  { %6875 = vadd.xlane.f32.xlu1 %v6874_v1  ;;  %v19073_v12 = vpop.xlane.xlu0 %6182  ;;  %v6381_v1 = vsub.f32 %v21189_v22, %v18964_v18  ;;  %v19103_v61 = vpop.eup %15575  ;;  %15585 = vpow2.f32 %v6585_v51 }
 0x2ba   :  { %v19077_v15 = vpop.xlane.xlu1 %6176  ;;  %v6581_v49 = vmul.f32 1.442695, %v6380_v60  ;;  %21192 = vst [vmem:[#allocation96_spill] sm:$0xff] %v19103_v61  ;;  %v21193_v60 = vld [vmem:[#allocation67_spill] sm:$0xff]  ;;  %v19115_v9 = vpop.eup %15577  ;;  %v6883_v51 = vsel %vm5921_vm3, %v19103_v61, 0.0 }
 0x2bb   :  { %v6583_v45 = vmul.f32 1.442695, %v6381_v1  ;;  %21195 = vst [vmem:[#allocation7_spill] sm:$0xff] %v19115_v9  ;;  %v19119_v1 = vpop.eup %15579  ;;  %v6904_v61 = vsel %vm5925_vm2, %v19115_v9, 0.0 }
 0x2bc   :  { %6878 = vadd.xlane.f32.xlu0 %v6877_v39  ;;  %v6379_v39 = vsub.f32 %v21190_v43, %v18969_v0  ;;  %15587 = vpow2.f32 %v6581_v49  ;;  %v21194_v43 = vld [vmem:[#allocation69_spill] sm:$0xff]  ;;  %21196 = vst [vmem:[#allocation9_spill] sm:$0xff] %v19119_v1 }
 0x2bd   :  { %6872 = vadd.xlane.f32.xlu1 %v6871_v50  ;;  %v19089_v7 = vpop.xlane.xlu0 %6197  ;;  %v6386_v50 = vsub.f32 %v21193_v60, %v18993_v32  ;;  %15589 = vpow2.f32 %v6583_v45  ;;  %v6898_v45 = vsel %vm5925_vm2, %v19119_v1, 0.0 }
 0x2be   :  { %v19093_v17 = vpop.xlane.xlu1 %6191  ;;  %v6579_v22 = vmul.f32 1.442695, %v6379_v39  ;;  %v21197_v39 = vld [vmem:[#allocation73_spill] sm:$0xff] }
 0x2bf   :  { %v6593_v49 = vmul.f32 1.442695, %v6386_v50  ;;  %v19131_v46 = vpop.eup %15581 }
 0x2c0   :  { %6893 = vadd.xlane.f32.xlu0 %v6892_v55  ;;  %v6384_v55 = vsub.f32 %v21194_v43, %v18997_v27  ;;  %15591 = vpow2.f32 %v6579_v22  ;;  %v21198_v43 = vld [vmem:[#allocation74_spill] sm:$0xff]  ;;  %21199 = vst [vmem:[#allocation49_spill] sm:$0xff] %v19131_v46  ;;  %v6901_v1 = vsel %vm5921_vm3, %v19131_v46, 0.0 }
 0x2c1   :  { %6887 = vadd.xlane.f32.xlu1 %v6886_v8  ;;  %v19105_v18 = vpop.xlane.xlu0 %6194  ;;  %v6385_v8 = vsub.f32 %v21197_v39, %v19009_v38  ;;  %15593 = vpow2.f32 %v6593_v49 }
 0x2c2   :  { %v19109_v0 = vpop.xlane.xlu1 %6188  ;;  %v6589_v60 = vmul.f32 1.442695, %v6384_v55  ;;  %v19135_v50 = vpop.eup %15583  ;;  %v21201_v55 = vld [vmem:[#allocation76_spill] sm:$0xff] }
 0x2c3   :  { %21200 = vst [vmem:[#allocation27_spill] sm:$0xff] %v19135_v50  ;;  %v6591_v22 = vmul.f32 1.442695, %v6385_v8  ;;  %v19147_v9 = vpop.eup %15585  ;;  %v6895_v49 = vsel %vm5921_vm3, %v19135_v50, 0.0 }
 0x2c4   :  { %6890 = vadd.xlane.f32.xlu0 %v6889_v33  ;;  %v6383_v33 = vsub.f32 %v21198_v43, %v19013_v57  ;;  %15595 = vpow2.f32 %v6589_v60  ;;  %v21202_v43 = vld [vmem:[#allocation77_spill] sm:$0xff]  ;;  %21203 = vst [vmem:[#allocation50_spill] sm:$0xff] %v19147_v9  ;;  %v6916_v50 = vsel %vm5925_vm2, %v19147_v9, 0.0 }
 0x2c5   :  { %6884 = vadd.xlane.f32.xlu1 %v6883_v51  ;;  %v19121_v32 = vpop.xlane.xlu0 %6209  ;;  %v6390_v51 = vsub.f32 %v21201_v55, %v19025_v59  ;;  %15597 = vpow2.f32 %v6591_v22 }
 0x2c6   :  { %v19125_v27 = vpop.xlane.xlu1 %6203  ;;  %v6587_v39 = vmul.f32 1.442695, %v6383_v33  ;;  %v19151_v8 = vpop.eup %15587  ;;  %v21205_v33 = vld [vmem:[#allocation81_spill] sm:$0xff] }
 0x2c7   :  { %21204 = vst [vmem:[#allocation11_spill] sm:$0xff] %v19151_v8  ;;  %v6601_v60 = vmul.f32 1.442695, %v6390_v51  ;;  %v19163_v46 = vpop.eup %15589  ;;  %v6910_v22 = vsel %vm5925_vm2, %v19151_v8, 0.0 }
 0x2c8   :  { %6905 = vadd.xlane.f32.xlu0 %v6904_v61  ;;  %v6388_v61 = vsub.f32 %v21202_v43, %v19029_v44  ;;  %15599 = vpow2.f32 %v6587_v39  ;;  %v21206_v43 = vld [vmem:[#allocation82_spill] sm:$0xff]  ;;  %21207 = vst [vmem:[#allocation17_spill] sm:$0xff] %v19163_v46  ;;  %v6913_v8 = vsel %vm5921_vm3, %v19163_v46, 0.0 }
 0x2c9   :  { %6899 = vadd.xlane.f32.xlu1 %v6898_v45  ;;  %v19137_v38 = vpop.xlane.xlu0 %6206  ;;  %v6389_v45 = vsub.f32 %v21205_v33, %v19041_v3  ;;  %15601 = vpow2.f32 %v6601_v60 }
 0x2ca   :  { %v19141_v57 = vpop.xlane.xlu1 %6200  ;;  %v6597_v55 = vmul.f32 1.442695, %v6388_v61  ;;  %v19167_v51 = vpop.eup %15591  ;;  %v21209_v61 = vld [vmem:[#allocation83_spill] sm:$0xff] }
 0x2cb   :  { %21208 = vst [vmem:[#allocation48_spill] sm:$0xff] %v19167_v51  ;;  %v6599_v39 = vmul.f32 1.442695, %v6389_v45  ;;  %v19179_v9 = vpop.eup %15593  ;;  %v6907_v60 = vsel %vm5921_vm3, %v19167_v51, 0.0 }
 0x2cc   :  { %6902 = vadd.xlane.f32.xlu0 %v6901_v1  ;;  %v6387_v1 = vsub.f32 %v21206_v43, %v19045_v42  ;;  %15603 = vpow2.f32 %v6597_v55  ;;  %v21210_v43 = vld [vmem:[#allocation84_spill] sm:$0xff]  ;;  %21211 = vst [vmem:[#allocation35_spill] sm:$0xff] %v19179_v9  ;;  %v6928_v51 = vsel %vm5925_vm2, %v19179_v9, 0.0 }
 0x2cd   :  { %6896 = vadd.xlane.f32.xlu1 %v6895_v49  ;;  %v19153_v59 = vpop.xlane.xlu0 %6221  ;;  %v6394_v49 = vsub.f32 %v21209_v61, %v19057_v35  ;;  %15605 = vpow2.f32 %v6599_v39 }
 0x2ce   :  { %v19157_v44 = vpop.xlane.xlu1 %6215  ;;  %v6595_v33 = vmul.f32 1.442695, %v6387_v1  ;;  %v19183_v45 = vpop.eup %15595  ;;  %v21213_v1 = vld [vmem:[#allocation89_spill] sm:$0xff] }
 0x2cf   :  { %21212 = vst [vmem:[#allocation36_spill] sm:$0xff] %v19183_v45  ;;  %v6609_v55 = vmul.f32 1.442695, %v6394_v49  ;;  %v19195_v46 = vpop.eup %15597  ;;  %v6922_v39 = vsel %vm5925_vm2, %v19183_v45, 0.0 }
 0x2d0   :  { %6917 = vadd.xlane.f32.xlu0 %v6916_v50  ;;  %v6392_v50 = vsub.f32 %v21210_v43, %v19061_v23  ;;  %15607 = vpow2.f32 %v6595_v33  ;;  %v21214_v43 = vld [vmem:[#allocation90_spill] sm:$0xff] }
 0x2d1   :  { %6911 = vadd.xlane.f32.xlu1 %v6910_v22  ;;  %v19169_v3 = vpop.xlane.xlu0 %6218  ;;  %v6393_v22 = vsub.f32 %v21213_v1, %v19073_v12  ;;  %15609 = vpow2.f32 %v6609_v55 }
 0x2d2   :  { %v19173_v42 = vpop.xlane.xlu1 %6212  ;;  %v6605_v61 = vmul.f32 1.442695, %v6392_v50  ;;  %v19199_v49 = vpop.eup %15599  ;;  %v21216_v50 = vld [vmem:[#allocation91_spill] sm:$0xff] }
 0x2d3   :  { %21215 = vst [vmem:[#allocation34_spill] sm:$0xff] %v19199_v49  ;;  %v6607_v33 = vmul.f32 1.442695, %v6393_v22  ;;  %v19211_v45 = vpop.eup %15601  ;;  %v6919_v55 = vsel %vm5921_vm3, %v19199_v49, 0.0 }
 0x2d4   :  { %6914 = vadd.xlane.f32.xlu0 %v6913_v8  ;;  %v6391_v8 = vsub.f32 %v21214_v43, %v19077_v15  ;;  %15611 = vpow2.f32 %v6605_v61  ;;  %v6925_v43 = vsel %vm5921_vm3, %v19195_v46, 0.0  ;;  %21217 = vst [vmem:[#allocation10_spill] sm:$0xff] %v19211_v45 }
 0x2d5   :  { %6908 = vadd.xlane.f32.xlu1 %v6907_v60  ;;  %v19185_v35 = vpop.xlane.xlu0 %6233  ;;  %v6398_v60 = vsub.f32 %v21216_v50, %v19089_v7  ;;  %15613 = vpow2.f32 %v6607_v33 }
 0x2d6   :  { %v19189_v23 = vpop.xlane.xlu1 %6227  ;;  %v6603_v1 = vmul.f32 1.442695, %v6391_v8  ;;  %v19215_v22 = vpop.eup %15603  ;;  %v6397_v8 = vsub.f32 %v18302_v25, %v19105_v18 }
 0x2d7   :  { %21218 = vst [vmem:[#allocation37_spill] sm:$0xff] %v19215_v22  ;;  %v6617_v61 = vmul.f32 1.442695, %v6398_v60  ;;  %v19227_v49 = vpop.eup %15605  ;;  %v6934_v33 = vsel %vm5925_vm2, %v19215_v22, 0.0 }
 0x2d8   :  { %6929 = vadd.xlane.f32.xlu0 %v6928_v51  ;;  %v6396_v51 = vsub.f32 %v18263_v62, %v19093_v17  ;;  %15615 = vpow2.f32 %v6603_v1  ;;  %21220 = vst [vmem:[#allocation38_spill] sm:$0xff] %v19227_v49  ;;  %v6615_v18 = vmul.f32 1.442695, %v6397_v8  ;;  %v21222_v1 = vld [vmem:[#allocation101_spill] sm:$0xff]  ;;  %v6937_v22 = vsel %vm5921_vm3, %v19227_v49, 0.0  ;;  %v21225_v8 = vld [vmem:[#allocation104_spill] sm:$0xff] }
 0x2d9   :  { %6923 = vadd.xlane.f32.xlu1 %v6922_v39  ;;  %v19201_v12 = vpop.xlane.xlu0 %6230  ;;  %v21219_v39 = vld [vmem:[#allocation99_spill] sm:$0xff]  ;;  %15617 = vpow2.f32 %v6617_v61 }
 0x2da   :  { %v19205_v15 = vpop.xlane.xlu1 %6224  ;;  %v6613_v17 = vmul.f32 1.442695, %v6396_v51  ;;  %v6395_v50 = vsub.f32 %v21219_v39, %v19109_v0  ;;  %v19231_v60 = vpop.eup %15607  ;;  %v6402_v51 = vsub.f32 %v21222_v1, %v19121_v32  ;;  %v21223_v39 = vld [vmem:[#allocation102_spill] sm:$0xff]  ;;  %v21226_v1 = vld [vmem:[#allocation105_spill] sm:$0xff] }
 0x2db   :  { %21221 = vst [vmem:[#allocation39_spill] sm:$0xff] %v19231_v60  ;;  %v6931_v61 = vsel %vm5921_vm3, %v19231_v60, 0.0 }
 0x2dc   :  { %6926 = vadd.xlane.f32.xlu0 %v6925_v43  ;;  %v6940_v43 = vsel %vm5925_vm2, %v19211_v45, 0.0  ;;  %15619 = vpow2.f32 %v6613_v17  ;;  %v19243_v45 = vpop.eup %15609  ;;  %v6399_v17 = vsub.f32 %v21225_v8, %v19141_v57 }
 0x2dd   :  { %6920 = vadd.xlane.f32.xlu1 %v6919_v55  ;;  %v19217_v7 = vpop.xlane.xlu0 %6245  ;;  %v6611_v55 = vmul.f32 1.442695, %v6395_v50  ;;  %15621 = vpow2.f32 %v6615_v18 }
 0x2de   :  { %v19221_v62 = vpop.xlane.xlu1 %6239  ;;  %v19249_v32 = vpop.eup %15611 }
 0x2df   :  { %15623 = vpow2.f32 %v6611_v55  ;;  %v19263_v60 = vpop.eup %15613  ;;  %v6946_v18 = vsel %vm5925_vm2, %v19249_v32, 0.0 }
 0x2e0   :  { %6941 = vadd.xlane.f32.xlu0 %v6940_v43  ;;  %v6400_v43 = vsub.f32 %v21223_v39, %v19125_v27  ;;  %v6625_v27 = vmul.f32 1.442695, %v6402_v51  ;;  %v6406_v39 = vsub.f32 %v21226_v1, %v19153_v59  ;;  %v6619_v59 = vmul.f32 1.442695, %v6399_v17 }
 0x2e1   :  { %6935 = vadd.xlane.f32.xlu1 %v6934_v33  ;;  %v19233_v25 = vpop.xlane.xlu0 %6242  ;;  %v21224_v33 = vld [vmem:[#allocation103_spill] sm:$0xff]  ;;  %v6405_v1 = vsub.f32 %v18402_v54, %v19169_v3 }
 0x2e2   :  { %v19237_v0 = vpop.xlane.xlu1 %6236  ;;  %v6401_v9 = vsub.f32 %v21224_v33, %v19137_v38  ;;  %v6621_v38 = vmul.f32 1.442695, %v6400_v43  ;;  %v6952_v33 = vsel %vm5925_vm2, %v19243_v45, 0.0  ;;  %v19267_v51 = vpop.eup %15615  ;;  %15625 = vpow2.f32 %v6625_v27 }
 0x2e3   :  { %v6633_v55 = vmul.f32 1.442695, %v6406_v39  ;;  %v6943_v8 = vsel %vm5921_vm3, %v19267_v51, 0.0  ;;  %v6631_v3 = vmul.f32 1.442695, %v6405_v1 }
 0x2e4   :  { %6938 = vadd.xlane.f32.xlu0 %v6937_v22  ;;  %v6404_v22 = vsub.f32 %v18371_v28, %v19157_v44  ;;  %v6623_v57 = vmul.f32 1.442695, %v6401_v9  ;;  %15627 = vpow2.f32 %v6621_v38  ;;  %v6949_v44 = vsel %vm5921_vm3, %v19263_v60, 0.0  ;;  %v19275_v9 = vpop.eup %15617 }
 0x2e5   :  { %6932 = vadd.xlane.f32.xlu1 %v6931_v61  ;;  %v19253_v50 = vpop.xlane.xlu0 %6257  ;;  %v6403_v38 = vsub.f32 %v18409_v10, %v19173_v42 }
 0x2e6   :  { %v19257_v49 = vpop.xlane.xlu1 %6251  ;;  %v6629_v28 = vmul.f32 1.442695, %v6404_v22  ;;  %15629 = vpow2.f32 %v6623_v57  ;;  %v19279_v17 = vpop.eup %15619  ;;  %v6964_v22 = vsel %vm5925_vm2, %v19275_v9, 0.0 }
 0x2e7   :  { %15631 = vpow2.f32 %v6619_v59  ;;  %v6958_v57 = vsel %vm5925_vm2, %v19279_v17, 0.0  ;;  %v6410_v59 = vsub.f32 %v18417_v29, %v19185_v35  ;;  %v6627_v42 = vmul.f32 1.442695, %v6403_v38 }
 0x2e8   :  { %6953 = vadd.xlane.f32.xlu0 %v6952_v33  ;;  %15633 = vpow2.f32 %v6633_v55  ;;  %v19287_v33 = vpop.eup %15621  ;;  %v6408_v55 = vsub.f32 %v18421_v41, %v19189_v23  ;;  %v6407_v35 = vsub.f32 %v18459_v48, %v19205_v15 }
 0x2e9   :  { %6947 = vadd.xlane.f32.xlu1 %v6946_v18  ;;  %v19269_v61 = vpop.xlane.xlu0 %6254  ;;  %15635 = vpow2.f32 %v6629_v28  ;;  %v19291_v18 = vpop.eup %15623  ;;  %v6961_v28 = vsel %vm5921_vm3, %v19287_v33, 0.0  ;;  %v6641_v1 = vmul.f32 1.442695, %v6410_v59 }
 0x2ea   :  { %v19271_v43 = vpop.xlane.xlu1 %6248  ;;  %v6637_v38 = vmul.f32 1.442695, %v6408_v55 }
 0x2ec   :  { %6950 = vadd.xlane.f32.xlu0 %v6949_v44  ;;  %v19299_v44 = vpop.eup %15625 }
 0x2ed   :  { %6944 = vadd.xlane.f32.xlu1 %v6943_v8  ;;  %v6798_v27 = vpop.xlane.xlu0 %6797  ;;  %21227 = vst [vmem:[#allocation40_spill] sm:$0xff] %v19299_v44  ;;  %v6409_v8 = vsub.f32 %v18456_v52, %v19201_v12  ;;  %v6976_v48 = vsel %vm5925_vm2, %v19299_v44, 0.0 }
 0x2ee   :  { %v6792_v39 = vpop.xlane.xlu1 %6791  ;;  %15637 = vrcp.f32 %v6798_v27  ;;  %v6955_v27 = vsel %vm5921_vm3, %v19291_v18, 0.0  ;;  %v19305_v29 = vpop.eup %15627 }
 0x2ef   :  { %15639 = vrcp.f32 %v6792_v39  ;;  %21228 = vst [vmem:[#allocation57_spill] sm:$0xff] %v19305_v29  ;;  %v6414_v39 = vsub.f32 %v18470_v53, %v19217_v7  ;;  %v6635_v7 = vmul.f32 1.442695, %v6407_v35 }
 0x2f0   :  { %6965 = vadd.xlane.f32.xlu0 %v6964_v22  ;;  %v19311_v23 = vpop.eup %15629  ;;  %v21231_v22 = vld [vmem:[#allocation108_spill] sm:$0xff] }
 0x2f1   :  { %6959 = vadd.xlane.f32.xlu1 %v6958_v57  ;;  %v6795_v54 = vpop.xlane.xlu0 %6794  ;;  %21229 = vst [vmem:[#allocation41_spill] sm:$0xff] %v19311_v23  ;;  %v19317_v12 = vpop.eup %15631  ;;  %v6412_v57 = vsub.f32 %v21231_v22, %v19221_v62 }
 0x2f2   :  { %15641 = vrcp.f32 %v6795_v54  ;;  %v6789_v10 = vpop.xlane.xlu1 %6788  ;;  %21230 = vst [vmem:[#allocation58_spill] sm:$0xff] %v19317_v12  ;;  %v19323_v15 = vpop.eup %15633  ;;  %v6639_v54 = vmul.f32 1.442695, %v6409_v8  ;;  %v6973_v8 = vsel %vm5921_vm3, %v19311_v23, 0.0  ;;  %v6967_v35 = vsel %vm5921_vm3, %v19317_v12, 0.0 }
 0x2f3   :  { %15643 = vrcp.f32 %v6789_v10  ;;  %v19327_v53 = vpop.eup %15635 }
 0x2f4   :  { %6962 = vadd.xlane.f32.xlu0 %v6961_v28  ;;  %15645 = vpow2.f32 %v6631_v3  ;;  %v6970_v3 = vsel %vm5925_vm2, %v19305_v29, 0.0  ;;  %v6645_v28 = vmul.f32 1.442695, %v6412_v57  ;;  %v21234_v29 = vld [vmem:[#allocation29_spill] sm:$0xff] }
 0x2f5   :  { %6956 = vadd.xlane.f32.xlu1 %v6955_v27  ;;  %v19309_v41 = vpop.xlane.xlu0 %6269  ;;  %15647 = vpow2.f32 %v6627_v42  ;;  %v6649_v42 = vmul.f32 1.442695, %v6414_v39 }
 0x2f6   :  { %v19315_v52 = vpop.xlane.xlu1 %6263  ;;  %15649 = vpow2.f32 %v6641_v1  ;;  %v21232_v1 = vld [vmem:[#allocation75_spill] sm:$0xff] }
 0x2f7   :  { %15651 = vpow2.f32 %v6637_v38 }
 0x2f8   :  { %6977 = vadd.xlane.f32.xlu0 %v6976_v48  ;;  %v15638_v10 = vpop.eup %15637  ;;  %15653 = vpow2.f32 %v6639_v54  ;;  %v21235_v54 = vld [vmem:[#allocation68_spill] sm:$0xff] }
 0x2f9   :  { %6971 = vadd.xlane.f32.xlu1 %v6970_v3  ;;  %v19329_v59 = vpop.xlane.xlu0 %6266  ;;  %v15640_v55 = vpop.eup %15639  ;;  %15655 = vpow2.f32 %v6635_v7  ;;  %v21233_v3 = vld [vmem:[#allocation70_spill] sm:$0xff]  ;;  %v6988_v7 = vsel %vm5925_vm2, %v19323_v15, 0.0 }
 0x2fa   :  { %v19331_v62 = vpop.xlane.xlu1 %6260  ;;  %15657 = vpow2.f32 %v6649_v42  ;;  %v6413_v38 = vsub.f32 %v21233_v3, %v19233_v25  ;;  %v6982_v25 = vsel %vm5925_vm2, %v19327_v53, 0.0 }
 0x2fb   :  { %15659 = vpow2.f32 %v6645_v28 }
 0x2fc   :  { %v15642_v27 = vpop.eup %15641  ;;  %6974 = vadd.xlane.f32.xlu0 %v6973_v8  ;;  %v6411_v8 = vsub.f32 %v21235_v54, %v19237_v0 }
 0x2fd   :  { %v15644_v22 = vpop.eup %15643  ;;  %6968 = vadd.xlane.f32.xlu1 %v6967_v35  ;;  %v6810_v48 = vpop.xlane.xlu0 %6809  ;;  %v7144_v39 = vmul.f32 %v15642_v27, %v21232_v1  ;;  %v21236_v35 = vld [vmem:[#allocation24_spill] sm:$0xff]  ;;  %v6647_v27 = vmul.f32 1.442695, %v6413_v38 }
 0x2fe   :  { %v6804_v57 = vpop.xlane.xlu1 %6803  ;;  %v7140_v44 = vmul.f32 %v15644_v22, %v21234_v29  ;;  %v7146_v12 = vmul.f32 %v15638_v10, %v21236_v35  ;;  %v19347_v23 = vpop.eup %15645  ;;  %15661 = vrcp.f32 %v6810_v48  ;;  %v21237_v29 = vld [vmem:[#allocation25_spill] sm:$0xff]  ;;  %v21239_v48 = vld [vmem:[#allocation8_spill] sm:$0xff] }
 0x2ff   :  { %14276 = vmatprep.mubr.msk.f32.mxu1 %vm5921_vm3, %v7144_v39  ;;  %v7142_v42 = vmul.f32 %v15640_v55, %v21237_v29  ;;  %v19353_v28 = vpop.eup %15647  ;;  %15663 = vrcp.f32 %v6804_v57  ;;  %v21238_v10 = vld [vmem:[#allocation5_spill] sm:$0xff]  ;;  %v6643_v55 = vmul.f32 1.442695, %v6411_v8  ;;  %v6416_v1 = vsub.f32 %v21239_v48, %v19257_v49  ;;  %v21242_v49 = vld [vmem:[#allocation100_spill] sm:$0xff]  ;;  %v21244_v57 = vld [vmem:[#allocation71_spill] sm:$0xff] }
 0x300   :  { %14269 = vmatprep.mubr.msk.f32.mxu0 %vm5921_vm3, %v7140_v44  ;;  %6989 = vadd.xlane.f32.xlu0 %v6988_v7  ;;  %v6418_v22 = vsub.f32 %v21238_v10, %v19253_v50  ;;  %v21240_v50 = vld [vmem:[#allocation98_spill] sm:$0xff]  ;;  %v19372_v39 = vpop.eup %15649  ;;  %v21248_v10 = vld [vmem:[#allocation79_spill] sm:$0xff] }
 0x301   :  { %14277 = vmatmul.mubr.msk.f32.vlgmr.msra.gmra.mrb[80].mxu1 %vm5921_vm3, %v7146_v12  ;;  %6983 = vadd.xlane.f32.xlu1 %v6982_v25  ;;  %v6807_v0 = vpop.xlane.xlu0 %6806  ;;  %v6985_v12 = vsel %vm5921_vm3, %v19347_v23, 0.0  ;;  %21241 = vst [vmem:[#allocation42_spill] sm:$0xff] %v19372_v39  ;;  %v19379_v38 = vpop.eup %15651  ;;  %v21246_v25 = vld [vmem:[#allocation72_spill] sm:$0xff] }
 0x302   :  { %14270 = vmatmul.mubr.msk.f32.vlgmr.msra.gmra.mrb[80].mxu0 %vm5921_vm3, %v7142_v42  ;;  %15665 = vrcp.f32 %v6807_v0  ;;  %v6801_v44 = vpop.xlane.xlu1 %6800  ;;  %15104 = vmatpush3.bf16.msk.msra.mxu1 %vm17760_vm6, %v17836_v26  ;;  %v6979_v26 = vsel %vm5921_vm3, %v19353_v28, 0.0  ;;  %21243 = vst [vmem:[#allocation55_spill] sm:$0xff] %v19379_v38  ;;  %v19387_v7 = vpop.eup %15653  ;;  %v6657_v35 = vmul.f32 1.442695, %v6418_v22  ;;  %v6415_v29 = vsub.f32 %v21246_v25, %v19271_v43 }
 0x303   :  { %15667 = vrcp.f32 %v6801_v44  ;;  %15098 = vmatpush3.bf16.msk.msra.mxu0 %vm17760_vm6, %v17826_v20  ;;  %15113 = vmatprep.subr.msk.bf16.mxu1 %vm17760_vm6, %v21240_v50  ;;  %v6417_v20 = vsub.f32 %v21244_v57, %v19269_v61  ;;  %21245 = vst [vmem:[#allocation56_spill] sm:$0xff] %v19387_v7  ;;  %v19401_v0 = vpop.eup %15655  ;;  %v6422_v43 = vsub.f32 %v21248_v10, %v19309_v41  ;;  %v7000_v44 = vsel %vm5925_vm2, %v19372_v39, 0.0 }
 0x304   :  { %v14166_v3 = vpop.f32.mrb[64].mxu1  ;;  %6986 = vadd.xlane.f32.xlu0 %v6985_v12  ;;  %15107 = vmatprep.subr.msk.bf16.mxu0 %vm17760_vm6, %v21242_v49  ;;  %15669 = vpow2.f32 %v6647_v27  ;;  %21247 = vst [vmem:[#allocation44_spill] sm:$0xff] %v19401_v0  ;;  %v6653_v27 = vmul.f32 1.442695, %v6416_v1  ;;  %v19413_v48 = vpop.eup %15657  ;;  %v21249_v12 = vld [vmem:[#allocation78_spill] sm:$0xff] }
 0x305   :  { %v14159_v54 = vpop.f32.mrb[64].mxu0  ;;  %12616 = vst.msk [vmem:[%s20615_s9 + $0x18] sm:$0xf] %vm12613_vm7, %v14166_v3  ;;  %v7491_v8 = vpop.f32.mrb[65].mxu1  ;;  %6980 = vadd.xlane.f32.xlu1 %v6979_v26  ;;  %15671 = vpow2.f32 %v6643_v55  ;;  %v6420_v3 = vsub.f32 %v21249_v12, %v19315_v52  ;;  %v6994_v55 = vsel %vm5925_vm2, %v19379_v38, 0.0  ;;  %v6997_v52 = vsel %vm5921_vm3, %v19387_v7, 0.0 }
 0x306   :  { %12614 = vst.msk [vmem:[%s20615_s9 + $0x8] sm:$0xf] %vm12613_vm7, %v14159_v54  ;;  %v7407_v61 = vpop.f32.mrb[65].mxu0  ;;  %v19399_v42 = vpop.xlane.xlu0 %6281  ;;  %v6655_v1 = vmul.f32 1.442695, %v6417_v20  ;;  %15673 = vpow2.f32 %v6657_v35  ;;  %v6991_v20 = vsel %vm5921_vm3, %v19401_v0, 0.0 }
 0x307   :  { %12615 = vst.msk [vmem:[%s20615_s9 + $0x10] sm:$0xff] %vm384_vm0, %v7491_v8  ;;  %12612 = vst.msk [vmem:[%s20615_s9] sm:$0xff] %vm384_vm0, %v7407_v61  ;;  %v19409_v22 = vpop.xlane.xlu1 %6275  ;;  %v19419_v41 = vpop.eup %15659  ;;  %v6651_v57 = vmul.f32 1.442695, %v6415_v29  ;;  %15675 = vpow2.f32 %v6653_v27  ;;  %v6665_v25 = vmul.f32 1.442695, %v6422_v43 }
 0x308   :  { %7001 = vadd.xlane.f32.xlu0 %v7000_v44  ;;  %v15662_v26 = vpop.eup %15661  ;;  %v6661_v44 = vmul.f32 1.442695, %v6420_v3  ;;  %15677 = vpow2.f32 %v6655_v1  ;;  %v21250_v35 = vld [vmem:[#allocation21_spill] sm:$0xff]  ;;  %v21251_v27 = vld [vmem:[#allocation18_spill] sm:$0xff]  ;;  %v7012_v3 = vsel %vm5925_vm2, %v19413_v48, 0.0 }
 0x309   :  { %6995 = vadd.xlane.f32.xlu1 %v6994_v55  ;;  %v15664_v8 = vpop.eup %15663  ;;  %15679 = vpow2.f32 %v6651_v57  ;;  %v6421_v43 = vsub.f32 %v21251_v27, %v19329_v59  ;;  %v21252_v38 = vld [vmem:[#allocation86_spill] sm:$0xff]  ;;  %v21254_v57 = vld [vmem:[#allocation28_spill] sm:$0xff]  ;;  %v7006_v59 = vsel %vm5925_vm2, %v19419_v41, 0.0 }
 0x30a   :  { %v19421_v54 = vpop.xlane.xlu0 %6278  ;;  %15681 = vpow2.f32 %v6665_v25 }
 0x30b   :  { %v19423_v61 = vpop.xlane.xlu1 %6272  ;;  %15683 = vpow2.f32 %v6661_v44  ;;  %v21256_v44 = vld [vmem:[#allocation92_spill] sm:$0xff] }
 0x30c   :  { %v15666_v10 = vpop.eup %15665  ;;  %6998 = vadd.xlane.f32.xlu0 %v6997_v52  ;;  %v21253_v52 = vld [vmem:[#allocation12_spill] sm:$0xff] }
 0x30d   :  { %v15668_v12 = vpop.eup %15667  ;;  %6992 = vadd.xlane.f32.xlu1 %v6991_v20  ;;  %v7152_v29 = vmul.f32 %v15666_v10, %v21250_v35  ;;  %v7154_v0 = vmul.f32 %v15662_v26, %v21253_v52  ;;  %v6419_v10 = vsub.f32 %v21254_v57, %v19331_v62  ;;  %v6663_v26 = vmul.f32 1.442695, %v6421_v43  ;;  %v21258_v35 = vld [vmem:[#allocation2_spill] sm:$0xff]  ;;  %v21259_v43 = vld [vmem:[#allocation107_spill] sm:$0xff] }
 0x30e   :  { %v6822_v55 = vpop.xlane.xlu0 %6821  ;;  %v7148_v39 = vmul.f32 %v15668_v12, %v21252_v38  ;;  %v19437_v1 = vpop.eup %15669  ;;  %v21255_v38 = vld [vmem:[#allocation80_spill] sm:$0xff]  ;;  %v6426_v12 = vsub.f32 %v21256_v44, %v19399_v42 }
 0x30f   :  { %v6816_v7 = vpop.xlane.xlu1 %6815  ;;  %14290 = vmatprep.mubr.msk.f32.mxu1 %vm5921_vm3, %v7152_v29  ;;  %v7150_v25 = vmul.f32 %v15664_v8, %v21255_v38  ;;  %v19445_v20 = vpop.eup %15671  ;;  %15685 = vrcp.f32 %v6822_v55  ;;  %v7009_v8 = vsel %vm5921_vm3, %v19437_v1, 0.0  ;;  %v6659_v42 = vmul.f32 1.442695, %v6419_v10  ;;  %v21261_v55 = vld [vmem:[#allocation31_spill] sm:$0xff]  ;;  %v21262_v10 = vld [vmem:[#allocation93_spill] sm:$0xff] }
 0x310   :  { %14283 = vmatprep.mubr.msk.f32.mxu0 %vm5921_vm3, %v7148_v39  ;;  %7013 = vadd.xlane.f32.xlu0 %v7012_v3  ;;  %15687 = vrcp.f32 %v6816_v7  ;;  %v19462_v7 = vpop.eup %15673  ;;  %v6424_v29 = vsub.f32 %v21258_v35, %v19409_v22  ;;  %v7003_v27 = vsel %vm5921_vm3, %v19445_v20, 0.0  ;;  %v6425_v3 = vsub.f32 %v21261_v55, %v19421_v54 }
 0x311   :  { %14291 = vmatmul.mubr.msk.f32.vlgmr.msra.gmra.mrb[82].mxu1 %vm5921_vm3, %v7154_v0  ;;  %7007 = vadd.xlane.f32.xlu1 %v7006_v59  ;;  %v21257_v0 = vld [vmem:[#allocation106_spill] sm:$0xff]  ;;  %v6673_v57 = vmul.f32 1.442695, %v6426_v12  ;;  %v6423_v59 = vsub.f32 %v21262_v10, %v19423_v61  ;;  %v7024_v44 = vsel %vm5925_vm2, %v19462_v7, 0.0 }
 0x312   :  { %14284 = vmatmul.mubr.msk.f32.vlgmr.msra.gmra.mrb[82].mxu0 %vm5921_vm3, %v7150_v25  ;;  %v6819_v62 = vpop.xlane.xlu0 %6818  ;;  %15116 = vmatpush3.bf16.msk.msra.mxu1 %vm17760_vm6, %v21240_v50 }
 0x313   :  { %15689 = vrcp.f32 %v6819_v62  ;;  %v6813_v39 = vpop.xlane.xlu1 %6812  ;;  %15110 = vmatpush3.bf16.msk.msra.mxu0 %vm17760_vm6, %v21242_v49  ;;  %15125 = vmatprep.subr.msk.bf16.mxu1 %vm17760_vm6, %v21257_v0  ;;  %v19471_v49 = vpop.eup %15675  ;;  %v6669_v62 = vmul.f32 1.442695, %v6424_v29 }
 0x314   :  { %15691 = vrcp.f32 %v6813_v39  ;;  %v14180_v50 = vpop.f32.mrb[66].mxu1  ;;  %7010 = vadd.xlane.f32.xlu0 %v7009_v8  ;;  %15119 = vmatprep.subr.msk.bf16.mxu0 %vm17760_vm6, %v21259_v43  ;;  %21260 = vst [vmem:[#allocation45_spill] sm:$0xff] %v19471_v49  ;;  %v19489_v25 = vpop.eup %15677  ;;  %v7018_v8 = vsel %vm5925_vm2, %v19471_v49, 0.0 }
 0x315   :  { %v14173_v52 = vpop.f32.mrb[66].mxu0  ;;  %12620 = vst.msk [vmem:[%s20615_s9 + $0x38] sm:$0xf] %vm12613_vm7, %v14180_v50  ;;  %v7659_v22 = vpop.f32.mrb[67].mxu1  ;;  %7004 = vadd.xlane.f32.xlu1 %v7003_v27  ;;  %15693 = vpow2.f32 %v6663_v26  ;;  %v6671_v50 = vmul.f32 1.442695, %v6425_v3 }
 0x316   :  { %12618 = vst.msk [vmem:[%s20615_s9 + $0x28] sm:$0xf] %vm12613_vm7, %v14173_v52  ;;  %v7575_v54 = vpop.f32.mrb[67].mxu0  ;;  %v6294_v38 = vpop.xlane.xlu0 %6293  ;;  %15695 = vpow2.f32 %v6659_v42  ;;  %v7021_v42 = vsel %vm5921_vm3, %v19489_v25, 0.0 }
 0x317   :  { %12619 = vst.msk [vmem:[%s20615_s9 + $0x30] sm:$0xff] %vm384_vm0, %v7659_v22  ;;  %12617 = vst.msk [vmem:[%s20615_s9 + $0x20] sm:$0xff] %vm384_vm0, %v7575_v54  ;;  %v6430_v61 = vsub.f32 %v18803_v2, %v6294_v38  ;;  %v6288_v26 = vpop.xlane.xlu1 %6287  ;;  %v19498_v12 = vpop.eup %15679  ;;  %15697 = vpow2.f32 %v6673_v57  ;;  %v6667_v2 = vmul.f32 1.442695, %v6423_v59 }
 0x318   :  { %21263 = vst [vmem:[#allocation46_spill] sm:$0xff] %v19498_v12  ;;  %v6428_v39 = vsub.f32 %v18807_v11, %v6288_v26  ;;  %7025 = vadd.xlane.f32.xlu0 %v7024_v44  ;;  %v19503_v35 = vpop.eup %15681  ;;  %15699 = vpow2.f32 %v6669_v62  ;;  %v7015_v54 = vsel %vm5921_vm3, %v19498_v12, 0.0  ;;  %v21264_v26 = vld [vmem:[#allocation85_spill] sm:$0xff]  ;;  %v21265_v62 = vld [vmem:[#allocation88_spill] sm:$0xff] }
 0x319   :  { %7019 = vadd.xlane.f32.xlu1 %v7018_v8  ;;  %v19505_v27 = vpop.eup %15683  ;;  %v6681_v22 = vmul.f32 1.442695, %v6430_v61  ;;  %15701 = vpow2.f32 %v6671_v50  ;;  %v21266_v50 = vld [vmem:[#allocation20_spill] sm:$0xff] }
 0x31a   :  { %v6291_v55 = vpop.xlane.xlu0 %6290  ;;  %v15686_v52 = vpop.eup %15685  ;;  %v6677_v29 = vmul.f32 1.442695, %v6428_v39  ;;  %15703 = vpow2.f32 %v6667_v2  ;;  %v21267_v2 = vld [vmem:[#allocation87_spill] sm:$0xff] }
 0x31b   :  { %v6285_v10 = vpop.xlane.xlu1 %6284  ;;  %v15688_v11 = vpop.eup %15687  ;;  %v6429_v57 = vsub.f32 %v18840_v5, %v6291_v55  ;;  %v7162_v44 = vmul.f32 %v15686_v52, %v21264_v26  ;;  %15705 = vpow2.f32 %v6681_v22 }
 0x31c   :  { %7022 = vadd.xlane.f32.xlu0 %v7021_v42  ;;  %v7036_v42 = vsel %vm5925_vm2, %v19503_v35, 0.0  ;;  %15707 = vpow2.f32 %v6677_v29  ;;  %v6427_v12 = vsub.f32 %v21267_v2, %v6285_v10 }
 0x31d   :  { %v15690_v3 = vpop.eup %15689  ;;  %7016 = vadd.xlane.f32.xlu1 %v7015_v54  ;;  %v7158_v54 = vmul.f32 %v15688_v11, %v21266_v50  ;;  %v6679_v55 = vmul.f32 1.442695, %v6429_v57 }
 0x31e   :  { %v15692_v38 = vpop.eup %15691  ;;  %v6834_v59 = vpop.xlane.xlu0 %6833  ;;  %v7160_v61 = vmul.f32 %v15690_v3, %v18791_v47  ;;  %v7030_v47 = vsel %vm5925_vm2, %v19505_v27, 0.0  ;;  %v6675_v29 = vmul.f32 1.442695, %v6427_v12 }
 0x31f   :  { %v6828_v8 = vpop.xlane.xlu1 %6827  ;;  %v7156_v39 = vmul.f32 %v15692_v38, %v21265_v62  ;;  %v19517_v49 = vpop.eup %15693  ;;  %15709 = vrcp.f32 %v6834_v59  ;;  %v21268_v38 = vld [vmem:[#allocation23_spill] sm:$0xff]  ;;  %v21269_v59 = vld [vmem:[#allocation109_spill] sm:$0xff] }
 0x320   :  { %14304 = vmatprep.mubr.msk.f32.mxu1 %vm5921_vm3, %v7160_v61  ;;  %7037 = vadd.xlane.f32.xlu0 %v7036_v42  ;;  %v19526_v5 = vpop.eup %15695  ;;  %15711 = vrcp.f32 %v6828_v8  ;;  %v7033_v10 = vsel %vm5921_vm3, %v19517_v49, 0.0 }
 0x321   :  { %14297 = vmatprep.mubr.msk.f32.mxu0 %vm5921_vm3, %v7156_v39  ;;  %14305 = vmatmul.mubr.msk.f32.vlgmr.msra.gmra.mrb[84].mxu1 %vm5921_vm3, %v7162_v44  ;;  %v19537_v11 = vpop.eup %15697 }
 0x322   :  { %7031 = vadd.xlane.f32.xlu1 %v7030_v47  ;;  %14298 = vmatmul.mubr.msk.f32.vlgmr.msra.gmra.mrb[84].mxu0 %vm5921_vm3, %v7158_v54  ;;  %v6831_v52 = vpop.xlane.xlu0 %6830  ;;  %v19551_v12 = vpop.eup %15699  ;;  %v7048_v39 = vsel %vm5925_vm2, %v19537_v11, 0.0 }
 0x323   :  { %15713 = vrcp.f32 %v6831_v52  ;;  %v6825_v22 = vpop.xlane.xlu1 %6824  ;;  %15128 = vmatpush3.bf16.msk.msra.mxu1 %vm17760_vm6, %v21257_v0  ;;  %15122 = vmatpush3.bf16.msk.msra.mxu0 %vm17760_vm6, %v21259_v43  ;;  %v7027_v43 = vsel %vm5921_vm3, %v19526_v5, 0.0  ;;  %v19561_v44 = vpop.eup %15701  ;;  %v7042_v47 = vsel %vm5925_vm2, %v19551_v12, 0.0 }
 0x324   :  { %15715 = vrcp.f32 %v6825_v22  ;;  %v14194_v3 = vpop.f32.mrb[68].mxu1  ;;  %7034 = vadd.xlane.f32.xlu0 %v7033_v10  ;;  %15131 = vmatprep.subr.msk.bf16.mxu0 %vm17760_vm6, %v21268_v38  ;;  %v19570_v42 = vpop.eup %15703 }
 0x325   :  { %v14187_v57 = vpop.f32.mrb[68].mxu0  ;;  %12624 = vst.msk [vmem:[%s20615_s9 + $0x58] sm:$0xf] %vm12613_vm7, %v14194_v3  ;;  %v7827_v0 = vpop.f32.mrb[69].mxu1  ;;  %15137 = vmatprep.subr.msk.bf16.mxu1 %vm17760_vm6, %v21269_v59  ;;  %15717 = vpow2.f32 %v6679_v55 }
 0x326   :  { %12622 = vst.msk [vmem:[%s20615_s9 + $0x48] sm:$0xf] %vm12613_vm7, %v14187_v57  ;;  %v7743_v61 = vpop.f32.mrb[69].mxu0  ;;  %7028 = vadd.xlane.f32.xlu1 %v7027_v43  ;;  %v6306_v26 = vpop.xlane.xlu0 %6305  ;;  %15719 = vpow2.f32 %v6675_v29  ;;  %v7045_v29 = vsel %vm5921_vm3, %v19561_v44, 0.0 }
 0x327   :  { %12623 = vst.msk [vmem:[%s20615_s9 + $0x50] sm:$0xff] %vm384_vm0, %v7827_v0  ;;  %12621 = vst.msk [vmem:[%s20615_s9 + $0x40] sm:$0xff] %vm384_vm0, %v7743_v61  ;;  %v6434_v8 = vsub.f32 %v18882_v40, %v6306_v26  ;;  %v6300_v62 = vpop.xlane.xlu1 %6299  ;;  %v19573_v54 = vpop.eup %15705  ;;  %v7039_v61 = vsel %vm5921_vm3, %v19570_v42, 0.0 }
 0x328   :  { %v6432_v50 = vsub.f32 %v18879_v21, %v6300_v62  ;;  %7049 = vadd.xlane.f32.xlu0 %v7048_v39  ;;  %v19577_v55 = vpop.eup %15707 }
 0x329   :  { %v6689_v2 = vmul.f32 1.442695, %v6434_v8  ;;  %v15710_v22 = vpop.eup %15709 }
 0x32a   :  { %v6685_v52 = vmul.f32 1.442695, %v6432_v50  ;;  %7043 = vadd.xlane.f32.xlu1 %v7042_v47  ;;  %v6303_v40 = vpop.xlane.xlu0 %6302  ;;  %v15712_v21 = vpop.eup %15711  ;;  %v7170_v39 = vmul.f32 %v15710_v22, %v18842_v19  ;;  %v7054_v19 = vsel %vm5925_vm2, %v19577_v55, 0.0 }
 0x32b   :  { %v6433_v10 = vsub.f32 %v18920_v36, %v6303_v40  ;;  %v6297_v3 = vpop.xlane.xlu1 %6296  ;;  %15721 = vpow2.f32 %v6689_v2  ;;  %v7060_v2 = vsel %vm5925_vm2, %v19573_v54, 0.0  ;;  %v21270_v40 = vld [vmem:[#allocation3_spill] sm:$0xff] }
 0x32c   :  { %v6431_v57 = vsub.f32 %v18925_v6, %v6297_v3  ;;  %7046 = vadd.xlane.f32.xlu0 %v7045_v29  ;;  %15723 = vpow2.f32 %v6685_v52  ;;  %v21271_v29 = vld [vmem:[#allocation26_spill] sm:$0xff] }
 0x32d   :  { %v15714_v0 = vpop.eup %15713  ;;  %v6687_v43 = vmul.f32 1.442695, %v6433_v10  ;;  %v7166_v10 = vmul.f32 %v15712_v21, %v21270_v40 }
 0x32e   :  { %v15716_v26 = vpop.eup %15715  ;;  %v6683_v8 = vmul.f32 1.442695, %v6431_v57  ;;  %7040 = vadd.xlane.f32.xlu1 %v7039_v61  ;;  %v6846_v62 = vpop.xlane.xlu0 %6845  ;;  %v7168_v36 = vmul.f32 %v15714_v0, %v18869_v24  ;;  %v21272_v0 = vld [vmem:[#allocation13_spill] sm:$0xff] }
 0x32f   :  { %15725 = vpow2.f32 %v6687_v43  ;;  %v6840_v50 = vpop.xlane.xlu1 %6839  ;;  %v7164_v6 = vmul.f32 %v15716_v26, %v18875_v37  ;;  %v19590_v47 = vpop.eup %15717 }
 0x330   :  { %15727 = vpow2.f32 %v6683_v8  ;;  %14318 = vmatprep.mubr.msk.f32.mxu1 %vm5921_vm3, %v7168_v36  ;;  %7061 = vadd.xlane.f32.xlu0 %v7060_v2  ;;  %v19598_v24 = vpop.eup %15719  ;;  %v7057_v22 = vsel %vm5921_vm3, %v19590_v47, 0.0 }
 0x331   :  { %15729 = vrcp.f32 %v6846_v62  ;;  %14311 = vmatprep.mubr.msk.f32.mxu0 %vm5921_vm3, %v7164_v6  ;;  %14319 = vmatmul.mubr.msk.f32.vlgmr.msra.gmra.mrb[86].mxu1 %vm5921_vm3, %v7170_v39 }
 0x332   :  { %15731 = vrcp.f32 %v6840_v50  ;;  %7055 = vadd.xlane.f32.xlu1 %v7054_v19  ;;  %14312 = vmatmul.mubr.msk.f32.vlgmr.msra.gmra.mrb[86].mxu0 %vm5921_vm3, %v7166_v10  ;;  %v6843_v37 = vpop.xlane.xlu0 %6842 }
 0x333   :  { %15733 = vrcp.f32 %v6843_v37  ;;  %v6837_v52 = vpop.xlane.xlu1 %6836  ;;  %15140 = vmatpush3.bf16.msk.msra.mxu1 %vm17760_vm6, %v21269_v59  ;;  %15134 = vmatpush3.bf16.msk.msra.mxu0 %vm17760_vm6, %v21268_v38  ;;  %v7051_v59 = vsel %vm5921_vm3, %v19598_v24, 0.0 }
 0x334   :  { %15735 = vrcp.f32 %v6837_v52  ;;  %v14208_v3 = vpop.f32.mrb[70].mxu1  ;;  %7058 = vadd.xlane.f32.xlu0 %v7057_v22  ;;  %15143 = vmatprep.subr.msk.bf16.mxu0 %vm17760_vm6, %v21271_v29 }
 0x335   :  { %v14201_v21 = vpop.f32.mrb[70].mxu0  ;;  %12628 = vst.msk [vmem:[%s20615_s9 + $0x78] sm:$0xf] %vm12613_vm7, %v14208_v3  ;;  %v7995_v57 = vpop.f32.mrb[71].mxu1  ;;  %15149 = vmatprep.subr.msk.bf16.mxu1 %vm17760_vm6, %v21272_v0 }
 0x336   :  { %12626 = vst.msk [vmem:[%s20615_s9 + $0x68] sm:$0xf] %vm12613_vm7, %v14201_v21  ;;  %v7911_v38 = vpop.f32.mrb[71].mxu0  ;;  %7052 = vadd.xlane.f32.xlu1 %v7051_v59  ;;  %v6858_v43 = vpop.xlane.xlu0 %6857 }
 0x337   :  { %12627 = vst.msk [vmem:[%s20615_s9 + $0x70] sm:$0xff] %vm384_vm0, %v7995_v57  ;;  %v19629_v61 = vpop.eup %15721  ;;  %12625 = vst.msk [vmem:[%s20615_s9 + $0x60] sm:$0xff] %vm384_vm0, %v7911_v38  ;;  %v6852_v26 = vpop.xlane.xlu1 %6851  ;;  %15737 = vrcp.f32 %v6858_v43 }
 0x338   :  { %21273 = vst [vmem:[#allocation47_spill] sm:$0xff] %v19629_v61  ;;  %v19635_v8 = vpop.eup %15723  ;;  %15739 = vrcp.f32 %v6852_v26  ;;  %v7072_v22 = vsel %vm5925_vm2, %v19629_v61, 0.0 }
 0x339   :  { %21274 = vst [vmem:[#allocation51_spill] sm:$0xff] %v19635_v8  ;;  %v19637_v62 = vpop.eup %15725  ;;  %v7066_v59 = vsel %vm5925_vm2, %v19635_v8, 0.0  ;;  %v21301_v8 = vld [vmem:[#allocation36_spill] sm:$0xff] }
 0x33a   :  { %v19639_v36 = vpop.eup %15727  ;;  %v6855_v39 = vpop.xlane.xlu0 %6854  ;;  %v7069_v50 = vsel %vm5921_vm3, %v19637_v62, 0.0 }
 0x33b   :  { %21275 = vst [vmem:[#allocation52_spill] sm:$0xff] %v19639_v36  ;;  %v15730_v6 = vpop.eup %15729  ;;  %15741 = vrcp.f32 %v6855_v39  ;;  %v6849_v2 = vpop.xlane.xlu1 %6848  ;;  %7070 = vadd.xlane.f32.xlu0 %v7069_v50  ;;  %v7063_v40 = vsel %vm5921_vm3, %v19639_v36, 0.0  ;;  %v21277_v50 = vld [vmem:[#allocation15_spill] sm:$0xff] }
 0x33c   :  { %v15732_v10 = vpop.eup %15731  ;;  %15743 = vrcp.f32 %v6849_v2  ;;  %7064 = vadd.xlane.f32.xlu1 %v7063_v40  ;;  %v7178_v21 = vmul.f32 %v15730_v6, %v18922_v34 }
 0x33d   :  { %v15734_v19 = vpop.eup %15733  ;;  %v7174_v43 = vmul.f32 %v15732_v10, %v18927_v63  ;;  %v21276_v63 = vld [vmem:[#allocation19_spill] sm:$0xff] }
 0x33e   :  { %v15736_v37 = vpop.eup %15735  ;;  %v6870_v52 = vpop.xlane.xlu0 %6869  ;;  %v7176_v3 = vmul.f32 %v15734_v19, %v18955_v13 }
 0x33f   :  { %v6864_v57 = vpop.xlane.xlu1 %6863  ;;  %7073 = vadd.xlane.f32.xlu0 %v7072_v22  ;;  %v7172_v38 = vmul.f32 %v15736_v37, %v18961_v16  ;;  %15745 = vrcp.f32 %v6870_v52 }
 0x340   :  { %7067 = vadd.xlane.f32.xlu1 %v7066_v59  ;;  %14332 = vmatprep.mubr.msk.f32.mxu1 %vm5921_vm3, %v7176_v3  ;;  %15747 = vrcp.f32 %v6864_v57  ;;  %v21279_v57 = vld [vmem:[#allocation30_spill] sm:$0xff]  ;;  %v194_v59 = vld [vmem:[%s20616_s8 + $0x10] sm:$0xff] }
 0x341   :  { %14325 = vmatprep.mubr.msk.f32.mxu0 %vm5921_vm3, %v7172_v38  ;;  %14333 = vmatmul.mubr.msk.f32.vlgmr.msra.gmra.mrb[88].mxu1 %vm5921_vm3, %v7178_v21  ;;  %v15738_v34 = vpop.eup %15737  ;;  %v195_v38 = vld [vmem:[%s20616_s8 + $0x18] sm:$0xf] }
 0x342   :  { %14326 = vmatmul.mubr.msk.f32.vlgmr.msra.gmra.mrb[88].mxu0 %vm5921_vm3, %v7174_v43  ;;  %v6867_v13 = vpop.xlane.xlu0 %6866  ;;  %15152 = vmatpush3.bf16.msk.msra.mxu1 %vm17760_vm6, %v21272_v0  ;;  %v15740_v26 = vpop.eup %15739  ;;  %v7186_v37 = vmul.f32 %v15738_v34, %v18984_v31  ;;  %v193_v34 = vld [vmem:[%s20616_s8 + $0x8] sm:$0xf] }
 0x343   :  { %15749 = vrcp.f32 %v6867_v13  ;;  %v6861_v16 = vpop.xlane.xlu1 %6860  ;;  %15146 = vmatpush3.bf16.msk.msra.mxu0 %vm17760_vm6, %v21271_v29  ;;  %15161 = vmatprep.subr.msk.bf16.mxu1 %vm17760_vm6, %v21276_v63  ;;  %v7182_v3 = vmul.f32 %v15740_v26, %v18991_v14  ;;  %v21278_v14 = vld [vmem:[#allocation14_spill] sm:$0xff] }
 0x344   :  { %15751 = vrcp.f32 %v6861_v16  ;;  %v14222_v39 = vpop.f32.mrb[72].mxu1  ;;  %15155 = vmatprep.subr.msk.bf16.mxu0 %vm17760_vm6, %v21277_v50  ;;  %v192_v13 = vld [vmem:[%s20616_s8] sm:$0xff] }
 0x345   :  { %v15742_v6 = vpop.eup %15741  ;;  %v14215_v0 = vpop.f32.mrb[72].mxu0  ;;  %12632 = vst.msk [vmem:[%s20615_s9 + $0x98] sm:$0xf] %vm12613_vm7, %v14222_v39  ;;  %v21280_v39 = vld [vmem:[#allocation4_spill] sm:$0xff] }
 0x346   :  { %v8163_v2 = vpop.f32.mrb[73].mxu1  ;;  %v15744_v29 = vpop.eup %15743  ;;  %12630 = vst.msk [vmem:[%s20615_s9 + $0x88] sm:$0xf] %vm12613_vm7, %v14215_v0  ;;  %v7184_v19 = vmul.f32 %v15742_v6, %v19003_v58  ;;  %v21281_v0 = vld [vmem:[#allocation95_spill] sm:$0xff] }
 0x347   :  { %v8079_v40 = vpop.f32.mrb[73].mxu0  ;;  %12631 = vst.msk [vmem:[%s20615_s9 + $0x90] sm:$0xff] %vm384_vm0, %v8163_v2  ;;  %v6882_v10 = vpop.xlane.xlu0 %6881  ;;  %v7180_v22 = vmul.f32 %v15744_v29, %v19007_v56  ;;  %v19720_v29 = vpack.c.bf16 %v195_v38, %v194_v59  ;;  %v197_v59 = vld [vmem:[%s20616_s8 + $0x28] sm:$0xf] }
 0x348   :  { %12629 = vst.msk [vmem:[%s20615_s9 + $0x80] sm:$0xff] %vm384_vm0, %v8079_v40  ;;  %v6876_v52 = vpop.xlane.xlu1 %6875  ;;  %14346 = vmatprep.mubr.msk.f32.mxu1 %vm5921_vm3, %v7184_v19  ;;  %15753 = vrcp.f32 %v6882_v10  ;;  %v21282_v40 = vld [vmem:[#allocation33_spill] sm:$0xff]  ;;  %v19724_v19 = vpack.c.bf16 %v193_v34, %v192_v13  ;;  %v21283_v34 = vld [vmem:[#allocation94_spill] sm:$0xff] }
 0x349   :  { %14339 = vmatprep.mubr.msk.f32.mxu0 %vm5921_vm3, %v7180_v22  ;;  %14347 = vmatmul.mubr.msk.f32.vlgmr.msra.gmra.mrb[90].mxu1 %vm5921_vm3, %v7186_v37  ;;  %15755 = vrcp.f32 %v6876_v52  ;;  %v15746_v58 = vpop.eup %15745 }
 0x34a   :  { %14340 = vmatmul.mubr.msk.f32.vlgmr.msra.gmra.mrb[90].mxu0 %vm5921_vm3, %v7182_v3  ;;  %15164 = vmatpush3.bf16.msk.msra.mxu1 %vm17760_vm6, %v21276_v63  ;;  %v15748_v21 = vpop.eup %15747 }
 0x34b   :  { %v6879_v31 = vpop.xlane.xlu0 %6878  ;;  %15158 = vmatpush3.bf16.msk.msra.mxu0 %vm17760_vm6, %v21277_v50  ;;  %15173 = vmatprep.subr.msk.bf16.mxu1 %vm17760_vm6, %v21278_v14  ;;  %v7194_v50 = vmul.f32 %v15746_v58, %v21280_v39  ;;  %v7190_v10 = vmul.f32 %v15748_v21, %v21282_v40  ;;  %v199_v58 = vld [vmem:[%s20616_s8 + $0x38] sm:$0xf] }
 0x34c   :  { %15757 = vrcp.f32 %v6879_v31  ;;  %v6873_v56 = vpop.xlane.xlu1 %6872  ;;  %15167 = vmatprep.subr.msk.bf16.mxu0 %vm17760_vm6, %v21279_v57  ;;  %v198_v31 = vld [vmem:[%s20616_s8 + $0x30] sm:$0xff] }
 0x34d   :  { %15759 = vrcp.f32 %v6873_v56  ;;  %v15750_v43 = vpop.eup %15749 }
 0x34e   :  { %v15752_v16 = vpop.eup %15751  ;;  %v7192_v26 = vmul.f32 %v15750_v43, %v19035_v30 }
 0x34f   :  { %v6894_v63 = vpop.xlane.xlu0 %6893  ;;  %v7188_v2 = vmul.f32 %v15752_v16, %v21281_v0  ;;  %v19772_v0 = vpack.c.bf16 %v199_v58, %v198_v31  ;;  %v203_v31 = vld [vmem:[%s20616_s8 + $0x58] sm:$0xf] }
 0x350   :  { %v6888_v6 = vpop.xlane.xlu1 %6887  ;;  %14360 = vmatprep.mubr.msk.f32.mxu1 %vm5921_vm3, %v7192_v26  ;;  %15761 = vrcp.f32 %v6894_v63  ;;  %v21284_v63 = vld [vmem:[#allocation22_spill] sm:$0xff] }
 0x351   :  { %14353 = vmatprep.mubr.msk.f32.mxu0 %vm5921_vm3, %v7188_v2  ;;  %14361 = vmatmul.mubr.msk.f32.vlgmr.msra.gmra.mrb[92].mxu1 %vm5921_vm3, %v7194_v50  ;;  %15763 = vrcp.f32 %v6888_v6  ;;  %v21285_v50 = vld [vmem:[#allocation6_spill] sm:$0xff]  ;;  %v21286_v2 = vld [vmem:[#allocation43_spill] sm:$0xff] }
 0x352   :  { %14354 = vmatmul.mubr.msk.f32.vlgmr.msra.gmra.mrb[92].mxu0 %vm5921_vm3, %v7190_v10  ;;  %15176 = vmatpush3.bf16.msk.msra.mxu1 %vm17760_vm6, %v21278_v14  ;;  %v15754_v37 = vpop.eup %15753 }
 0x353   :  { %v6891_v30 = vpop.xlane.xlu0 %6890  ;;  %15170 = vmatpush3.bf16.msk.msra.mxu0 %vm17760_vm6, %v21279_v57  ;;  %15185 = vmatprep.subr.msk.bf16.mxu1 %vm17760_vm6, %v19720_v29  ;;  %v15756_v22 = vpop.eup %15755  ;;  %v196_v57 = vld [vmem:[%s20616_s8 + $0x20] sm:$0xff]  ;;  %v7202_v26 = vmul.f32 %v15754_v37, %v21284_v63 }
 0x354   :  { %15765 = vrcp.f32 %v6891_v30  ;;  %v6885_v52 = vpop.xlane.xlu1 %6884  ;;  %v14236_v3 = vpop.f32.mrb[74].mxu1  ;;  %15179 = vmatprep.subr.msk.bf16.mxu0 %vm17760_vm6, %v19724_v19  ;;  %v7198_v40 = vmul.f32 %v15756_v22, %v21286_v2  ;;  %v19776_v10 = vpack.c.bf16 %v197_v59, %v196_v57  ;;  %v21287_v59 = vld [vmem:[#allocation97_spill] sm:$0xff] }
 0x355   :  { %15767 = vrcp.f32 %v6885_v52  ;;  %v14229_v14 = vpop.f32.mrb[74].mxu0  ;;  %12636 = vst.msk [vmem:[%s20615_s9 + $0xb8] sm:$0xf] %vm12613_vm7, %v14236_v3  ;;  %v8331_v21 = vpop.f32.mrb[75].mxu1  ;;  %v202_v3 = vld [vmem:[%s20616_s8 + $0x50] sm:$0xff] }
 0x356   :  { %v15758_v56 = vpop.eup %15757  ;;  %12634 = vst.msk [vmem:[%s20615_s9 + $0xa8] sm:$0xf] %vm12613_vm7, %v14229_v14  ;;  %v8247_v43 = vpop.f32.mrb[75].mxu0  ;;  %v201_v14 = vld [vmem:[%s20616_s8 + $0x48] sm:$0xf] }
 0x357   :  { %v15760_v38 = vpop.eup %15759  ;;  %12635 = vst.msk [vmem:[%s20615_s9 + $0xb0] sm:$0xff] %vm384_vm0, %v8331_v21  ;;  %v6906_v13 = vpop.xlane.xlu0 %6905  ;;  %v7200_v16 = vmul.f32 %v15758_v56, %v21283_v34  ;;  %12633 = vst.msk [vmem:[%s20615_s9 + $0xa0] sm:$0xff] %vm384_vm0, %v8247_v43  ;;  %v200_v56 = vld [vmem:[%s20616_s8 + $0x40] sm:$0xff]  ;;  %v21288_v43 = vld [vmem:[#allocation16_spill] sm:$0xff] }
 0x358   :  { %v6900_v39 = vpop.xlane.xlu1 %6899  ;;  %v7196_v6 = vmul.f32 %v15760_v38, %v21285_v50  ;;  %15769 = vrcp.f32 %v6906_v13 }
 0x359   :  { %14374 = vmatprep.mubr.msk.f32.mxu1 %vm5921_vm3, %v7200_v16  ;;  %15771 = vrcp.f32 %v6900_v39  ;;  %v21289_v16 = vld [vmem:[#allocation96_spill] sm:$0xff] }
 0x35a   :  { %14367 = vmatprep.mubr.msk.f32.mxu0 %vm5921_vm3, %v7196_v6  ;;  %14375 = vmatmul.mubr.msk.f32.vlgmr.msra.gmra.mrb[94].mxu1 %vm5921_vm3, %v7202_v26  ;;  %v15762_v37 = vpop.eup %15761  ;;  %v19808_v26 = vpack.c.bf16 %v203_v31, %v202_v3  ;;  %v21290_v39 = vld [vmem:[#allocation32_spill] sm:$0xff]  ;;  %v19812_v6 = vpack.c.bf16 %v201_v14, %v200_v56  ;;  %v207_v3 = vld [vmem:[%s20616_s8 + $0x78] sm:$0xf]  ;;  %v204_v14 = vld [vmem:[%s20616_s8 + $0x60] sm:$0xff] }
 0x35b   :  { %14368 = vmatmul.mubr.msk.f32.vlgmr.msra.gmra.mrb[94].mxu0 %vm5921_vm3, %v7198_v40  ;;  %v6903_v30 = vpop.xlane.xlu0 %6902  ;;  %15188 = vmatpush3.bf16.msk.msra.mxu1 %vm17760_vm6, %v19720_v29  ;;  %v15764_v22 = vpop.eup %15763  ;;  %v7210_v13 = vmul.f32 %v15762_v37, %v21288_v43  ;;  %v21291_v43 = vld [vmem:[#allocation49_spill] sm:$0xff] }
 0x35c   :  { %15773 = vrcp.f32 %v6903_v30  ;;  %v6897_v52 = vpop.xlane.xlu1 %6896  ;;  %15182 = vmatpush3.bf16.msk.msra.mxu0 %vm17760_vm6, %v19724_v19  ;;  %15197 = vmatprep.subr.msk.bf16.mxu1 %vm17760_vm6, %v19772_v0  ;;  %v7206_v50 = vmul.f32 %v15764_v22, %v21290_v39  ;;  %v206_v22 = vld [vmem:[%s20616_s8 + $0x70] sm:$0xff]  ;;  %v21293_v39 = vld [vmem:[#allocation27_spill] sm:$0xff] }
 0x35d   :  { %15775 = vrcp.f32 %v6897_v52  ;;  %15191 = vmatprep.subr.msk.bf16.mxu0 %vm17760_vm6, %v19776_v10 }
 0x35e   :  { %v15766_v58 = vpop.eup %15765 }
 0x35f   :  { %v15768_v21 = vpop.eup %15767  ;;  %v6918_v57 = vpop.xlane.xlu0 %6917  ;;  %v7208_v38 = vmul.f32 %v15766_v58, %v21287_v59 }
 0x360   :  { %v6912_v34 = vpop.xlane.xlu1 %6911  ;;  %v7204_v63 = vmul.f32 %v15768_v21, %v21289_v16  ;;  %15777 = vrcp.f32 %v6918_v57  ;;  %v205_v21 = vld [vmem:[%s20616_s8 + $0x68] sm:$0xf] }
 0x361   :  { %14388 = vmatprep.mubr.msk.f32.mxu1 %vm5921_vm3, %v7208_v38  ;;  %15779 = vrcp.f32 %v6912_v34  ;;  %v21292_v34 = vld [vmem:[#allocation7_spill] sm:$0xff] }
 0x362   :  { %14381 = vmatprep.mubr.msk.f32.mxu0 %vm5921_vm3, %v7204_v63  ;;  %14389 = vmatmul.mubr.msk.f32.vlgmr.msra.gmra.mrb[96].mxu1 %vm5921_vm3, %v7210_v13  ;;  %v15770_v40 = vpop.eup %15769 }
 0x363   :  { %14382 = vmatmul.mubr.msk.f32.vlgmr.msra.gmra.mrb[96].mxu0 %vm5921_vm3, %v7206_v50  ;;  %v6915_v2 = vpop.xlane.xlu0 %6914  ;;  %15200 = vmatpush3.bf16.msk.msra.mxu1 %vm17760_vm6, %v19772_v0  ;;  %v15772_v37 = vpop.eup %15771  ;;  %v7218_v16 = vmul.f32 %v15770_v40, %v21292_v34  ;;  %v21296_v34 = vld [vmem:[#allocation50_spill] sm:$0xff] }
 0x364   :  { %15781 = vrcp.f32 %v6915_v2  ;;  %v6909_v30 = vpop.xlane.xlu1 %6908  ;;  %15194 = vmatpush3.bf16.msk.msra.mxu0 %vm17760_vm6, %v19776_v10  ;;  %15209 = vmatprep.subr.msk.bf16.mxu1 %vm17760_vm6, %v19808_v26  ;;  %v14250_v52 = vpop.f32.mrb[76].mxu1  ;;  %v19860_v2 = vpack.c.bf16 %v207_v3, %v206_v22 }
 0x365   :  { %15783 = vrcp.f32 %v6909_v30  ;;  %15203 = vmatprep.subr.msk.bf16.mxu0 %vm17760_vm6, %v19812_v6  ;;  %v14243_v58 = vpop.f32.mrb[76].mxu0  ;;  %12640 = vst.msk [vmem:[%s20615_s9 + $0xd8] sm:$0xf] %vm12613_vm7, %v14250_v52  ;;  %v8499_v56 = vpop.f32.mrb[77].mxu1  ;;  %v21294_v30 = vld [vmem:[#allocation9_spill] sm:$0xff] }
 0x366   :  { %v15774_v31 = vpop.eup %15773  ;;  %12638 = vst.msk [vmem:[%s20615_s9 + $0xc8] sm:$0xf] %vm12613_vm7, %v14243_v58  ;;  %v8415_v59 = vpop.f32.mrb[77].mxu0  ;;  %v7214_v52 = vmul.f32 %v15772_v37, %v21294_v30  ;;  %v19864_v58 = vpack.c.bf16 %v205_v21, %v204_v14  ;;  %v208_v21 = vld [vmem:[%s20616_s8 + $0x80] sm:$0xff] }
 0x367   :  { %v15776_v57 = vpop.eup %15775  ;;  %12639 = vst.msk [vmem:[%s20615_s9 + $0xd0] sm:$0xff] %vm384_vm0, %v8499_v56  ;;  %v6930_v38 = vpop.xlane.xlu0 %6929  ;;  %v7216_v13 = vmul.f32 %v15774_v31, %v21291_v43  ;;  %12637 = vst.msk [vmem:[%s20615_s9 + $0xc0] sm:$0xff] %vm384_vm0, %v8415_v59  ;;  %v210_v31 = vld [vmem:[%s20616_s8 + $0x90] sm:$0xff]  ;;  %v211_v56 = vld [vmem:[%s20616_s8 + $0x98] sm:$0xf] }
 0x368   :  { %v6924_v63 = vpop.xlane.xlu1 %6923  ;;  %v7212_v50 = vmul.f32 %v15776_v57, %v21293_v39  ;;  %15785 = vrcp.f32 %v6930_v38  ;;  %v209_v57 = vld [vmem:[%s20616_s8 + $0x88] sm:$0xf]  ;;  %v21295_v43 = vld [vmem:[#allocation17_spill] sm:$0xff]  ;;  %v21297_v39 = vld [vmem:[#allocation48_spill] sm:$0xff]  ;;  %v19896_v30 = vpack.c.bf16 %v211_v56, %v210_v31 }
 0x369   :  { %14402 = vmatprep.mubr.msk.f32.mxu1 %vm5921_vm3, %v7216_v13  ;;  %15787 = vrcp.f32 %v6924_v63 }
 0x36a   :  { %14395 = vmatprep.mubr.msk.f32.mxu0 %vm5921_vm3, %v7212_v50  ;;  %14403 = vmatmul.mubr.msk.f32.vlgmr.msra.gmra.mrb[98].mxu1 %vm5921_vm3, %v7218_v16  ;;  %v15778_v22 = vpop.eup %15777 }
 0x36b   :  { %14396 = vmatmul.mubr.msk.f32.vlgmr.msra.gmra.mrb[98].mxu0 %vm5921_vm3, %v7214_v52  ;;  %v6927_v40 = vpop.xlane.xlu0 %6926  ;;  %15212 = vmatpush3.bf16.msk.msra.mxu1 %vm17760_vm6, %v19808_v26  ;;  %v15780_v3 = vpop.eup %15779  ;;  %v7226_v16 = vmul.f32 %v15778_v22, %v21296_v34  ;;  %v21298_v52 = vld [vmem:[#allocation11_spill] sm:$0xff] }
 0x36c   :  { %15789 = vrcp.f32 %v6927_v40  ;;  %v6921_v37 = vpop.xlane.xlu1 %6920  ;;  %15206 = vmatpush3.bf16.msk.msra.mxu0 %vm17760_vm6, %v19812_v6  ;;  %15221 = vmatprep.subr.msk.bf16.mxu1 %vm17760_vm6, %v19860_v2  ;;  %v7222_v40 = vmul.f32 %v15780_v3, %v21298_v52  ;;  %v213_v34 = vld [vmem:[%s20616_s8 + $0xa8] sm:$0xf] }
 0x36d   :  { %15791 = vrcp.f32 %v6921_v37  ;;  %15215 = vmatprep.subr.msk.bf16.mxu0 %vm17760_vm6, %v19864_v58  ;;  %v19900_v37 = vpack.c.bf16 %v209_v57, %v208_v21  ;;  %v214_v21 = vld [vmem:[%s20616_s8 + $0xb0] sm:$0xff]  ;;  %v215_v57 = vld [vmem:[%s20616_s8 + $0xb8] sm:$0xf]  ;;  %v21299_v52 = vld [vmem:[#allocation35_spill] sm:$0xff] }
 0x36e   :  { %v15782_v14 = vpop.eup %15781 }
 0x36f   :  { %v15784_v59 = vpop.eup %15783  ;;  %v6942_v38 = vpop.xlane.xlu0 %6941  ;;  %v7224_v13 = vmul.f32 %v15782_v14, %v21295_v43 }
 0x370   :  { %v6936_v63 = vpop.xlane.xlu1 %6935  ;;  %v7220_v50 = vmul.f32 %v15784_v59, %v21297_v39  ;;  %15793 = vrcp.f32 %v6942_v38 }
 0x371   :  { %14416 = vmatprep.mubr.msk.f32.mxu1 %vm5921_vm3, %v7224_v13  ;;  %15795 = vrcp.f32 %v6936_v63  ;;  %v212_v13 = vld [vmem:[%s20616_s8 + $0xa0] sm:$0xff] }
 0x372   :  { %14409 = vmatprep.mubr.msk.f32.mxu0 %vm5921_vm3, %v7220_v50  ;;  %14417 = vmatmul.mubr.msk.f32.vlgmr.msra.gmra.mrb[100].mxu1 %vm5921_vm3, %v7226_v16  ;;  %v15786_v31 = vpop.eup %15785 }
 0x373   :  { %14410 = vmatmul.mubr.msk.f32.vlgmr.msra.gmra.mrb[100].mxu0 %vm5921_vm3, %v7222_v40  ;;  %v6939_v22 = vpop.xlane.xlu0 %6938  ;;  %15224 = vmatpush3.bf16.msk.msra.mxu1 %vm17760_vm6, %v19860_v2  ;;  %v15788_v56 = vpop.eup %15787  ;;  %v7234_v40 = vmul.f32 %v15786_v31, %v21299_v52 }
 0x374   :  { %15797 = vrcp.f32 %v6939_v22  ;;  %v6933_v3 = vpop.xlane.xlu1 %6932  ;;  %15218 = vmatpush3.bf16.msk.msra.mxu0 %vm17760_vm6, %v19864_v58  ;;  %15233 = vmatprep.subr.msk.bf16.mxu1 %vm17760_vm6, %v19896_v30  ;;  %v14264_v14 = vpop.f32.mrb[78].mxu1  ;;  %v7230_v61 = vmul.f32 %v15788_v56, %v21301_v8 }
 0x375   :  { %15799 = vrcp.f32 %v6933_v3  ;;  %15227 = vmatprep.subr.msk.bf16.mxu0 %vm17760_vm6, %v19900_v37  ;;  %v14257_v38 = vpop.f32.mrb[78].mxu0  ;;  %12644 = vst.msk [vmem:[%s20615_s9 + $0xf8] sm:$0xf] %vm12613_vm7, %v14264_v14  ;;  %v8667_v43 = vpop.f32.mrb[79].mxu1  ;;  %v21300_v3 = vld [vmem:[#allocation34_spill] sm:$0xff] }
 0x376   :  { %v15790_v59 = vpop.eup %15789  ;;  %12642 = vst.msk [vmem:[%s20615_s9 + $0xe8] sm:$0xf] %vm12613_vm7, %v14257_v38  ;;  %v8583_v63 = vpop.f32.mrb[79].mxu0  ;;  %v19948_v38 = vpack.c.bf16 %v215_v57, %v214_v21  ;;  %v219_v21 = vld [vmem:[%s20616_s8 + $0xd8] sm:$0xf] }
 0x377   :  { %v15792_v16 = vpop.eup %15791  ;;  %12643 = vst.msk [vmem:[%s20615_s9 + $0xf0] sm:$0xff] %vm384_vm0, %v8667_v43  ;;  %v6954_v39 = vpop.xlane.xlu0 %6953  ;;  %v7232_v50 = vmul.f32 %v15790_v59, %v19195_v46  ;;  %12641 = vst.msk [vmem:[%s20615_s9 + $0xe0] sm:$0xff] %vm384_vm0, %v8583_v63  ;;  %v19952_v43 = vpack.c.bf16 %v213_v34, %v212_v13  ;;  %v216_v59 = vld [vmem:[%s20616_s8 + $0xc0] sm:$0xff]  ;;  %v217_v13 = vld [vmem:[%s20616_s8 + $0xc8] sm:$0xf] }
 0x378   :  { %v6948_v22 = vpop.xlane.xlu1 %6947  ;;  %v7228_v14 = vmul.f32 %v15792_v16, %v21300_v3  ;;  %15801 = vrcp.f32 %v6954_v39  ;;  %v21302_v63 = vld [vmem:[#allocation38_spill] sm:$0xff]  ;;  %v19988_v36 = vpack.c.bf16 %v217_v13, %v216_v59  ;;  %v223_v59 = vld [vmem:[%s20616_s8 + $0xf8] sm:$0xf] }
 0x379   :  { %14430 = vmatprep.mubr.msk.f32.mxu1 %vm5921_vm3, %v7232_v50  ;;  %15803 = vrcp.f32 %v6948_v22  ;;  %v21303_v50 = vld [vmem:[#allocation10_spill] sm:$0xff]  ;;  %v21304_v22 = vld [vmem:[#allocation39_spill] sm:$0xff] }
 0x37a   :  { %14423 = vmatprep.mubr.msk.f32.mxu0 %vm5921_vm3, %v7228_v14  ;;  %14431 = vmatmul.mubr.msk.f32.vlgmr.msra.gmra.mrb[102].mxu1 %vm5921_vm3, %v7234_v40  ;;  %v15794_v31 = vpop.eup %15793 }
 0x37b   :  { %14424 = vmatmul.mubr.msk.f32.vlgmr.msra.gmra.mrb[102].mxu0 %vm5921_vm3, %v7230_v61  ;;  %v6951_v46 = vpop.xlane.xlu0 %6950  ;;  %15236 = vmatpush3.bf16.msk.msra.mxu1 %vm17760_vm6, %v19896_v30  ;;  %v15796_v56 = vpop.eup %15795  ;;  %v218_v61 = vld [vmem:[%s20616_s8 + $0xd0] sm:$0xff]  ;;  %v7242_v52 = vmul.f32 %v15794_v31, %v21303_v50 }
 0x37c   :  { %15805 = vrcp.f32 %v6951_v46  ;;  %v6945_v8 = vpop.xlane.xlu1 %6944  ;;  %15230 = vmatpush3.bf16.msk.msra.mxu0 %vm17760_vm6, %v19900_v37  ;;  %15245 = vmatprep.subr.msk.bf16.mxu1 %vm17760_vm6, %v19948_v38  ;;  %v19984_v14 = vpack.c.bf16 %v219_v21, %v218_v61  ;;  %v21305_v46 = vld [vmem:[#allocation37_spill] sm:$0xff] }
 0x37d   :  { %15807 = vrcp.f32 %v6945_v8  ;;  %15239 = vmatprep.subr.msk.bf16.mxu0 %vm17760_vm6, %v19952_v43  ;;  %v7238_v8 = vmul.f32 %v15796_v56, %v21305_v46 }
 0x37e   :  { %v15798_v57 = vpop.eup %15797 }
 0x37f   :  { %v15800_v34 = vpop.eup %15799  ;;  %v6966_v16 = vpop.xlane.xlu0 %6965  ;;  %v7240_v39 = vmul.f32 %v15798_v57, %v21302_v63  ;;  %v222_v57 = vld [vmem:[%s20616_s8 + $0xf0] sm:$0xff] }
 0x380   :  { %v6960_v40 = vpop.xlane.xlu1 %6959  ;;  %v7236_v3 = vmul.f32 %v15800_v34, %v21304_v22  ;;  %15809 = vrcp.f32 %v6966_v16  ;;  %v220_v34 = vld [vmem:[%s20616_s8 + $0xe0] sm:$0xff]  ;;  %v221_v16 = vld [vmem:[%s20616_s8 + $0xe8] sm:$0xf] }
 0x381   :  { %14444 = vmatprep.mubr.msk.f32.mxu1 %vm5921_vm3, %v7240_v39  ;;  %15811 = vrcp.f32 %v6960_v40 }
 0x382   :  { %14437 = vmatprep.mubr.msk.f32.mxu0 %vm5921_vm3, %v7236_v3  ;;  %14445 = vmatmul.mubr.msk.f32.vlgmr.msra.gmra.mrb[104].mxu1 %vm5921_vm3, %v7242_v52  ;;  %v15802_v61 = vpop.eup %15801  ;;  %v20020_v3 = vpack.c.bf16 %v223_v59, %v222_v57 }
 0x383   :  { %14438 = vmatmul.mubr.msk.f32.vlgmr.msra.gmra.mrb[104].mxu0 %vm5921_vm3, %v7238_v8  ;;  %v6963_v31 = vpop.xlane.xlu0 %6962  ;;  %15248 = vmatpush3.bf16.msk.msra.mxu1 %vm17760_vm6, %v19948_v38  ;;  %v15804_v21 = vpop.eup %15803  ;;  %v7250_v52 = vmul.f32 %v15802_v61, %v19243_v45  ;;  %v20024_v8 = vpack.c.bf16 %v221_v16, %v220_v34 }
 0x384   :  { %15813 = vrcp.f32 %v6963_v31  ;;  %v6957_v56 = vpop.xlane.xlu1 %6956  ;;  %15242 = vmatpush3.bf16.msk.msra.mxu0 %vm17760_vm6, %v19952_v43  ;;  %15257 = vmatprep.subr.msk.bf16.mxu1 %vm17760_vm6, %v19984_v14  ;;  %v7246_v46 = vmul.f32 %v15804_v21, %v19249_v32 }
 0x385   :  { %15815 = vrcp.f32 %v6957_v56  ;;  %15251 = vmatprep.subr.msk.bf16.mxu0 %vm17760_vm6, %v19988_v36 }
 0x386   :  { %v15806_v13 = vpop.eup %15805 }
 0x387   :  { %v15808_v63 = vpop.eup %15807  ;;  %v6978_v39 = vpop.xlane.xlu0 %6977  ;;  %v7248_v50 = vmul.f32 %v15806_v13, %v19263_v60 }
 0x388   :  { %v6972_v40 = vpop.xlane.xlu1 %6971  ;;  %v7244_v22 = vmul.f32 %v15808_v63, %v19267_v51  ;;  %15817 = vrcp.f32 %v6978_v39 }
 0x389   :  { %14458 = vmatprep.mubr.msk.f32.mxu1 %vm5921_vm3, %v7248_v50  ;;  %15819 = vrcp.f32 %v6972_v40  ;;  %v21306_v50 = vld [vmem:[#allocation41_spill] sm:$0xff]  ;;  %v21307_v40 = vld [vmem:[#allocation40_spill] sm:$0xff] }
 0x38a   :  { %14451 = vmatprep.mubr.msk.f32.mxu0 %vm5921_vm3, %v7244_v22  ;;  %14459 = vmatmul.mubr.msk.f32.vlgmr.msra.gmra.mrb[106].mxu1 %vm5921_vm3, %v7250_v52  ;;  %v15810_v60 = vpop.eup %15809 }
 0x38b   :  { %14452 = vmatmul.mubr.msk.f32.vlgmr.msra.gmra.mrb[106].mxu0 %vm5921_vm3, %v7246_v46  ;;  %v6975_v45 = vpop.xlane.xlu0 %6974  ;;  %15260 = vmatpush3.bf16.msk.msra.mxu1 %vm17760_vm6, %v19984_v14  ;;  %v15812_v51 = vpop.eup %15811  ;;  %v7258_v57 = vmul.f32 %v15810_v60, %v19275_v9 }
 0x38c   :  { %15821 = vrcp.f32 %v6975_v45  ;;  %v6969_v32 = vpop.xlane.xlu1 %6968  ;;  %15254 = vmatpush3.bf16.msk.msra.mxu0 %vm17760_vm6, %v19988_v36  ;;  %15269 = vmatprep.subr.msk.bf16.mxu1 %vm17760_vm6, %v20020_v3  ;;  %v7254_v34 = vmul.f32 %v15812_v51, %v19279_v17  ;;  %v21308_v45 = vld [vmem:[#allocation58_spill] sm:$0xff] }
 0x38d   :  { %15823 = vrcp.f32 %v6969_v32  ;;  %15263 = vmatprep.subr.msk.bf16.mxu0 %vm17760_vm6, %v20024_v8  ;;  %v21309_v32 = vld [vmem:[#allocation57_spill] sm:$0xff] }
 0x38e   :  { %v15814_v31 = vpop.eup %15813 }
 0x38f   :  { %v15816_v61 = vpop.eup %15815  ;;  %v6990_v56 = vpop.xlane.xlu0 %6989  ;;  %v7256_v21 = vmul.f32 %v15814_v31, %v19287_v33 }
 0x390   :  { %v6984_v59 = vpop.xlane.xlu1 %6983  ;;  %v7252_v13 = vmul.f32 %v15816_v61, %v19291_v18  ;;  %15825 = vrcp.f32 %v6990_v56 }
 0x391   :  { %14472 = vmatprep.mubr.msk.f32.mxu1 %vm5921_vm3, %v7256_v21  ;;  %15827 = vrcp.f32 %v6984_v59 }
 0x392   :  { %14465 = vmatprep.mubr.msk.f32.mxu0 %vm5921_vm3, %v7252_v13  ;;  %14473 = vmatmul.mubr.msk.f32.vlgmr.msra.gmra.mrb[108].mxu1 %vm5921_vm3, %v7258_v57  ;;  %v15818_v9 = vpop.eup %15817 }
 0x393   :  { %14466 = vmatmul.mubr.msk.f32.vlgmr.msra.gmra.mrb[108].mxu0 %vm5921_vm3, %v7254_v34  ;;  %v6987_v16 = vpop.xlane.xlu0 %6986  ;;  %15272 = vmatpush3.bf16.msk.msra.mxu1 %vm17760_vm6, %v20020_v3  ;;  %v15820_v17 = vpop.eup %15819  ;;  %v7266_v22 = vmul.f32 %v15818_v9, %v21307_v40  ;;  %v21312_v40 = vld [vmem:[#allocation44_spill] sm:$0xff] }
 0x394   :  { %15829 = vrcp.f32 %v6987_v16  ;;  %v6981_v33 = vpop.xlane.xlu1 %6980  ;;  %15266 = vmatpush3.bf16.msk.msra.mxu0 %vm17760_vm6, %v20024_v8  ;;  %15281 = vmatprep.subr.msk.bf16.mxu1 %vm17760_vm6, %v19720_v29  ;;  %v7262_v51 = vmul.f32 %v15820_v17, %v21309_v32 }
 0x395   :  { %15831 = vrcp.f32 %v6981_v33  ;;  %15275 = vmatprep.subr.msk.bf16.mxu0 %vm17760_vm6, %v19724_v19 }
 0x396   :  { %v15822_v18 = vpop.eup %15821 }
 0x397   :  { %v15824_v63 = vpop.eup %15823  ;;  %v7002_v39 = vpop.xlane.xlu0 %7001  ;;  %v7264_v52 = vmul.f32 %v15822_v18, %v21306_v50  ;;  %v21310_v18 = vld [vmem:[#allocation56_spill] sm:$0xff] }
 0x398   :  { %v6996_v46 = vpop.xlane.xlu1 %6995  ;;  %v7260_v60 = vmul.f32 %v15824_v63, %v21308_v45  ;;  %15833 = vrcp.f32 %v7002_v39  ;;  %v21311_v39 = vld [vmem:[#allocation42_spill] sm:$0xff] }
 0x399   :  { %14486 = vmatprep.mubr.msk.f32.mxu1 %vm5921_vm3, %v7264_v52  ;;  %15835 = vrcp.f32 %v6996_v46 }
 0x39a   :  { %14479 = vmatprep.mubr.msk.f32.mxu0 %vm5921_vm3, %v7260_v60  ;;  %14487 = vmatmul.mubr.msk.f32.vlgmr.msra.gmra.mrb[110].mxu1 %vm5921_vm3, %v7266_v22  ;;  %v15826_v61 = vpop.eup %15825  ;;  %v21313_v22 = vld [vmem:[#allocation55_spill] sm:$0xff] }
 0x39b   :  { %14480 = vmatmul.mubr.msk.f32.vlgmr.msra.gmra.mrb[110].mxu0 %vm5921_vm3, %v7262_v51  ;;  %v6999_v31 = vpop.xlane.xlu0 %6998  ;;  %15284 = vmatpush3.bf16.msk.msra.mxu1 %vm17760_vm6, %v19720_v29  ;;  %v15828_v21 = vpop.eup %15827  ;;  %v7274_v34 = vmul.f32 %v15826_v61, %v19323_v15 }
 0x39c   :  { %15837 = vrcp.f32 %v6999_v31  ;;  %v6993_v56 = vpop.xlane.xlu1 %6992  ;;  %15278 = vmatpush3.bf16.msk.msra.mxu0 %vm17760_vm6, %v19724_v19  ;;  %15293 = vmatprep.subr.msk.bf16.mxu1 %vm17760_vm6, %v19772_v0  ;;  %v7270_v9 = vmul.f32 %v15828_v21, %v19327_v53 }
 0x39d   :  { %15839 = vrcp.f32 %v6993_v56  ;;  %15287 = vmatprep.subr.msk.bf16.mxu0 %vm17760_vm6, %v19776_v10 }
 0x39e   :  { %v15830_v57 = vpop.eup %15829 }
 0x39f   :  { %v15832_v59 = vpop.eup %15831  ;;  %v7014_v29 = vpop.xlane.xlu0 %7013  ;;  %v7272_v13 = vmul.f32 %v15830_v57, %v19347_v23 }
 0x3a0   :  { %v7008_v16 = vpop.xlane.xlu1 %7007  ;;  %v7268_v19 = vmul.f32 %v15832_v59, %v19353_v28  ;;  %15841 = vrcp.f32 %v7014_v29 }
 0x3a1   :  { %14500 = vmatprep.mubr.msk.f32.mxu1 %vm5921_vm3, %v7272_v13  ;;  %15843 = vrcp.f32 %v7008_v16 }
 0x3a2   :  { %14493 = vmatprep.mubr.msk.f32.mxu0 %vm5921_vm3, %v7268_v19  ;;  %14501 = vmatmul.mubr.msk.f32.vlgmr.msra.gmra.mrb[112].mxu1 %vm5921_vm3, %v7274_v34  ;;  %v15834_v23 = vpop.eup %15833 }
 0x3a3   :  { %14494 = vmatmul.mubr.msk.f32.vlgmr.msra.gmra.mrb[112].mxu0 %vm5921_vm3, %v7270_v9  ;;  %v7011_v33 = vpop.xlane.xlu0 %7010  ;;  %15296 = vmatpush3.bf16.msk.msra.mxu1 %vm17760_vm6, %v19772_v0  ;;  %v15836_v53 = vpop.eup %15835  ;;  %v7282_v50 = vmul.f32 %v15834_v23, %v21311_v39  ;;  %v21314_v9 = vld [vmem:[#allocation46_spill] sm:$0xff] }
 0x3a4   :  { %15845 = vrcp.f32 %v7011_v33  ;;  %v7005_v15 = vpop.xlane.xlu1 %7004  ;;  %15290 = vmatpush3.bf16.msk.msra.mxu0 %vm17760_vm6, %v19776_v10  ;;  %15305 = vmatprep.subr.msk.bf16.mxu1 %vm17760_vm6, %v19808_v26  ;;  %v7278_v46 = vmul.f32 %v15836_v53, %v21313_v22  ;;  %v21315_v33 = vld [vmem:[#allocation45_spill] sm:$0xff] }
 0x3a5   :  { %15847 = vrcp.f32 %v7005_v15  ;;  %15299 = vmatprep.subr.msk.bf16.mxu0 %vm17760_vm6, %v19812_v6 }
 0x3a6   :  { %v15838_v28 = vpop.eup %15837 }
 0x3a7   :  { %v15840_v17 = vpop.eup %15839  ;;  %v7026_v0 = vpop.xlane.xlu0 %7025  ;;  %v7280_v63 = vmul.f32 %v15838_v28, %v21310_v18 }
 0x3a8   :  { %v7020_v52 = vpop.xlane.xlu1 %7019  ;;  %v7276_v10 = vmul.f32 %v15840_v17, %v21312_v40  ;;  %15849 = vrcp.f32 %v7026_v0 }
 0x3a9   :  { %14514 = vmatprep.mubr.msk.f32.mxu1 %vm5921_vm3, %v7280_v63  ;;  %15851 = vrcp.f32 %v7020_v52 }
 0x3aa   :  { %14507 = vmatprep.mubr.msk.f32.mxu0 %vm5921_vm3, %v7276_v10  ;;  %14515 = vmatmul.mubr.msk.f32.vlgmr.msra.gmra.mrb[114].mxu1 %vm5921_vm3, %v7282_v50  ;;  %v15842_v60 = vpop.eup %15841 }
 0x3ab   :  { %14508 = vmatmul.mubr.msk.f32.vlgmr.msra.gmra.mrb[114].mxu0 %vm5921_vm3, %v7278_v46  ;;  %v7023_v45 = vpop.xlane.xlu0 %7022  ;;  %15308 = vmatpush3.bf16.msk.msra.mxu1 %vm17760_vm6, %v19808_v26  ;;  %v15844_v51 = vpop.eup %15843  ;;  %v7290_v21 = vmul.f32 %v15842_v60, %v19413_v48 }
 0x3ac   :  { %15853 = vrcp.f32 %v7023_v45  ;;  %v7017_v32 = vpop.xlane.xlu1 %7016  ;;  %15302 = vmatpush3.bf16.msk.msra.mxu0 %vm17760_vm6, %v19812_v6  ;;  %15317 = vmatprep.subr.msk.bf16.mxu1 %vm17760_vm6, %v19860_v2  ;;  %v7286_v59 = vmul.f32 %v15844_v51, %v19419_v41 }
 0x3ad   :  { %15855 = vrcp.f32 %v7017_v32  ;;  %15311 = vmatprep.subr.msk.bf16.mxu0 %vm17760_vm6, %v19864_v58 }
 0x3ae   :  { %v15846_v31 = vpop.eup %15845 }
 0x3af   :  { %v15848_v61 = vpop.eup %15847  ;;  %v7038_v26 = vpop.xlane.xlu0 %7037  ;;  %v7288_v56 = vmul.f32 %v15846_v31, %v19437_v1 }
 0x3b0   :  { %v7032_v57 = vpop.xlane.xlu1 %7031  ;;  %v7284_v6 = vmul.f32 %v15848_v61, %v19445_v20  ;;  %15857 = vrcp.f32 %v7038_v26  ;;  %v21316_v26 = vld [vmem:[#allocation52_spill] sm:$0xff] }
 0x3b1   :  { %14528 = vmatprep.mubr.msk.f32.mxu1 %vm5921_vm3, %v7288_v56  ;;  %15859 = vrcp.f32 %v7032_v57  ;;  %v21318_v57 = vld [vmem:[#allocation51_spill] sm:$0xff] }
 0x3b2   :  { %14521 = vmatprep.mubr.msk.f32.mxu0 %vm5921_vm3, %v7284_v6  ;;  %14529 = vmatmul.mubr.msk.f32.vlgmr.msra.gmra.mrb[116].mxu1 %vm5921_vm3, %v7290_v21  ;;  %v15850_v48 = vpop.eup %15849 }
 0x3b3   :  { %14522 = vmatmul.mubr.msk.f32.vlgmr.msra.gmra.mrb[116].mxu0 %vm5921_vm3, %v7286_v59  ;;  %v7035_v29 = vpop.xlane.xlu0 %7034  ;;  %15320 = vmatpush3.bf16.msk.msra.mxu1 %vm17760_vm6, %v19860_v2  ;;  %v15852_v41 = vpop.eup %15851  ;;  %v7298_v16 = vmul.f32 %v15850_v48, %v19462_v7 }
 0x3b4   :  { %15861 = vrcp.f32 %v7035_v29  ;;  %v7029_v1 = vpop.xlane.xlu1 %7028  ;;  %15314 = vmatpush3.bf16.msk.msra.mxu0 %vm17760_vm6, %v19864_v58  ;;  %15329 = vmatprep.subr.msk.bf16.mxu1 %vm17760_vm6, %v19896_v30  ;;  %v7294_v23 = vmul.f32 %v15852_v41, %v21315_v33 }
 0x3b5   :  { %15863 = vrcp.f32 %v7029_v1  ;;  %15323 = vmatprep.subr.msk.bf16.mxu0 %vm17760_vm6, %v19900_v37 }
 0x3b6   :  { %v15854_v20 = vpop.eup %15853 }
 0x3b7   :  { %v15856_v13 = vpop.eup %15855  ;;  %v7050_v2 = vpop.xlane.xlu0 %7049  ;;  %v7296_v34 = vmul.f32 %v15854_v20, %v19489_v25 }
 0x3b8   :  { %v7044_v19 = vpop.xlane.xlu1 %7043  ;;  %v7292_v58 = vmul.f32 %v15856_v13, %v21314_v9  ;;  %15865 = vrcp.f32 %v7050_v2 }
 0x3b9   :  { %14542 = vmatprep.mubr.msk.f32.mxu1 %vm5921_vm3, %v7296_v34  ;;  %15867 = vrcp.f32 %v7044_v19 }
 0x3ba   :  { %14535 = vmatprep.mubr.msk.f32.mxu0 %vm5921_vm3, %v7292_v58  ;;  %14543 = vmatmul.mubr.msk.f32.vlgmr.msra.gmra.mrb[118].mxu1 %vm5921_vm3, %v7298_v16  ;;  %v15858_v7 = vpop.eup %15857 }
 0x3bb   :  { %14536 = vmatmul.mubr.msk.f32.vlgmr.msra.gmra.mrb[118].mxu0 %vm5921_vm3, %v7294_v23  ;;  %v7047_v15 = vpop.xlane.xlu0 %7046  ;;  %15332 = vmatpush3.bf16.msk.msra.mxu1 %vm17760_vm6, %v19896_v30  ;;  %v15860_v53 = vpop.eup %15859  ;;  %v7306_v18 = vmul.f32 %v15858_v7, %v19503_v35 }
 0x3bc   :  { %15869 = vrcp.f32 %v7047_v15  ;;  %v7041_v25 = vpop.xlane.xlu1 %7040  ;;  %15326 = vmatpush3.bf16.msk.msra.mxu0 %vm17760_vm6, %v19900_v37  ;;  %15341 = vmatprep.subr.msk.bf16.mxu1 %vm17760_vm6, %v19948_v38  ;;  %v7302_v39 = vmul.f32 %v15860_v53, %v19505_v27 }
 0x3bd   :  { %15871 = vrcp.f32 %v7041_v25  ;;  %15335 = vmatprep.subr.msk.bf16.mxu0 %vm17760_vm6, %v19952_v43 }
 0x3be   :  { %v15862_v28 = vpop.eup %15861 }
 0x3bf   :  { %v15864_v17 = vpop.eup %15863  ;;  %v7062_v30 = vpop.xlane.xlu0 %7061  ;;  %v7304_v0 = vmul.f32 %v15862_v28, %v19517_v49 }
 0x3c0   :  { %v7056_v63 = vpop.xlane.xlu1 %7055  ;;  %v7300_v37 = vmul.f32 %v15864_v17, %v19526_v5  ;;  %15873 = vrcp.f32 %v7062_v30 }
 0x3c1   :  { %14556 = vmatprep.mubr.msk.f32.mxu1 %vm5921_vm3, %v7304_v0  ;;  %15875 = vrcp.f32 %v7056_v63 }
 0x3c2   :  { %14549 = vmatprep.mubr.msk.f32.mxu0 %vm5921_vm3, %v7300_v37  ;;  %14557 = vmatmul.mubr.msk.f32.vlgmr.msra.gmra.mrb[120].mxu1 %vm5921_vm3, %v7306_v18  ;;  %v15866_v49 = vpop.eup %15865 }
 0x3c3   :  { %14550 = vmatmul.mubr.msk.f32.vlgmr.msra.gmra.mrb[120].mxu0 %vm5921_vm3, %v7302_v39  ;;  %v7059_v50 = vpop.xlane.xlu0 %7058  ;;  %15344 = vmatpush3.bf16.msk.msra.mxu1 %vm17760_vm6, %v19948_v38  ;;  %v15868_v27 = vpop.eup %15867  ;;  %v7314_v40 = vmul.f32 %v15866_v49, %v19537_v11 }
 0x3c4   :  { %15877 = vrcp.f32 %v7059_v50  ;;  %v7053_v35 = vpop.xlane.xlu1 %7052  ;;  %15338 = vmatpush3.bf16.msk.msra.mxu0 %vm17760_vm6, %v19952_v43  ;;  %15353 = vmatprep.subr.msk.bf16.mxu1 %vm17760_vm6, %v19984_v14  ;;  %v7310_v43 = vmul.f32 %v15868_v27, %v19551_v12 }
 0x3c5   :  { %15879 = vrcp.f32 %v7053_v35  ;;  %15347 = vmatprep.subr.msk.bf16.mxu0 %vm17760_vm6, %v19988_v36 }
 0x3c6   :  { %v15870_v5 = vpop.eup %15869 }
 0x3c7   :  { %v15872_v52 = vpop.eup %15871  ;;  %v7312_v38 = vmul.f32 %v15870_v5, %v19561_v44 }
 0x3c8   :  { %v7308_v10 = vmul.f32 %v15872_v52, %v19570_v42  ;;  %v7071_v22 = vpop.xlane.xlu0 %7070 }
 0x3c9   :  { %14570 = vmatprep.mubr.msk.f32.mxu1 %vm5921_vm3, %v7312_v38  ;;  %15881 = vrcp.f32 %v7071_v22  ;;  %v7065_v46 = vpop.xlane.xlu1 %7064 }
 0x3ca   :  { %14563 = vmatprep.mubr.msk.f32.mxu0 %vm5921_vm3, %v7308_v10  ;;  %14571 = vmatmul.mubr.msk.f32.vlgmr.msra.gmra.mrb[122].mxu1 %vm5921_vm3, %v7314_v40  ;;  %15883 = vrcp.f32 %v7065_v46  ;;  %v15874_v11 = vpop.eup %15873 }
 0x3cb   :  { %14564 = vmatmul.mubr.msk.f32.vlgmr.msra.gmra.mrb[122].mxu0 %vm5921_vm3, %v7310_v43  ;;  %15356 = vmatpush3.bf16.msk.msra.mxu1 %vm17760_vm6, %v19984_v14  ;;  %v15876_v12 = vpop.eup %15875  ;;  %v7322_v32 = vmul.f32 %v15874_v11, %v19573_v54 }
 0x3cc   :  { %15350 = vmatpush3.bf16.msk.msra.mxu0 %vm17760_vm6, %v19988_v36  ;;  %15365 = vmatprep.subr.msk.bf16.mxu1 %vm17760_vm6, %v20020_v3  ;;  %v7074_v44 = vpop.xlane.xlu0 %7073  ;;  %v7318_v51 = vmul.f32 %v15876_v12, %v19577_v55 }
 0x3cd   :  { %15359 = vmatprep.subr.msk.bf16.mxu0 %vm17760_vm6, %v20024_v8  ;;  %15885 = vrcp.f32 %v7074_v44  ;;  %v7068_v45 = vpop.xlane.xlu1 %7067 }
 0x3ce   :  { %v15878_v42 = vpop.eup %15877  ;;  %15887 = vrcp.f32 %v7068_v45 }
 0x3cf   :  { %v15880_v60 = vpop.eup %15879  ;;  %v7320_v14 = vmul.f32 %v15878_v42, %v19590_v47 }
 0x3d0   :  { %v7316_v36 = vmul.f32 %v15880_v60, %v19598_v24 }
 0x3d1   :  { %14584 = vmatprep.mubr.msk.f32.mxu1 %vm5921_vm3, %v7320_v14 }
 0x3d2   :  { %14577 = vmatprep.mubr.msk.f32.mxu0 %vm5921_vm3, %v7316_v36  ;;  %14585 = vmatmul.mubr.msk.f32.vlgmr.msra.gmra.mrb[124].mxu1 %vm5921_vm3, %v7322_v32 }
 0x3d3   :  { %14578 = vmatmul.mubr.msk.f32.vlgmr.msra.gmra.mrb[124].mxu0 %vm5921_vm3, %v7318_v51  ;;  %15368 = vmatpush3.bf16.msk.msra.mxu1 %vm17760_vm6, %v20020_v3  ;;  %v15882_v31 = vpop.eup %15881 }
 0x3d4   :  { %15362 = vmatpush3.bf16.msk.msra.mxu0 %vm17760_vm6, %v20024_v8  ;;  %v15884_v54 = vpop.eup %15883  ;;  %v14278_v47 = vpop.f32.mrb[80].mxu1  ;;  %v7328_v55 = vmul.f32 %v15882_v31, %v19637_v62  ;;  %v21317_v8 = vld [vmem:[#allocation47_spill] sm:$0xff] }
 0x3d5   :  { %v14271_v24 = vpop.f32.mrb[80].mxu0  ;;  %12648 = vst.msk [vmem:[%s20615_s9 + $0x118] sm:$0xf] %vm12613_vm7, %v14278_v47  ;;  %v8829_v61 = vpop.f32.mrb[81].mxu1  ;;  %v7324_v56 = vmul.f32 %v15884_v54, %v21316_v26 }
 0x3d6   :  { %12646 = vst.msk [vmem:[%s20615_s9 + $0x108] sm:$0xf] %vm12613_vm7, %v14271_v24  ;;  %v8748_v4 = vpop.f32.mrb[81].mxu0  ;;  %14598 = vmatprep.mubr.msk.f32.mxu1 %vm5921_vm3, %v7328_v55 }
 0x3d7   :  { %12647 = vst.msk [vmem:[%s20615_s9 + $0x110] sm:$0xff] %vm384_vm0, %v8829_v61  ;;  %v15886_v62 = vpop.eup %15885  ;;  %12645 = vst.msk [vmem:[%s20615_s9 + $0x100] sm:$0xff] %vm384_vm0, %v8748_v4  ;;  %14591 = vmatprep.mubr.msk.f32.mxu0 %vm5921_vm3, %v7324_v56 }
 0x3d8   :  { %v15888_v3 = vpop.eup %15887  ;;  %v7330_v21 = vmul.f32 %v15886_v62, %v21317_v8 }
 0x3d9   :  { %v7326_v6 = vmul.f32 %v15888_v3, %v21318_v57 }
 0x3da   :  { %14599 = vmatmul.mubr.msk.f32.vlgmr.msra.gmra.mrb[126].mxu1 %vm5921_vm3, %v7330_v21 }
 0x3db   :  { %14592 = vmatmul.mubr.msk.f32.vlgmr.msra.gmra.mrb[126].mxu0 %vm5921_vm3, %v7326_v6 }
 0x3e4   :  { %v14292_v59 = vpop.f32.mrb[82].mxu1 }
 0x3e5   :  { %v14285_v29 = vpop.f32.mrb[82].mxu0  ;;  %12652 = vst.msk [vmem:[%s20615_s9 + $0x138] sm:$0xf] %vm12613_vm7, %v14292_v59  ;;  %v8991_v48 = vpop.f32.mrb[83].mxu1 }
 0x3e6   :  { %12650 = vst.msk [vmem:[%s20615_s9 + $0x128] sm:$0xf] %vm12613_vm7, %v14285_v29  ;;  %v8910_v1 = vpop.f32.mrb[83].mxu0 }
 0x3e7   :  { %12651 = vst.msk [vmem:[%s20615_s9 + $0x130] sm:$0xff] %vm384_vm0, %v8991_v48  ;;  %12649 = vst.msk [vmem:[%s20615_s9 + $0x120] sm:$0xff] %vm384_vm0, %v8910_v1 }
 0x3f4   :  { %v14306_v41 = vpop.f32.mrb[84].mxu1 }
 0x3f5   :  { %v14299_v20 = vpop.f32.mrb[84].mxu0  ;;  %12656 = vst.msk [vmem:[%s20615_s9 + $0x158] sm:$0xf] %vm12613_vm7, %v14306_v41  ;;  %v9153_v13 = vpop.f32.mrb[85].mxu1 }
 0x3f6   :  { %12654 = vst.msk [vmem:[%s20615_s9 + $0x148] sm:$0xf] %vm12613_vm7, %v14299_v20  ;;  %v9072_v2 = vpop.f32.mrb[85].mxu0 }
 0x3f7   :  { %12655 = vst.msk [vmem:[%s20615_s9 + $0x150] sm:$0xff] %vm384_vm0, %v9153_v13  ;;  %12653 = vst.msk [vmem:[%s20615_s9 + $0x140] sm:$0xff] %vm384_vm0, %v9072_v2 }
 0x404   :  { %v14320_v34 = vpop.f32.mrb[86].mxu1 }
 0x405   :  { %v14313_v16 = vpop.f32.mrb[86].mxu0  ;;  %12660 = vst.msk [vmem:[%s20615_s9 + $0x178] sm:$0xf] %vm12613_vm7, %v14320_v34  ;;  %v9315_v19 = vpop.f32.mrb[87].mxu1 }
 0x406   :  { %12658 = vst.msk [vmem:[%s20615_s9 + $0x168] sm:$0xf] %vm12613_vm7, %v14313_v16  ;;  %v9234_v9 = vpop.f32.mrb[87].mxu0 }
 0x407   :  { %12659 = vst.msk [vmem:[%s20615_s9 + $0x170] sm:$0xff] %vm384_vm0, %v9315_v19  ;;  %12657 = vst.msk [vmem:[%s20615_s9 + $0x160] sm:$0xff] %vm384_vm0, %v9234_v9 }
 0x414   :  { %v14334_v58 = vpop.f32.mrb[88].mxu1 }
 0x415   :  { %v14327_v33 = vpop.f32.mrb[88].mxu0  ;;  %12664 = vst.msk [vmem:[%s20615_s9 + $0x198] sm:$0xf] %vm12613_vm7, %v14334_v58  ;;  %v9477_v23 = vpop.f32.mrb[89].mxu1 }
 0x416   :  { %12662 = vst.msk [vmem:[%s20615_s9 + $0x188] sm:$0xf] %vm12613_vm7, %v14327_v33  ;;  %v9396_v15 = vpop.f32.mrb[89].mxu0 }
 0x417   :  { %12663 = vst.msk [vmem:[%s20615_s9 + $0x190] sm:$0xff] %vm384_vm0, %v9477_v23  ;;  %12661 = vst.msk [vmem:[%s20615_s9 + $0x180] sm:$0xff] %vm384_vm0, %v9396_v15 }
 0x41c   :  { %v14348_v7 = vpop.f32.mrb[90].mxu1 }
 0x41d   :  { %v14341_v25 = vpop.f32.mrb[90].mxu0  ;;  %12668 = vst.msk [vmem:[%s20615_s9 + $0x1b8] sm:$0xf] %vm12613_vm7, %v14348_v7  ;;  %v9639_v53 = vpop.f32.mrb[91].mxu1 }
 0x41e   :  { %12666 = vst.msk [vmem:[%s20615_s9 + $0x1a8] sm:$0xf] %vm12613_vm7, %v14341_v25  ;;  %v9558_v28 = vpop.f32.mrb[91].mxu0 }
 0x41f   :  { %12667 = vst.msk [vmem:[%s20615_s9 + $0x1b0] sm:$0xff] %vm384_vm0, %v9639_v53  ;;  %12665 = vst.msk [vmem:[%s20615_s9 + $0x1a0] sm:$0xff] %vm384_vm0, %v9558_v28 }
 0x424   :  { %v14362_v17 = vpop.f32.mrb[92].mxu1 }
 0x425   :  { %v14355_v30 = vpop.f32.mrb[92].mxu0  ;;  %12672 = vst.msk [vmem:[%s20615_s9 + $0x1d8] sm:$0xf] %vm12613_vm7, %v14362_v17  ;;  %v9801_v0 = vpop.f32.mrb[93].mxu1 }
 0x426   :  { %12670 = vst.msk [vmem:[%s20615_s9 + $0x1c8] sm:$0xf] %vm12613_vm7, %v14355_v30  ;;  %v9720_v18 = vpop.f32.mrb[93].mxu0 }
 0x427   :  { %12671 = vst.msk [vmem:[%s20615_s9 + $0x1d0] sm:$0xff] %vm384_vm0, %v9801_v0  ;;  %12669 = vst.msk [vmem:[%s20615_s9 + $0x1c0] sm:$0xff] %vm384_vm0, %v9720_v18 }
 0x42d   :  { %v14376_v63 = vpop.f32.mrb[94].mxu1 }
 0x42e   :  { %v14369_v37 = vpop.f32.mrb[94].mxu0  ;;  %12676 = vst.msk [vmem:[%s20615_s9 + $0x1f8] sm:$0xf] %vm12613_vm7, %v14376_v63  ;;  %v9963_v39 = vpop.f32.mrb[95].mxu1 }
 0x42f   :  { %12674 = vst.msk [vmem:[%s20615_s9 + $0x1e8] sm:$0xf] %vm12613_vm7, %v14369_v37  ;;  %v9882_v50 = vpop.f32.mrb[95].mxu0 }
 0x430   :  { %12675 = vst.msk [vmem:[%s20615_s9 + $0x1f0] sm:$0xff] %vm384_vm0, %v9963_v39  ;;  %12673 = vst.msk [vmem:[%s20615_s9 + $0x1e0] sm:$0xff] %vm384_vm0, %v9882_v50 }
 0x435   :  { %v14390_v49 = vpop.f32.mrb[96].mxu1 }
 0x436   :  { %v14383_v35 = vpop.f32.mrb[96].mxu0  ;;  %12680 = vst.msk [vmem:[%s20615_s9 + $0x218] sm:$0xf] %vm12613_vm7, %v14390_v49  ;;  %v10131_v27 = vpop.f32.mrb[97].mxu1 }
 0x437   :  { %12678 = vst.msk [vmem:[%s20615_s9 + $0x208] sm:$0xf] %vm12613_vm7, %v14383_v35  ;;  %v10047_v5 = vpop.f32.mrb[97].mxu0 }
 0x438   :  { %12679 = vst.msk [vmem:[%s20615_s9 + $0x210] sm:$0xff] %vm384_vm0, %v10131_v27  ;;  %12677 = vst.msk [vmem:[%s20615_s9 + $0x200] sm:$0xff] %vm384_vm0, %v10047_v5 }
 0x43d   :  { %v14404_v52 = vpop.f32.mrb[98].mxu1 }
 0x43e   :  { %v14397_v38 = vpop.f32.mrb[98].mxu0  ;;  %12684 = vst.msk [vmem:[%s20615_s9 + $0x238] sm:$0xf] %vm12613_vm7, %v14404_v52  ;;  %v10299_v40 = vpop.f32.mrb[99].mxu1 }
 0x43f   :  { %12682 = vst.msk [vmem:[%s20615_s9 + $0x228] sm:$0xf] %vm12613_vm7, %v14397_v38  ;;  %v10215_v10 = vpop.f32.mrb[99].mxu0 }
 0x440   :  { %12683 = vst.msk [vmem:[%s20615_s9 + $0x230] sm:$0xff] %vm384_vm0, %v10299_v40  ;;  %12681 = vst.msk [vmem:[%s20615_s9 + $0x220] sm:$0xff] %vm384_vm0, %v10215_v10 }
 0x445   :  { %v14418_v43 = vpop.f32.mrb[100].mxu1 }
 0x446   :  { %v14411_v22 = vpop.f32.mrb[100].mxu0  ;;  %12688 = vst.msk [vmem:[%s20615_s9 + $0x258] sm:$0xf] %vm12613_vm7, %v14418_v43  ;;  %v10467_v46 = vpop.f32.mrb[101].mxu1 }
 0x447   :  { %12686 = vst.msk [vmem:[%s20615_s9 + $0x248] sm:$0xf] %vm12613_vm7, %v14411_v22  ;;  %v10383_v11 = vpop.f32.mrb[101].mxu0 }
 0x448   :  { %12687 = vst.msk [vmem:[%s20615_s9 + $0x250] sm:$0xff] %vm384_vm0, %v10467_v46  ;;  %12685 = vst.msk [vmem:[%s20615_s9 + $0x240] sm:$0xff] %vm384_vm0, %v10383_v11 }
 0x44d   :  { %v14432_v12 = vpop.f32.mrb[102].mxu1 }
 0x44e   :  { %v14425_v44 = vpop.f32.mrb[102].mxu0  ;;  %12692 = vst.msk [vmem:[%s20615_s9 + $0x278] sm:$0xf] %vm12613_vm7, %v14432_v12  ;;  %v10635_v42 = vpop.f32.mrb[103].mxu1 }
 0x44f   :  { %12690 = vst.msk [vmem:[%s20615_s9 + $0x268] sm:$0xf] %vm12613_vm7, %v14425_v44  ;;  %v10551_v45 = vpop.f32.mrb[103].mxu0 }
 0x450   :  { %12691 = vst.msk [vmem:[%s20615_s9 + $0x270] sm:$0xff] %vm384_vm0, %v10635_v42  ;;  %12689 = vst.msk [vmem:[%s20615_s9 + $0x260] sm:$0xff] %vm384_vm0, %v10551_v45 }
 0x455   :  { %v14446_v60 = vpop.f32.mrb[104].mxu1 }
 0x456   :  { %v14439_v14 = vpop.f32.mrb[104].mxu0  ;;  %12696 = vst.msk [vmem:[%s20615_s9 + $0x298] sm:$0xf] %vm12613_vm7, %v14446_v60  ;;  %v10803_v32 = vpop.f32.mrb[105].mxu1 }
 0x457   :  { %12694 = vst.msk [vmem:[%s20615_s9 + $0x288] sm:$0xf] %vm12613_vm7, %v14439_v14  ;;  %v10719_v36 = vpop.f32.mrb[105].mxu0 }
 0x458   :  { %12695 = vst.msk [vmem:[%s20615_s9 + $0x290] sm:$0xff] %vm384_vm0, %v10803_v32  ;;  %12693 = vst.msk [vmem:[%s20615_s9 + $0x280] sm:$0xff] %vm384_vm0, %v10719_v36 }
 0x45d   :  { %v14460_v51 = vpop.f32.mrb[106].mxu1 }
 0x45e   :  { %v14453_v31 = vpop.f32.mrb[106].mxu0  ;;  %12700 = vst.msk [vmem:[%s20615_s9 + $0x2b8] sm:$0xf] %vm12613_vm7, %v14460_v51  ;;  %v10971_v54 = vpop.f32.mrb[107].mxu1 }
 0x45f   :  { %12698 = vst.msk [vmem:[%s20615_s9 + $0x2a8] sm:$0xf] %vm12613_vm7, %v14453_v31  ;;  %v10887_v47 = vpop.f32.mrb[107].mxu0 }
 0x460   :  { %12699 = vst.msk [vmem:[%s20615_s9 + $0x2b0] sm:$0xff] %vm384_vm0, %v10971_v54  ;;  %12697 = vst.msk [vmem:[%s20615_s9 + $0x2a0] sm:$0xff] %vm384_vm0, %v10887_v47 }
 0x465   :  { %v14474_v55 = vpop.f32.mrb[108].mxu1 }
 0x466   :  { %v14467_v24 = vpop.f32.mrb[108].mxu0  ;;  %12704 = vst.msk [vmem:[%s20615_s9 + $0x2d8] sm:$0xf] %vm12613_vm7, %v14474_v55  ;;  %v11139_v61 = vpop.f32.mrb[109].mxu1 }
 0x467   :  { %12702 = vst.msk [vmem:[%s20615_s9 + $0x2c8] sm:$0xf] %vm12613_vm7, %v14467_v24  ;;  %v11055_v26 = vpop.f32.mrb[109].mxu0 }
 0x468   :  { %12703 = vst.msk [vmem:[%s20615_s9 + $0x2d0] sm:$0xff] %vm384_vm0, %v11139_v61  ;;  %12701 = vst.msk [vmem:[%s20615_s9 + $0x2c0] sm:$0xff] %vm384_vm0, %v11055_v26 }
 0x46d   :  { %v14488_v56 = vpop.f32.mrb[110].mxu1 }
 0x46e   :  { %v14481_v4 = vpop.f32.mrb[110].mxu0  ;;  %12708 = vst.msk [vmem:[%s20615_s9 + $0x2f8] sm:$0xf] %vm12613_vm7, %v14488_v56  ;;  %v11307_v62 = vpop.f32.mrb[111].mxu1 }
 0x46f   :  { %12706 = vst.msk [vmem:[%s20615_s9 + $0x2e8] sm:$0xf] %vm12613_vm7, %v14481_v4  ;;  %v11223_v3 = vpop.f32.mrb[111].mxu0 }
 0x470   :  { %12707 = vst.msk [vmem:[%s20615_s9 + $0x2f0] sm:$0xff] %vm384_vm0, %v11307_v62  ;;  %12705 = vst.msk [vmem:[%s20615_s9 + $0x2e0] sm:$0xff] %vm384_vm0, %v11223_v3 }
 0x475   :  { %v14502_v8 = vpop.f32.mrb[112].mxu1 }
 0x476   :  { %v14495_v21 = vpop.f32.mrb[112].mxu0  ;;  %12712 = vst.msk [vmem:[%s20615_s9 + $0x318] sm:$0xf] %vm12613_vm7, %v14502_v8  ;;  %v11469_v57 = vpop.f32.mrb[113].mxu1 }
 0x477   :  { %12710 = vst.msk [vmem:[%s20615_s9 + $0x308] sm:$0xf] %vm12613_vm7, %v14495_v21  ;;  %v11388_v6 = vpop.f32.mrb[113].mxu0 }
 0x478   :  { %12711 = vst.msk [vmem:[%s20615_s9 + $0x310] sm:$0xff] %vm384_vm0, %v11469_v57  ;;  %12709 = vst.msk [vmem:[%s20615_s9 + $0x300] sm:$0xff] %vm384_vm0, %v11388_v6 }
 0x47d   :  { %v14516_v59 = vpop.f32.mrb[114].mxu1 }
 0x47e   :  { %v14509_v29 = vpop.f32.mrb[114].mxu0  ;;  %12716 = vst.msk [vmem:[%s20615_s9 + $0x338] sm:$0xf] %vm12613_vm7, %v14516_v59  ;;  %v11631_v48 = vpop.f32.mrb[115].mxu1 }
 0x47f   :  { %12714 = vst.msk [vmem:[%s20615_s9 + $0x328] sm:$0xf] %vm12613_vm7, %v14509_v29  ;;  %v11550_v1 = vpop.f32.mrb[115].mxu0 }
 0x480   :  { %12715 = vst.msk [vmem:[%s20615_s9 + $0x330] sm:$0xff] %vm384_vm0, %v11631_v48  ;;  %12713 = vst.msk [vmem:[%s20615_s9 + $0x320] sm:$0xff] %vm384_vm0, %v11550_v1 }
 0x485   :  { %v14530_v41 = vpop.f32.mrb[116].mxu1 }
 0x486   :  { %v14523_v20 = vpop.f32.mrb[116].mxu0  ;;  %12720 = vst.msk [vmem:[%s20615_s9 + $0x358] sm:$0xf] %vm12613_vm7, %v14530_v41  ;;  %v11793_v13 = vpop.f32.mrb[117].mxu1 }
 0x487   :  { %12718 = vst.msk [vmem:[%s20615_s9 + $0x348] sm:$0xf] %vm12613_vm7, %v14523_v20  ;;  %v11712_v2 = vpop.f32.mrb[117].mxu0 }
 0x488   :  { %12719 = vst.msk [vmem:[%s20615_s9 + $0x350] sm:$0xff] %vm384_vm0, %v11793_v13  ;;  %12717 = vst.msk [vmem:[%s20615_s9 + $0x340] sm:$0xff] %vm384_vm0, %v11712_v2 }
 0x48d   :  { %v14544_v34 = vpop.f32.mrb[118].mxu1 }
 0x48e   :  { %v14537_v16 = vpop.f32.mrb[118].mxu0  ;;  %12724 = vst.msk [vmem:[%s20615_s9 + $0x378] sm:$0xf] %vm12613_vm7, %v14544_v34  ;;  %v11955_v19 = vpop.f32.mrb[119].mxu1 }
 0x48f   :  { %12722 = vst.msk [vmem:[%s20615_s9 + $0x368] sm:$0xf] %vm12613_vm7, %v14537_v16  ;;  %v11874_v9 = vpop.f32.mrb[119].mxu0 }
 0x490   :  { %12723 = vst.msk [vmem:[%s20615_s9 + $0x370] sm:$0xff] %vm384_vm0, %v11955_v19  ;;  %12721 = vst.msk [vmem:[%s20615_s9 + $0x360] sm:$0xff] %vm384_vm0, %v11874_v9 }
 0x495   :  { %v14558_v58 = vpop.f32.mrb[120].mxu1 }
 0x496   :  { %v14551_v33 = vpop.f32.mrb[120].mxu0  ;;  %12728 = vst.msk [vmem:[%s20615_s9 + $0x398] sm:$0xf] %vm12613_vm7, %v14558_v58  ;;  %v12117_v23 = vpop.f32.mrb[121].mxu1 }
 0x497   :  { %12726 = vst.msk [vmem:[%s20615_s9 + $0x388] sm:$0xf] %vm12613_vm7, %v14551_v33  ;;  %v12036_v15 = vpop.f32.mrb[121].mxu0 }
 0x498   :  { %12727 = vst.msk [vmem:[%s20615_s9 + $0x390] sm:$0xff] %vm384_vm0, %v12117_v23  ;;  %12725 = vst.msk [vmem:[%s20615_s9 + $0x380] sm:$0xff] %vm384_vm0, %v12036_v15 }
 0x49d   :  { %v14572_v7 = vpop.f32.mrb[122].mxu1 }
 0x49e   :  { %v14565_v25 = vpop.f32.mrb[122].mxu0  ;;  %12732 = vst.msk [vmem:[%s20615_s9 + $0x3b8] sm:$0xf] %vm12613_vm7, %v14572_v7  ;;  %v12279_v53 = vpop.f32.mrb[123].mxu1 }
 0x49f   :  { %12730 = vst.msk [vmem:[%s20615_s9 + $0x3a8] sm:$0xf] %vm12613_vm7, %v14565_v25  ;;  %v12198_v28 = vpop.f32.mrb[123].mxu0 }
 0x4a0   :  { %12731 = vst.msk [vmem:[%s20615_s9 + $0x3b0] sm:$0xff] %vm384_vm0, %v12279_v53  ;;  %12729 = vst.msk [vmem:[%s20615_s9 + $0x3a0] sm:$0xff] %vm384_vm0, %v12198_v28 }
 0x4a5   :  { %v14586_v17 = vpop.f32.mrb[124].mxu1 }
 0x4a6   :  { %v14579_v30 = vpop.f32.mrb[124].mxu0  ;;  %12736 = vst.msk [vmem:[%s20615_s9 + $0x3d8] sm:$0xf] %vm12613_vm7, %v14586_v17  ;;  %v12441_v0 = vpop.f32.mrb[125].mxu1 }
 0x4a7   :  { %12734 = vst.msk [vmem:[%s20615_s9 + $0x3c8] sm:$0xf] %vm12613_vm7, %v14579_v30  ;;  %v12360_v18 = vpop.f32.mrb[125].mxu0 }
 0x4a8   :  { %12735 = vst.msk [vmem:[%s20615_s9 + $0x3d0] sm:$0xff] %vm384_vm0, %v12441_v0  ;;  %12733 = vst.msk [vmem:[%s20615_s9 + $0x3c0] sm:$0xff] %vm384_vm0, %v12360_v18 }
 0x4ad   :  { %v14600_v63 = vpop.f32.mrb[126].mxu1 }
 0x4ae   :  { %v14593_v37 = vpop.f32.mrb[126].mxu0  ;;  %12740 = vst.msk [vmem:[%s20615_s9 + $0x3f8] sm:$0xf] %vm12613_vm7, %v14600_v63  ;;  %v12603_v39 = vpop.f32.mrb[127].mxu1 }
 0x4af   :  { %12738 = vst.msk [vmem:[%s20615_s9 + $0x3e8] sm:$0xf] %vm12613_vm7, %v14593_v37  ;;  %v12522_v50 = vpop.f32.mrb[127].mxu0 }
 0x4b0   :  { %12739 = vst.msk [vmem:[%s20615_s9 + $0x3f0] sm:$0xff] %vm384_vm0, %v12603_v39  ;;  %12737 = vst.msk [vmem:[%s20615_s9 + $0x3e0] sm:$0xff] %vm384_vm0, %v12522_v50 }

</bundles_post_ra>
